<compile_context>
chip_gen: v6e
topology: v6e:2x2x1
jax: 0.10.0
libtpu: 0.0.40
codegen_flags: <defaults>
</compile_context>

<pallas_src>
import jax
import jax.numpy as jnp
from jax.experimental import pallas as pl
from jax.experimental.pallas import tpu as pltpu

# Head output sizes fixed by the PyTorch HyperNetwork module definition.
HEAD_SIZES = (1152, 4160, 390, 390, 1536, 4160, 65, 1536, 4160, 65)
HEAD_NAMES = (
    "actor_fc1", "actor_fc2", "actor_mean", "actor_logstd",
    "critic_q1_fc1", "critic_q1_fc2", "critic_q1_fc3",
    "critic_q2_fc1", "critic_q2_fc2", "critic_q2_fc3",
)
TOTAL_HEAD = sum(HEAD_SIZES)        # 17614
LANE = 128
BATCH_BLOCK = 64                    # max rows per grid step (multiple of 8)
# Column-tile candidates (multiples of 128 that divide 17664 = round_up(17614, 128)).
_COL_TILE_CANDIDATES = (17664, 8832, 5888, 2944, 768, 384, 256, 128)
_HEAD_W_BLOCK_BUDGET = 8 * 1024 * 1024   # ~8 MiB per head-weight block (x2 buffered)


def _round_up(x, m):
    return ((x + m - 1) // m) * m


def _pick_col_block(tt_rows):
    """Largest lane-dense column tile whose weight block stays under budget."""
    for cand in _COL_TILE_CANDIDATES:
        if cand * tt_rows * 4 <= _HEAD_W_BLOCK_BUDGET:
            return cand
    return LANE


def _hyper_kernel(emb_ref, wt1_ref, bt1_ref, wt2_ref, bt2_ref, wh_ref, bh_ref,
                  out_ref, h_scratch):
    # Trunk is computed once per batch block (first column block only) and
    # kept resident in VMEM scratch for all head-column blocks.
    @pl.when(pl.program_id(1) == 0)
    def _():
        # layer 1: (Bblk, L) @ (L, T) + (1, T) -> ReLU
        h = jnp.dot(emb_ref[...], wt1_ref[...],
                    preferred_element_type=jnp.float32)
        h = jnp.maximum(h + bt1_ref[...], 0.0)
        # layer 2: (Bblk, T) @ (T, 2T) + (1, 2T) -> ReLU
        h = jnp.dot(h, wt2_ref[...], preferred_element_type=jnp.float32)
        h_scratch[...] = jnp.maximum(h + bt2_ref[...], 0.0)

    # Fused heads, one lane-dense column tile at a time:
    # (Bblk, 2T) @ (2T, n_blk) + (1, n_blk)
    out = jnp.dot(h_scratch[...], wh_ref[...],
                  preferred_element_type=jnp.float32)
    out_ref[...] = (out + bh_ref[...]).astype(out_ref.dtype)


def hypernetwork_forward(embedding, trunk1_w, trunk1_b, trunk2_w, trunk2_b,
                         head_ws, head_bs):
    """Forward pass of the PyTorch HyperNetwork.

    Args (PyTorch nn.Linear layout):
      embedding : (B, latent_dim)
      trunk1_w  : (T, latent_dim),   trunk1_b : (T,)
      trunk2_w  : (2T, T),           trunk2_b : (2T,)
      head_ws[i]: (HEAD_SIZES[i], 2T), head_bs[i]: (HEAD_SIZES[i],)
    Returns the 10 head outputs, each (B, HEAD_SIZES[i]).
    """
    B, L = embedding.shape
    T = trunk1_w.shape[0]
    TT = 2 * T

    # --- wrapper-side layout plumbing (done once; no in-kernel transposes) ---
    wt1 = trunk1_w.T                                       # (L, T)
    bt1 = trunk1_b.reshape(1, T)
    wt2 = trunk2_w.T                                       # (T, 2T)
    bt2 = trunk2_b.reshape(1, TT)
    wh = jnp.concatenate([w.T for w in head_ws], axis=1)   # (2T, TOTAL_HEAD)
    bh = jnp.concatenate(head_bs).reshape(1, TOTAL_HEAD)

    # --- head-column tiling (lane-dense, padded to a multiple of the tile) ---
    n_blk = _pick_col_block(TT)
    n_pad = _round_up(TOTAL_HEAD, n_blk)
    pad_cols = n_pad - TOTAL_HEAD
    if pad_cols:
        wh = jnp.pad(wh, ((0, 0), (0, pad_cols)))
        bh = jnp.pad(bh, ((0, 0), (0, pad_cols)))

    # --- batch tiling: block multiple of 8, padded batch ---
    b_blk = min(BATCH_BLOCK, _round_up(B, 8))
    b_pad = _round_up(B, b_blk)
    emb = embedding
    if b_pad != B:
        emb = jnp.pad(emb, ((0, b_pad - B), (0, 0)))

    grid = (b_pad // b_blk, n_pad // n_blk)

    fused = pl.pallas_call(
        _hyper_kernel,
        out_shape=jax.ShapeDtypeStruct((b_pad, n_pad), jnp.float32),
        grid=grid,
        in_specs=[
            pl.BlockSpec((b_blk, L), lambda i, j: (i, 0)),   # embedding
            pl.BlockSpec((L, T), lambda i, j: (0, 0)),       # wt1 (resident)
            pl.BlockSpec((1, T), lambda i, j: (0, 0)),       # bt1
            pl.BlockSpec((T, TT), lambda i, j: (0, 0)),      # wt2 (resident)
            pl.BlockSpec((1, TT), lambda i, j: (0, 0)),      # bt2
            pl.BlockSpec((TT, n_blk), lambda i, j: (0, j)),  # fused head W tile
            pl.BlockSpec((1, n_blk), lambda i, j: (0, j)),   # fused head b tile
        ],
        out_specs=pl.BlockSpec((b_blk, n_blk), lambda i, j: (i, j)),
        scratch_shapes=[pltpu.VMEM((b_blk, TT), jnp.float32)],  # trunk hidden
        compiler_params=pltpu.CompilerParams(
            dimension_semantics=("parallel", "arbitrary"),
            vmem_limit_bytes=60 * 1024 * 1024,
        ),
    )(emb, wt1, bt1, wt2, bt2, wh, bh)

    fused = fused[:B]
    outs = []
    off = 0
    for sz in HEAD_SIZES:
        outs.append(fused[:, off:off + sz])
        off += sz
    return tuple(outs)


def _reference(embedding, trunk1_w, trunk1_b, trunk2_w, trunk2_b,
               head_ws, head_bs):
    """Pure-JAX reference of the PyTorch forward semantics."""
    h = jnp.maximum(embedding @ trunk1_w.T + trunk1_b, 0.0)
    h = jnp.maximum(h @ trunk2_w.T + trunk2_b, 0.0)
    return tuple(h @ w.T + b for w, b in zip(head_ws, head_bs))


if __name__ == "__main__":
    # Small, deterministic shapes consistent with the module
    # (latent_dim and trunk_dim are constructor args; head sizes are fixed).
    latent_dim, trunk_dim, batch = 32, 64, 2

    key = jax.random.PRNGKey(0)
    ks = jax.random.split(key, 5 + 2 * len(HEAD_SIZES))
    it = iter(ks)

    emb = jax.random.normal(next(it), (batch, latent_dim), dtype=jnp.float32)
    t1w = 0.05 * jax.random.normal(next(it), (trunk_dim, latent_dim), jnp.float32)
    t1b = 0.05 * jax.random.normal(next(it), (trunk_dim,), jnp.float32)
    t2w = 0.05 * jax.random.normal(next(it), (2 * trunk_dim, trunk_dim), jnp.float32)
    t2b = 0.05 * jax.random.normal(next(it), (2 * trunk_dim,), jnp.float32)

    head_ws, head_bs = [], []
    for sz in HEAD_SIZES:
        head_ws.append(0.05 * jax.random.normal(next(it), (sz, 2 * trunk_dim),
                                                jnp.float32))
        head_bs.append(0.05 * jax.random.normal(next(it), (sz,), jnp.float32))

    outs = hypernetwork_forward(emb, t1w, t1b, t2w, t2b, head_ws, head_bs)
    jax.block_until_ready(outs)

    refs = _reference(emb, t1w, t1b, t2w, t2b, head_ws, head_bs)
    for name, sz, o, r in zip(HEAD_NAMES, HEAD_SIZES, outs, refs):
        assert o.shape == (batch, sz), (name, o.shape)
        assert jnp.allclose(o, r, atol=1e-3, rtol=1e-3), name

    print("KERNEL_OK")
</pallas_src>

<mosaic_0001>
module attributes {stable_mosaic.version = 11 : i64} {
  func.func @_hyper_kernel(%arg0: i32, %arg1: i32, %arg2: memref<8x32xf32, #tpu.memory_space<vmem>>, %arg3: memref<32x64xf32, #tpu.memory_space<vmem>>, %arg4: memref<1x64xf32, #tpu.memory_space<vmem>>, %arg5: memref<64x128xf32, #tpu.memory_space<vmem>>, %arg6: memref<1x128xf32, #tpu.memory_space<vmem>>, %arg7: memref<128x8832xf32, #tpu.memory_space<vmem>>, %arg8: memref<1x8832xf32, #tpu.memory_space<vmem>>, %arg9: memref<8x8832xf32, #tpu.memory_space<vmem>>, %arg10: memref<8x128xf32, #tpu.memory_space<vmem>>) attributes {dimension_semantics = [#tpu.dimension_semantics<parallel>, #tpu.dimension_semantics<arbitrary>], iteration_bounds = array<i64: 1, 2>, scalar_prefetch = 0 : i64, scratch_operands = 1 : i64, tpu.core_type = #tpu.core_type<tc>, window_params = [{transform_indices = @transform_0, window_bounds = array<i64: 8, 32>}, {pipeline_mode = #tpu.pipeline_mode<synchronous>, transform_indices = @transform_1, window_bounds = array<i64: 32, 64>}, {pipeline_mode = #tpu.pipeline_mode<synchronous>, transform_indices = @transform_2, window_bounds = array<i64: 1, 64>}, {pipeline_mode = #tpu.pipeline_mode<synchronous>, transform_indices = @transform_3, window_bounds = array<i64: 64, 128>}, {pipeline_mode = #tpu.pipeline_mode<synchronous>, transform_indices = @transform_4, window_bounds = array<i64: 1, 128>}, {transform_indices = @transform_5, window_bounds = array<i64: 128, 8832>}, {transform_indices = @transform_6, window_bounds = array<i64: 1, 8832>}, {transform_indices = @transform_7, window_bounds = array<i64: 8, 8832>}]} {
    %c0_i32 = arith.constant 0 : i32
    %0 = arith.cmpi eq, %arg1, %c0_i32 : i32
    %1 = arith.extui %0 : i1 to i32
    %c0_i32_0 = arith.constant 0 : i32
    %2 = arith.cmpi ne, %1, %c0_i32_0 : i32
    scf.if %2 {
      %c0_8 = arith.constant 0 : index
      %c0_9 = arith.constant 0 : index
      %10 = vector.load %arg2[%c0_8, %c0_9] : memref<8x32xf32, #tpu.memory_space<vmem>>, vector<8x32xf32>
      %c0_10 = arith.constant 0 : index
      %c0_11 = arith.constant 0 : index
      %11 = vector.load %arg3[%c0_10, %c0_11] : memref<32x64xf32, #tpu.memory_space<vmem>>, vector<32x64xf32>
      %cst_12 = arith.constant dense<0.000000e+00> : vector<8x64xf32>
      %12 = tpu.matmul %10, %11, %cst_12 {dimension_numbers = #tpu.dot_dimension_numbers<[1], [0], [0], [1], [0, 0, 1, 1], [], []>} : vector<8x32xf32>, vector<32x64xf32>, vector<8x64xf32> -> vector<8x64xf32>
      %c0_13 = arith.constant 0 : index
      %c0_14 = arith.constant 0 : index
      %13 = vector.load %arg4[%c0_13, %c0_14] : memref<1x64xf32, #tpu.memory_space<vmem>>, vector<1x64xf32>
      %14 = vector.broadcast %13 : vector<1x64xf32> to vector<8x64xf32>
      %15 = arith.addf %12, %14 : vector<8x64xf32>
      %cst_15 = arith.constant 0.000000e+00 : f32
      %16 = vector.broadcast %cst_15 : f32 to vector<8x64xf32>
      %17 = arith.maximumf %15, %16 : vector<8x64xf32>
      %c0_16 = arith.constant 0 : index
      %c0_17 = arith.constant 0 : index
      %18 = vector.load %arg5[%c0_16, %c0_17] : memref<64x128xf32, #tpu.memory_space<vmem>>, vector<64x128xf32>
      %cst_18 = arith.constant dense<0.000000e+00> : vector<8x128xf32>
      %19 = tpu.matmul %17, %18, %cst_18 {dimension_numbers = #tpu.dot_dimension_numbers<[1], [0], [0], [1], [0, 0, 1, 1], [], []>} : vector<8x64xf32>, vector<64x128xf32>, vector<8x128xf32> -> vector<8x128xf32>
      %c0_19 = arith.constant 0 : index
      %c0_20 = arith.constant 0 : index
      %20 = vector.load %arg6[%c0_19, %c0_20] : memref<1x128xf32, #tpu.memory_space<vmem>>, vector<1x128xf32>
      %21 = vector.broadcast %20 : vector<1x128xf32> to vector<8x128xf32>
      %22 = arith.addf %19, %21 : vector<8x128xf32>
      %cst_21 = arith.constant 0.000000e+00 : f32
      %23 = vector.broadcast %cst_21 : f32 to vector<8x128xf32>
      %24 = arith.maximumf %22, %23 : vector<8x128xf32>
      %c0_22 = arith.constant 0 : index
      %c0_23 = arith.constant 0 : index
      %25 = vector.load %arg10[%c0_22, %c0_23] : memref<8x128xf32, #tpu.memory_space<vmem>>, vector<8x128xf32>
      tpu.vector_store %arg10[%c0_22, %c0_23], %24 {strides = array<i32>} : memref<8x128xf32, #tpu.memory_space<vmem>>, vector<8x128xf32>,
    } else {
    }
    %c0 = arith.constant 0 : index
    %c0_1 = arith.constant 0 : index
    %3 = vector.load %arg10[%c0, %c0_1] : memref<8x128xf32, #tpu.memory_space<vmem>>, vector<8x128xf32>
    %c0_2 = arith.constant 0 : index
    %c0_3 = arith.constant 0 : index
    %4 = vector.load %arg7[%c0_2, %c0_3] : memref<128x8832xf32, #tpu.memory_space<vmem>>, vector<128x8832xf32>
    %cst = arith.constant dense<0.000000e+00> : vector<8x8832xf32>
    %5 = tpu.matmul %3, %4, %cst {dimension_numbers = #tpu.dot_dimension_numbers<[1], [0], [0], [1], [0, 0, 1, 1], [], []>} : vector<8x128xf32>, vector<128x8832xf32>, vector<8x8832xf32> -> vector<8x8832xf32>
    %c0_4 = arith.constant 0 : index
    %c0_5 = arith.constant 0 : index
    %6 = vector.load %arg8[%c0_4, %c0_5] : memref<1x8832xf32, #tpu.memory_space<vmem>>, vector<1x8832xf32>
    %7 = vector.broadcast %6 : vector<1x8832xf32> to vector<8x8832xf32>
    %8 = arith.addf %5, %7 : vector<8x8832xf32>
    %c0_6 = arith.constant 0 : index
    %c0_7 = arith.constant 0 : index
    %9 = vector.load %arg9[%c0_6, %c0_7] : memref<8x8832xf32, #tpu.memory_space<vmem>>, vector<8x8832xf32>
    tpu.vector_store %arg9[%c0_6, %c0_7], %8 {strides = array<i32>} : memref<8x8832xf32, #tpu.memory_space<vmem>>, vector<8x8832xf32>,
    return
  }
  func.func @transform_0(%arg0: i32, %arg1: i32) -> (i32, i32) {
    %c0_i32 = arith.constant 0 : i32
    %c0_i32_0 = arith.constant 0 : i32
    return %arg0, %c0_i32 : i32, i32
  }
  func.func @transform_1(%arg0: i32, %arg1: i32) -> (i32, i32) {
    %c0_i32 = arith.constant 0 : i32
    %c0_i32_0 = arith.constant 0 : i32
    %c0_i32_1 = arith.constant 0 : i32
    return %c0_i32, %c0_i32_0 : i32, i32
  }
  func.func @transform_2(%arg0: i32, %arg1: i32) -> (i32, i32) {
    %c0_i32 = arith.constant 0 : i32
    %c0_i32_0 = arith.constant 0 : i32
    %c0_i32_1 = arith.constant 0 : i32
    return %c0_i32, %c0_i32_0 : i32, i32
  }
  func.func @transform_3(%arg0: i32, %arg1: i32) -> (i32, i32) {
    %c0_i32 = arith.constant 0 : i32
    %c0_i32_0 = arith.constant 0 : i32
    %c0_i32_1 = arith.constant 0 : i32
    return %c0_i32, %c0_i32_0 : i32, i32
  }
  func.func @transform_4(%arg0: i32, %arg1: i32) -> (i32, i32) {
    %c0_i32 = arith.constant 0 : i32
    %c0_i32_0 = arith.constant 0 : i32
    %c0_i32_1 = arith.constant 0 : i32
    return %c0_i32, %c0_i32_0 : i32, i32
  }
  func.func @transform_5(%arg0: i32, %arg1: i32) -> (i32, i32) {
    %c0_i32 = arith.constant 0 : i32
    %c0_i32_0 = arith.constant 0 : i32
    return %c0_i32, %arg1 : i32, i32
  }
  func.func @transform_6(%arg0: i32, %arg1: i32) -> (i32, i32) {
    %c0_i32 = arith.constant 0 : i32
    %c0_i32_0 = arith.constant 0 : i32
    return %c0_i32, %arg1 : i32, i32
  }
  func.func @transform_7(%arg0: i32, %arg1: i32) -> (i32, i32) {
    %c0_i32 = arith.constant 0 : i32
    return %arg0, %arg1 : i32, i32
  }
}

</mosaic_0001>

<bundles_post_ra>
// kernel: tpu_custom_call.1
= control target key start
LH: loop header
LB: loop body
LE: loop exit
PB: predicated region body
PF: predicated region fallthrough
CT: control target
= control target key end

     0   :  { %s7060_s0 = inlined_call_operand.hbm [shape: f32[8,32], index: 0, kind: input, shape index: {}]   ;;  %s7061_s1 = inlined_call_operand.hbm [shape: f32[32,64], index: 1, kind: input, shape index: {}]   ;;  %s7062_s2 = inlined_call_operand.hbm [shape: f32[1,64], index: 2, kind: input, shape index: {}]   ;;  %s7063_s3 = inlined_call_operand.hbm [shape: f32[64,128], index: 3, kind: input, shape index: {}]   ;;  %s7064_s4 = inlined_call_operand.hbm [shape: f32[1,128], index: 4, kind: input, shape index: {}]   ;;  %s7065_s5 = inlined_call_operand.hbm [shape: f32[128,17664], index: 5, kind: input, shape index: {}]   ;;  %s7066_s6 = inlined_call_operand.hbm [shape: f32[1,17664], index: 6, kind: input, shape index: {}]   ;;  %s7067_s7 = inlined_call_operand.hbm [shape: f32[8,17664], index: 7, kind: output, shape index: {}]  }
   0x1   :  { %7074 = sst [smem:[#allocation24_spill]] %s7061_s1 }
   0x2   :  { %7075 = sst [smem:[#allocation25_spill]] %s7063_s3 }
   0x3   :  { %7076 = sst [smem:[#allocation26_spill]] %s7065_s5 }
   0x4   :  { %12 = vsyncpa [#allocation4], 0 }
   0x5   :  { %13 = vsyncpa [#allocation7], 0 }
   0x6   :  { %14 = vsyncpa [#allocation10], 0 }
   0x7   :  { %15 = vsyncpa [#allocation13], 0 }
   0x8   :  { %17 = vsyncpa [#allocation13 + $0x1], 0 }
   0x9   :  { %18 = vsyncpa [#allocation5], 0 }
   0xa   :  { %20 = vsyncpa [#allocation5 + $0x1], 0  ;;  %s5393_s24 = smov 0   ;;  %s5395_s25 = smov 0  }
   0xb   :  { %s5397_s26 = smov 0   ;;  %s5399_s27 = smov 0  }
   0xc   :  { %s5401_s28 = smov 0   ;;  %s5403_s29 = smov 0  }
   0xd LB: > { %s5424_s30 = sadd.s32 4294967295, %s5334_s29   ;;  %s4797_s8 = sadd.s32 4294967294, %s5334_s29   ;;  %s5334_s29 = sphi %s5403_s29, %s26_s29   ;;  %s5330_s28 = sphi %s5401_s28, %s7109_s28   ;;  %s5326_s27 = sphi %s5399_s27, %s7108_s27   ;;  %s5322_s26 = sphi %s5397_s26, %s7107_s26   ;;  %s5318_s25 = sphi %s5395_s25, %s7106_s25   ;;  %s5314_s24 = sphi %s5393_s24, %s7105_s24  }
   0xe   : > { %p168_p0 = scmp.ne.s32.totalorder %s5318_s25, %s5314_s24  ;;  %p7068_p1 = scmp.eq.s32.totalorder %s5424_s30, 0 }
   0xf   : > { %p226_p3 = scmp.eq.s32.totalorder %s4797_s8, 1  ;;  %p4798_p5 = scmp.ge.s32.totalorder %s5334_s29, 1 }
  0x10   : > { %p5433_p4 = por %p7068_p1, %p168_p0  ;;  %p233_p7 = scmp.lt.s32.totalorder %s5334_s29, 3 }
  0x11   : > { %p5438_p6 = por %p226_p3, %p168_p0  ;;  %s5336_s12 = smov [#allocation6]  }
  0x12   : > { %s7077_s9 = scalar_select %p5433_p4, 1, 0 }
  0x13   : > { %s7078_s10 = scalar_select %p5438_p6, 1, 0 }
  0x14   : > { %p5443_p8 = pnand %p4798_p5, %p233_p7  ;;  %s258_s13 = sshll.u32 %s5336_s12, 4  ;;  %s259_s13 = int_to_ptr.vmem [resolvable:$true] %s258_s13 }
  0x15   : > { %7079 = sst [smem:[#allocation21_spill]] %s7078_s10  ;;  %s5337_s15 = smov [#allocation9]  }
  0x16   : > { %p4951_p9 = pneg %p5443_p8  ;;  %s282_s16 = sshll.u32 %s5337_s15, 4  ;;  %s283_s16 = int_to_ptr.vmem [resolvable:$true] %s282_s16 }
  0x17   : > { %s5067_s18 = scalar_lea.vmem %s259_s13, 512  ;;  %p5075_p5 = scmp.lt.s32.totalorder %s259_s13, %s259_s13 }
  0x18   : > { %p5452_p11 = pnand %p4951_p9, %p7068_p1  ;;  %p5068_p13 = scmp.ne.s32.totalorder %s259_s13, %s5067_s18 }
  0x19   : > { %p5076_p7 = scmp.lt.s32.totalorder %s5067_s18, %s5067_s18 }
  0x1a   : > { %p5458_p12 = pneg %p5452_p11 }
  0x1b   : > { %p5077_p9 = por %p5076_p7, %p5075_p5 }
  0x1c   : > { %p5070_p0 = pnand %p5068_p13, %p5458_p12 }
  0x1e   : > { %p5071_p3 = pneg %p5070_p0 }
  0x20   : > { %p5078_p10 = pnand %p5077_p9, %p5071_p3 }
  0x22   : > { %5081 = shalt.err (!%p5078_p10)
}
  0x23   : > { %s5338_s19 = smov 128   ;;  %s5339_s20 = smov 8  }
  0x24   : > { %s7083_s1 = sld [smem:[#allocation24_spill]]  ;;  %s5093_s23 = scalar_lea.vmem %s283_s16, 1024 }
  0x25   : > { %p5094_p1 = scmp.ne.s32.totalorder %s283_s16, %s5093_s23  ;;  %p5101_p0 = scmp.lt.s32.totalorder %s283_s16, %s283_s16 }
  0x26   : > { %p5102_p6 = scmp.lt.s32.totalorder %s5093_s23, %s5093_s23 }
  0x27   : > { %p5096_p2 = pnand %p5094_p1, %p5458_p12 }
  0x28   : > { %p5103_p4 = por %p5102_p6, %p5101_p0 }
  0x29   : > { %p5097_p13 = pneg %p5096_p2 }
  0x2a   : > { %4957 = dma.hbm_to_vmem [thread:$0]  (!%p5452_p11), %s7083_s1, 512, %s259_s13, [#allocation7], %s5338_s19, %s5338_s19, %s5339_s20  }
  0x2b   : > { %p5104_p5 = pnand %p5103_p4, %p5097_p13 }
  0x2d   : > { %5107 = shalt.err (!%p5104_p5)
}
  0x2e   : > { %s7084_s3 = sld [smem:[#allocation25_spill]]  ;;  %s35_s13 = sadd.s32 1, %s5330_s28 }
  0x2f   : > { %s155_s15 = sadd.s32 1, %s5322_s26  ;;  %p36_p1 = scmp.ge.s32.totalorder %s35_s13, 2 }
  0x30   : > { %p162_p2 = scmp.ne.s32.totalorder %s5322_s26, %s5318_s25  ;;  %p163_p4 = scmp.eq.s32.totalorder %s5334_s29, 0 }
  0x31   : > { %p4983_p6 = scmp.lt.s32.totalorder %s5334_s29, 2  ;;  %s7111_s13 = smov (%p36_p1, %s35_s13), 0 }
  0x32   : > { %7085 = sst [smem:[#allocation22_spill]] %s7111_s13  ;;  %p164_p10 = por %p163_p4, %p162_p2 }
  0x33   : > { %p7086_p3 = scmp.eq.s32.totalorder %s5424_s30, 1  ;;  %s152_s21 = ssub.s32 %s5330_s28, %s7111_s13 }
  0x34   : > { %4963 = dma.hbm_to_vmem [thread:$0]  (!%p5452_p11), %s7084_s3, 1024, %s283_s16, [#allocation10], %s5338_s19, %s5338_s19, %s5339_s20  }
  0x35   : > { %p5486_p7 = por %p7086_p3, %p162_p2  ;;  %s307_s22 = sand.u32 1, %s5334_s29  }
  0x36   : > { %p153_p9 = scmp.eq.s32.totalorder %s152_s21, 0  ;;  %s7072_s16 = sand.u32 1, %s5322_s26  }
  0x37   : > { %s4821_s19 = smul.u32 8832, %s5330_s28  ;;  %s7089_s5 = sld [smem:[#allocation26_spill]] }
  0x38   : > { %s5496_s20 = scalar_select %p153_p9, %s5322_s26, %s155_s15  }
  0x39   : > { %s4920_s23 = smul.u32 8832, %s7072_s16  ;;  %p5503_p13 = pnand %p4983_p6, %p164_p10 }
  0x3a   : > { %7088 = sst [smem:[#allocation23_spill]] %s5496_s20  ;;  %s5507_s21 = scalar_lea.sflag [#allocation13], %s307_s22 }
  0x3b   : > { %s311_s10 = scalar_lea.vmem [#allocation12], %s4920_s23  ;;  %p7073_p0 = pneg %p5503_p13 }
  0x3c   : > { %s318_s13 = sshll.u32 %s311_s10, 4  ;;  %s319_s13 = int_to_ptr.vmem [resolvable:$true] %s318_s13 }
  0x3d   : > { %s317_s1 = scalar_lea.hbm %s7089_s5, %s4821_s19  ;;  %s5121_s15 = scalar_lea.vmem %s319_s13, 141312 }
  0x3e   : > { %p5122_p5 = scmp.ne.s32.totalorder %s319_s13, %s5121_s15  ;;  %s5340_s19 = smov [#allocation12]  }
  0x3f   : > { %s5126_s8 = sshll.u32 %s5340_s19, 4  ;;  %s5127_s8 = int_to_ptr.vmem [resolvable:$false] %s5126_s8 }
  0x40   : > { %p5124_p1 = pnand %p5122_p5, %p7073_p0  ;;  %s5128_s12 = scalar_lea.vmem %s5127_s8, 282624 }
  0x41   : > { %p5129_p4 = scmp.lt.s32.totalorder %s319_s13, %s5127_s8  ;;  %p5130_p6 = scmp.lt.s32.totalorder %s5128_s12, %s5121_s15 }
  0x42   : > { %p5125_p2 = pneg %p5124_p1 }
  0x43   : > { %p5131_p10 = por %p5130_p6, %p5129_p4 }
  0x45   : > { %p5132_p3 = pnand %p5131_p10, %p5125_p2 }
  0x47   : > { %5135 = shalt.err (!%p5132_p3)
}
  0x48   : > { %s5341_s10 = smov 17664   ;;  %s5342_s22 = smov 8832  }
  0x49   : > { %s5343_s23 = smov 552   ;;  %s5344_s16 = smov [#allocation3]  }
  0x4a   : > { %4970 = dma.hbm_to_vmem [thread:$0]  (!%p5503_p13), %s317_s1, 141312, %s319_s13, %s5507_s21, %s5341_s10, %s5342_s22, %s5343_s23  }
  0x4b   : > { %s248_s5 = sshll.u32 %s5344_s16, 4  ;;  %s249_s5 = int_to_ptr.vmem [resolvable:$true] %s248_s5 }
  0x4c   : > { %s5147_s20 = scalar_lea.vmem %s249_s5, 128  ;;  %p5155_p0 = scmp.lt.s32.totalorder %s249_s5, %s249_s5 }
  0x4d   : > { %p5148_p9 = scmp.ne.s32.totalorder %s249_s5, %s5147_s20  ;;  %p5156_p4 = scmp.lt.s32.totalorder %s5147_s20, %s5147_s20 }
  0x4f   : > { %p5150_p5 = pnand %p5148_p9, %p5458_p12  ;;  %p5157_p2 = por %p5156_p4, %p5155_p0 }
  0x51   : > { %p5151_p1 = pneg %p5150_p5 }
  0x53   : > { %p5158_p6 = pnand %p5157_p2, %p5151_p1 }
  0x55   : > { %5161 = shalt.err (!%p5158_p6)
}
  0x56   : > { %4954 = dma.hbm_to_vmem [thread:$0]  (!%p5452_p11), %s7060_s0, 128, %s249_s5, [#allocation4]  }
  0x57   : > { %s5345_s1 = smov [#allocation8]   ;;  %s5346_s16 = smov [#allocation11]  }
  0x58   : > { %s272_s13 = sshll.u32 %s5345_s1, 4  ;;  %s296_s8 = sshll.u32 %s5346_s16, 4  ;;  %s273_s13 = int_to_ptr.vmem [resolvable:$true] %s272_s13  ;;  %s297_s8 = int_to_ptr.vmem [resolvable:$true] %s296_s8 }
  0x59   : > { %s5173_s12 = scalar_lea.vmem %s273_s13, 16  ;;  %s5180_s20 = scalar_lea.vmem %s273_s13, 32 }
  0x5a   : > { %p5174_p10 = scmp.ne.s32.totalorder %s273_s13, %s5173_s12  ;;  %p5181_p0 = scmp.lt.s32.totalorder %s273_s13, %s273_s13 }
  0x5b   : > { %p5182_p5 = scmp.lt.s32.totalorder %s5180_s20, %s5173_s12 }
  0x5c   : > { %p5176_p3 = pnand %p5174_p10, %p5458_p12 }
  0x5d   : > { %p5183_p1 = por %p5182_p5, %p5181_p0 }
  0x5e   : > { %p5177_p9 = pneg %p5176_p3 }
  0x60   : > { %p5184_p4 = pnand %p5183_p1, %p5177_p9 }
  0x62   : > { %5187 = shalt.err (!%p5184_p4)
}
  0x63   : > { %4960 = dma.hbm_to_vmem [thread:$0]  (!%p5452_p11), %s7062_s2, 16, %s273_s13, [#allocation7]  }
  0x64   : > { %s7091_s22 = sand.u32 1, %s5322_s26   ;;  %s5199_s15 = scalar_lea.vmem %s297_s8, 16 }
  0x65   : > { %s4921_s23 = smul.u32 69, %s7091_s22  ;;  %p5200_p2 = scmp.ne.s32.totalorder %s297_s8, %s5199_s15 }
  0x66   : > { %s5206_s19 = scalar_lea.vmem %s297_s8, 32  ;;  %p5207_p3 = scmp.lt.s32.totalorder %s297_s8, %s297_s8 }
  0x67   : > { %p5202_p6 = pnand %p5200_p2, %p5458_p12  ;;  %p5208_p9 = scmp.lt.s32.totalorder %s5206_s19, %s5199_s15 }
  0x69   : > { %p5203_p10 = pneg %p5202_p6  ;;  %p5209_p0 = por %p5208_p9, %p5207_p3 }
  0x6b   : > { %p5210_p5 = pnand %p5209_p0, %p5203_p10 }
  0x6d   : > { %5213 = shalt.err (!%p5210_p5)
}
  0x6e   : > { %4966 = dma.hbm_to_vmem [thread:$0]  (!%p5452_p11), %s7064_s4, 16, %s297_s8, [#allocation10]  }
  0x6f   : > { %s4822_s13 = smul.u32 1104, %s5330_s28  ;;  %s332_s12 = scalar_lea.vmem [#allocation14], %s4921_s23 }
  0x70   : > { %s340_s20 = sshll.u32 %s332_s12, 4  ;;  %p7092_p1 = pneg %p5503_p13  ;;  %s341_s20 = int_to_ptr.vmem [resolvable:$true] %s340_s20 }
  0x71   : > { %s338_s5 = scalar_lea.hbm %s7066_s6, %s4822_s13  ;;  %s5227_s22 = scalar_lea.vmem %s341_s20, 1104 }
  0x72   : > { %p5228_p12 = scmp.ne.s32.totalorder %s341_s20, %s5227_s22  ;;  %s5347_s14 = smov [#allocation14]  }
  0x73   : > { %s5232_s15 = sshll.u32 %s5347_s14, 4  ;;  %s5233_s15 = int_to_ptr.vmem [resolvable:$false] %s5232_s15 }
  0x74   : > { %p5230_p4 = pnand %p5228_p12, %p7092_p1  ;;  %s5234_s19 = scalar_lea.vmem %s5233_s15, 2208 }
  0x75   : > { %p5235_p6 = scmp.lt.s32.totalorder %s341_s20, %s5233_s15  ;;  %p5236_p11 = scmp.lt.s32.totalorder %s5234_s19, %s5227_s22 }
  0x76   : > { %p5231_p2 = pneg %p5230_p4 }
  0x77   : > { %p5237_p10 = por %p5236_p11, %p5235_p6 }
  0x79   : > { %p5238_p3 = pnand %p5237_p10, %p5231_p2 }
  0x7b   : > { %5241 = shalt.err (!%p5238_p3)
}
  0x7c   : > { %4973 = dma.hbm_to_vmem [thread:$0]  (!%p5503_p13), %s338_s5, 1104, %s341_s20, %s5507_s21  }
  0x7d   : > { %349 = sbr.rel (%p5443_p8) target bundleno = 1360 (0x550), region = 48  ;;  %p7093_p9 = scmp.eq.s32.totalorder (!%p5443_p8), %s5424_s30, 0 }
  0x82   : > { %5293 = dma.done.wait (%p7093_p9), [#allocation4], 128   ;;  %p7094_p0 = pmov %p7093_p9 }
  0x84   : > { %5295 = vsyncadd (%p7094_p0), [#allocation4], 4294967168  ;;  %p7095_p5 = pmov %p7094_p0 }
  0x85   : > { %p7096_p12 = pmov %p7094_p0 }
  0x86   : > { %5297 = dma.done.wait (%p7095_p5), [#allocation7], 528  }
  0x87   : > { %5299 = vsyncadd (%p7096_p12), [#allocation7], 4294966768  ;;  %p7097_p1 = pmov %p7094_p0 }
  0x88   : > { %p7098_p13 = pmov %p7094_p0 }
  0x89   : > { %5301 = dma.done.wait (%p7097_p1), [#allocation10], 1040  }
  0x8a   : > { %5303 = vsyncadd (%p7098_p13), [#allocation10], 4294966256  ;;  %s371_s3 = sand.u32 1, %s5424_s30   ;;  %s5566_s11 = sand.u32 1, %s5318_s25  }
  0x8b   : > { %s4922_s21 = smul.u32 8832, %s5566_s11  ;;  %s372_s8 = scalar_lea.sflag [#allocation13], %s371_s3 }
  0x8c   : > { %p7099_p8 = scmp.ne.s32.totalorder %s7077_s9, 0 }
  0x8d   : > { %s5569_s23 = scalar_lea.vmem [#allocation12], %s4922_s21 }
  0x8e   : > { %5305 = dma.done.wait (%p7099_p8), %s372_s8, 142416  }
  0x8f   : > { %5307 = vsyncadd (%p7099_p8), %s372_s8, 4294824880  ;;  %s4923_s1 = smul.u32 69, %s5566_s11  ;;  %p4813_p4 = scmp.ne.s32.totalorder %s5326_s27, 0 }
  0x90   : > { %s4924_s16 = smul.u32 552, %s5566_s11 }
  0x91   : > { %s5577_s13 = scalar_lea.vmem [#allocation14], %s4923_s1  ;;  %426 = sbr.rel (%p4813_p4) target bundleno = 554 (0x22a), region = 80 }
  0x92   : > { %s5579_s12 = scalar_lea.vmem [#allocation15], %s4924_s16 }
  0x96   : > { %v431_v0 = vld [vmem:[#allocation6 + $0x18] sm:$0xff]  ;;  %v5348_v1 = vmov 0.0   ;;  %v430_v2 = vld [vmem:[#allocation6 + $0x10] sm:$0xff]  ;;  %vm5349_vm0 = vmmov 0   ;;  %v429_v5 = vld [vmem:[#allocation6 + $0x8] sm:$0xff]  ;;  %vm439_vm1 = vcmask 261120  }
  0x97   : > { %4855 = vmatprep.subr.mxu0 %v5348_v1  ;;  %4863 = vmatprep.mubr.msk.f32.mxu0 %vm5349_vm0, %v5348_v1  ;;  %v521_v3 = vld [vmem:[#allocation9 + $0x38] sm:$0xff]  ;;  %v520_v4 = vld [vmem:[#allocation9 + $0x30] sm:$0xff]  ;;  %v519_v6 = vld [vmem:[#allocation9 + $0x28] sm:$0xff]  ;;  %vm529_vm2 = vcmask 523264  }
  0x98   : > { %4856 = vmatpush3.msra.mxu0 %v431_v0  ;;  %4866 = vmatprep.subr.mxu1 %v5348_v1  ;;  %v428_v7 = vld [vmem:[#allocation6] sm:$0xff]  ;;  %v427_v8 = vld [vmem:[#allocation3] sm:$0xff]  ;;  %v515_v12 = vld [vmem:[#allocation9 + $0x8] sm:$0xff] }
  0x99   : > { %4857 = vmatprep.subr.mxu0 %v5348_v1  ;;  %4867 = vmatpush3.msra.mxu1 %v521_v3  ;;  %v518_v9 = vld [vmem:[#allocation9 + $0x20] sm:$0xff]  ;;  %v517_v10 = vld [vmem:[#allocation9 + $0x18] sm:$0xff]  ;;  %v516_v11 = vld [vmem:[#allocation9 + $0x10] sm:$0xff] }
  0x9a   : > { %4858 = vmatpush3.msra.mxu0 %v430_v2  ;;  %4868 = vmatprep.subr.mxu1 %v5348_v1  ;;  %v514_v13 = vld [vmem:[#allocation9] sm:$0xff]  ;;  %v4814_v14 = vld [vmem:[#allocation8] ss:$0 sm:$0xff] }
  0x9b   : > { %4859 = vmatprep.subr.mxu0 %v5348_v1  ;;  %4869 = vmatpush3.msra.mxu1 %v520_v4  ;;  %v4816_v19 = vld [vmem:[#allocation11] ss:$0 sm:$0xff] }
  0x9c   : > { %4860 = vmatpush3.msra.mxu0 %v429_v5  ;;  %4870 = vmatprep.subr.mxu1 %v5348_v1 }
  0x9d   : > { %4861 = vmatprep.subr.mxu0 %v5348_v1  ;;  %4871 = vmatpush3.msra.mxu1 %v519_v6 }
  0x9e   : > { %4862 = vmatpush3.msra.mxu0 %v428_v7  ;;  %4872 = vmatprep.subr.mxu1 %v5348_v1 }
  0x9f   : > { %4864 = vmatmul.mubr.msk.f32.vlgmr.msra.gmra.mxu0 %vm439_vm1, %v427_v8  ;;  %4873 = vmatpush3.msra.mxu1 %v518_v9 }
  0xa0   : > { %4874 = vmatprep.subr.mxu1 %v5348_v1  ;;  %4882 = vmatprep.mubr.msk.f32.mxu1 %vm5349_vm0, %v5348_v1 }
  0xa1   : > { %4875 = vmatpush3.msra.mxu1 %v517_v10 }
  0xa2   : > { %4876 = vmatprep.subr.mxu1 %v5348_v1 }
  0xa3   : > { %4877 = vmatpush3.msra.mxu1 %v516_v11 }
  0xa4   : > { %4878 = vmatprep.subr.mxu1 %v5348_v1 }
  0xa5   : > { %4879 = vmatpush3.msra.mxu1 %v515_v12 }
  0xa6   : > { %4880 = vmatprep.subr.mxu1 %v5348_v1 }
  0xa7   : > { %4881 = vmatpush3.msra.mxu1 %v514_v13 }
 0x15f   : > { %v509_v15 = vpop.f32.mrf.mxu0 }
 0x160   : > { %v510_v16 = vadd.f32 %v4814_v14, %v509_v15 }
 0x161   : > { %v4865_v17 = vpop.f32.mrf.mxu0 }
 0x162   : > { %v513_v18 = vmax.f32 %v510_v16, 0.0 }
 0x164   : > { %4883 = vmatmul.mubr.msk.f32.vlgmr.msra.gmra.mxu1 %vm529_vm2, %v513_v18 }
 0x224   : > { %v599_v20 = vpop.f32.mrf.mxu1 }
 0x225   : > { %v600_v21 = vadd.f32 %v4816_v19, %v599_v20 }
 0x226   : > { %v4884_v22 = vpop.f32.mrf.mxu1 }
 0x227   : > { %v603_v23 = vmax.f32 %v600_v21, 0.0 }
 0x229   : > { %604 = vst [vmem:[#allocation2] sm:$0xff] %v603_v23 }
 0x22a PF: > { %v1642_v24 = vld [vmem:[%s5569_s23 + $0x2060] sm:$0xff]  ;;  %v1641_v25 = vld [vmem:[%s5569_s23 + $0x2058] sm:$0xff]  ;;  %v1572_v27 = vld [vmem:[%s5569_s23 + $0x1e30] sm:$0xff]  ;;  %v5350_v28 = vmov 0.0   ;;  %vm5351_vm3 = vmmov 0   ;;  %s4823_s30 = smul.u32 8832, %s5326_s27 }
 0x22b   : > { %v1573_v26 = vld [vmem:[%s5569_s23 + $0x1e38] sm:$0xff]  ;;  %2073 = vmatprep.subr.mxu0 %v1642_v24  ;;  %2137 = vmatprep.mubr.f32.mxu0 %v5350_v28  ;;  %v1504_v29 = vld [vmem:[%s5569_s23 + $0x1c10] sm:$0xff]  ;;  %v1503_v30 = vld [vmem:[%s5569_s23 + $0x1c08] sm:$0xff]  ;;  %s4643_s9 = sshll.u32 %s5579_s12, 4  ;;  %s4627_s5 = scalar_lea.sflag [#allocation5], %s5566_s11  ;;  %s4644_s9 = int_to_ptr.vmem [resolvable:$true] %s4643_s9 }
 0x22c   : > { %2074 = vmatpush1.msra.mxu0 %v1641_v25  ;;  %2208 = vmatprep.mubr.f32.mxu1 %v5350_v28  ;;  %v1435_v31 = vld [vmem:[%s5569_s23 + $0x19e8] sm:$0xff]  ;;  %v1434_v32 = vld [vmem:[%s5569_s23 + $0x19e0] sm:$0xff]  ;;  %v1365_v34 = vld [vmem:[%s5569_s23 + $0x17b8] sm:$0xff]  ;;  %s7017_s10 = scalar_lea.hbm %s7067_s7, %s4823_s30  ;;  %s5242_s22 = scalar_lea.vmem %s4644_s9, 8832 }
 0x22d   : > { %2075 = vmatprep.subr.mxu0 %v1573_v26  ;;  %v1366_v33 = vld [vmem:[%s5569_s23 + $0x17c0] sm:$0xff]  ;;  %v1297_v35 = vld [vmem:[%s5569_s23 + $0x1598] sm:$0xff]  ;;  %v1296_v36 = vld [vmem:[%s5569_s23 + $0x1590] sm:$0xff]  ;;  %p5243_p2 = scmp.ne.s32.totalorder %s4644_s9, %s5242_s22  ;;  %s5352_s27 = smov [#allocation15]  }
 0x22e   : > { %2076 = vmatpush1.msra.mxu0 %v1572_v27  ;;  %v1644_v37 = vld [vmem:[%s5569_s23 + $0x2070] sm:$0xff]  ;;  %v1643_v39 = vld [vmem:[%s5569_s23 + $0x2068] sm:$0xff]  ;;  %v1574_v42 = vld [vmem:[%s5569_s23 + $0x1e40] sm:$0xff]  ;;  %s5246_s14 = sshll.u32 %s5352_s27, 4  ;;  %s5247_s14 = int_to_ptr.vmem [resolvable:$false] %s5246_s14 }
 0x22f   : > { %2077 = vmatprep.subr.mxu0 %v1504_v29  ;;  %v1228_v38 = vld [vmem:[%s5569_s23 + $0x1370] sm:$0xff]  ;;  %2144 = vmatprep.subr.mxu1 %v1644_v37  ;;  %v1227_v40 = vld [vmem:[%s5569_s23 + $0x1368] sm:$0xff]  ;;  %v1506_v44 = vld [vmem:[%s5569_s23 + $0x1c20] sm:$0xff]  ;;  %p5244_p6 = pnand %p5243_p2, %p5486_p7  ;;  %s5248_s15 = scalar_lea.vmem %s5247_s14, 17664 }
 0x230   : > { %2078 = vmatpush1.msra.mxu0 %v1503_v30  ;;  %2145 = vmatpush1.msra.mxu1 %v1643_v39  ;;  %v1575_v41 = vld [vmem:[%s5569_s23 + $0x1e48] sm:$0xff]  ;;  %v1158_v45 = vld [vmem:[%s5569_s23 + $0x1140] sm:$0xff]  ;;  %v1505_v46 = vld [vmem:[%s5569_s23 + $0x1c18] sm:$0xff]  ;;  %p5249_p10 = scmp.lt.s32.totalorder %s4644_s9, %s5247_s14  ;;  %p5250_p3 = scmp.lt.s32.totalorder %s5248_s15, %s5242_s22 }
 0x231   : > { %2079 = vmatprep.subr.mxu0 %v1435_v31  ;;  %v1159_v43 = vld [vmem:[%s5569_s23 + $0x1148] sm:$0xff]  ;;  %2146 = vmatprep.subr.mxu1 %v1575_v41  ;;  %v1437_v47 = vld [vmem:[%s5569_s23 + $0x19f8] sm:$0xff]  ;;  %v1090_v48 = vld [vmem:[%s5569_s23 + $0xf20] sm:$0xff]  ;;  %p5245_p11 = pneg %p5244_p6 }
 0x232   : > { %2080 = vmatpush1.msra.mxu0 %v1434_v32  ;;  %2147 = vmatpush1.msra.mxu1 %v1574_v42  ;;  %v1436_v49 = vld [vmem:[%s5569_s23 + $0x19f0] sm:$0xff]  ;;  %v1089_v50 = vld [vmem:[%s5569_s23 + $0xf18] sm:$0xff]  ;;  %v1367_v53 = vld [vmem:[%s5569_s23 + $0x17c8] sm:$0xff]  ;;  %p5251_p9 = por %p5250_p3, %p5249_p10 }
 0x233   : > { %2081 = vmatprep.subr.mxu0 %v1366_v33  ;;  %2148 = vmatprep.subr.mxu1 %v1506_v44  ;;  %v1368_v51 = vld [vmem:[%s5569_s23 + $0x17d0] sm:$0xff]  ;;  %v1021_v52 = vld [vmem:[%s5569_s23 + $0xcf8] sm:$0xff]  ;;  %v1299_v55 = vld [vmem:[%s5569_s23 + $0x15a8] sm:$0xff] }
 0x234   : > { %2082 = vmatpush1.msra.mxu0 %v1365_v34  ;;  %2149 = vmatpush1.msra.mxu1 %v1505_v46  ;;  %v1020_v54 = vld [vmem:[%s5569_s23 + $0xcf0] sm:$0xff]  ;;  %v1298_v57 = vld [vmem:[%s5569_s23 + $0x15a0] sm:$0xff]  ;;  %v951_v58 = vld [vmem:[%s5569_s23 + $0xac8] sm:$0xff]  ;;  %p5252_p0 = pnand %p5251_p9, %p5245_p11 }
 0x235   : > { %2083 = vmatprep.subr.mxu0 %v1297_v35  ;;  %2150 = vmatprep.subr.mxu1 %v1437_v47  ;;  %v952_v56 = vld [vmem:[%s5569_s23 + $0xad0] sm:$0xff]  ;;  %v1230_v59 = vld [vmem:[%s5569_s23 + $0x1380] sm:$0xff]  ;;  %v883_v60 = vld [vmem:[%s5569_s23 + $0x8a8] sm:$0xff] }
 0x236   : > { %2084 = vmatpush1.msra.mxu0 %v1296_v36  ;;  %2151 = vmatpush1.msra.mxu1 %v1436_v49  ;;  %v1229_v61 = vld [vmem:[%s5569_s23 + $0x1378] sm:$0xff]  ;;  %v882_v62 = vld [vmem:[%s5569_s23 + $0x8a0] sm:$0xff]  ;;  %v1160_v1 = vld [vmem:[%s5569_s23 + $0x1150] sm:$0xff] }
 0x237   : > { %2085 = vmatprep.subr.mxu0 %v1228_v38  ;;  %2152 = vmatprep.subr.mxu1 %v1368_v51  ;;  %v1161_v63 = vld [vmem:[%s5569_s23 + $0x1158] sm:$0xff]  ;;  %v814_v0 = vld [vmem:[%s5569_s23 + $0x680] sm:$0xff]  ;;  %v1092_v3 = vld [vmem:[%s5569_s23 + $0xf30] sm:$0xff] }
 0x238   : > { %2086 = vmatpush1.msra.mxu0 %v1227_v40  ;;  %2153 = vmatpush1.msra.mxu1 %v1367_v53  ;;  %v813_v2 = vld [vmem:[%s5569_s23 + $0x678] sm:$0xff]  ;;  %v1091_v5 = vld [vmem:[%s5569_s23 + $0xf28] sm:$0xff]  ;;  %v744_v6 = vld [vmem:[%s5569_s23 + $0x450] sm:$0xff] }
 0x239   : > { %2087 = vmatprep.subr.mxu0 %v1159_v43  ;;  %2154 = vmatprep.subr.mxu1 %v1299_v55  ;;  %v745_v4 = vld [vmem:[%s5569_s23 + $0x458] sm:$0xff]  ;;  %v1023_v7 = vld [vmem:[%s5569_s23 + $0xd08] sm:$0xff]  ;;  %v676_v8 = vld [vmem:[%s5569_s23 + $0x230] sm:$0xff] }
 0x23a   : > { %2088 = vmatpush1.msra.mxu0 %v1158_v45  ;;  %2155 = vmatpush1.msra.mxu1 %v1298_v57  ;;  %v1022_v9 = vld [vmem:[%s5569_s23 + $0xd00] sm:$0xff]  ;;  %v675_v10 = vld [vmem:[%s5569_s23 + $0x228] sm:$0xff]  ;;  %v953_v13 = vld [vmem:[%s5569_s23 + $0xad8] sm:$0xff] }
 0x23b   : > { %2089 = vmatprep.subr.mxu0 %v1090_v48  ;;  %2156 = vmatprep.subr.mxu1 %v1230_v59  ;;  %v954_v11 = vld [vmem:[%s5569_s23 + $0xae0] sm:$0xff]  ;;  %v607_v12 = vld [vmem:[%s5569_s23 + $0x8] sm:$0xff]  ;;  %v885_v15 = vld [vmem:[%s5569_s23 + $0x8b8] sm:$0xff] }
 0x23c   : > { %2090 = vmatpush1.msra.mxu0 %v1089_v50  ;;  %2157 = vmatpush1.msra.mxu1 %v1229_v61  ;;  %v606_v14 = vld [vmem:[%s5569_s23] sm:$0xff]  ;;  %v5641_v16 = vld [vmem:[#allocation2] sm:$0xff]  ;;  %v1645_v18 = vld [vmem:[%s5569_s23 + $0x2078] sm:$0xff] }
 0x23d   : > { %2091 = vmatprep.subr.mxu0 %v1021_v52  ;;  %2158 = vmatprep.subr.mxu1 %v1161_v63  ;;  %v1646_v17 = vld [vmem:[%s5569_s23 + $0x2080] sm:$0xff]  ;;  %v884_v19 = vld [vmem:[%s5569_s23 + $0x8b0] sm:$0xff]  ;;  %v1577_v20 = vld [vmem:[%s5569_s23 + $0x1e58] sm:$0xff] }
 0x23e   : > { %2092 = vmatpush1.msra.mxu0 %v1020_v54  ;;  %2159 = vmatpush1.msra.mxu1 %v1160_v1  ;;  %v816_v21 = vld [vmem:[%s5569_s23 + $0x690] sm:$0xff]  ;;  %v815_v23 = vld [vmem:[%s5569_s23 + $0x688] sm:$0xff]  ;;  %v746_v27 = vld [vmem:[%s5569_s23 + $0x460] sm:$0xff] }
 0x23f   : > { %2093 = vmatprep.subr.mxu0 %v952_v56  ;;  %2160 = vmatprep.subr.mxu1 %v1092_v3  ;;  %v1576_v22 = vld [vmem:[%s5569_s23 + $0x1e50] sm:$0xff]  ;;  %v747_v25 = vld [vmem:[%s5569_s23 + $0x468] sm:$0xff]  ;;  %v678_v30 = vld [vmem:[%s5569_s23 + $0x240] sm:$0xff] }
 0x240   : > { %2094 = vmatpush1.msra.mxu0 %v951_v58  ;;  %2161 = vmatpush1.msra.mxu1 %v1091_v5  ;;  %v1508_v24 = vld [vmem:[%s5569_s23 + $0x1c30] sm:$0xff]  ;;  %v1507_v26 = vld [vmem:[%s5569_s23 + $0x1c28] sm:$0xff]  ;;  %v1438_v31 = vld [vmem:[%s5569_s23 + $0x1a00] sm:$0xff] }
 0x241   : > { %2095 = vmatprep.subr.mxu0 %v883_v60  ;;  %2162 = vmatprep.subr.mxu1 %v1023_v7  ;;  %v1439_v29 = vld [vmem:[%s5569_s23 + $0x1a08] sm:$0xff]  ;;  %v677_v32 = vld [vmem:[%s5569_s23 + $0x238] sm:$0xff]  ;;  %v1370_v33 = vld [vmem:[%s5569_s23 + $0x17e0] sm:$0xff] }
 0x242   : > { %2096 = vmatpush1.msra.mxu0 %v882_v62  ;;  %2163 = vmatpush1.msra.mxu1 %v1022_v9  ;;  %v609_v34 = vld [vmem:[%s5569_s23 + $0x18] sm:$0xff]  ;;  %v608_v36 = vld [vmem:[%s5569_s23 + $0x10] sm:$0xff]  ;;  %v1647_v41 = vld [vmem:[%s5569_s23 + $0x2088] sm:$0xff] }
 0x243   : > { %2097 = vmatprep.subr.mxu0 %v814_v0  ;;  %2164 = vmatprep.subr.mxu1 %v954_v11  ;;  %v1369_v35 = vld [vmem:[%s5569_s23 + $0x17d8] sm:$0xff]  ;;  %v1648_v38 = vld [vmem:[%s5569_s23 + $0x2090] sm:$0xff]  ;;  %v1231_v42 = vld [vmem:[%s5569_s23 + $0x1388] sm:$0xff] }
 0x244   : > { %2098 = vmatpush1.msra.mxu0 %v813_v2  ;;  %2165 = vmatpush1.msra.mxu1 %v953_v13  ;;  %v1301_v37 = vld [vmem:[%s5569_s23 + $0x15b8] sm:$0xff]  ;;  %v1300_v39 = vld [vmem:[%s5569_s23 + $0x15b0] sm:$0xff]  ;;  %v1579_v43 = vld [vmem:[%s5569_s23 + $0x1e68] sm:$0xff] }
 0x245   : > { %2099 = vmatprep.subr.mxu0 %v745_v4  ;;  %2166 = vmatprep.subr.mxu1 %v885_v15  ;;  %v1232_v40 = vld [vmem:[%s5569_s23 + $0x1390] sm:$0xff]  ;;  %v1163_v44 = vld [vmem:[%s5569_s23 + $0x1168] sm:$0xff]  ;;  %v1162_v45 = vld [vmem:[%s5569_s23 + $0x1160] sm:$0xff] }
 0x246   : > { %2100 = vmatpush1.msra.mxu0 %v744_v6  ;;  %2167 = vmatpush1.msra.mxu1 %v884_v19  ;;  %v1578_v46 = vld [vmem:[%s5569_s23 + $0x1e60] sm:$0xff]  ;;  %v1093_v49 = vld [vmem:[%s5569_s23 + $0xf38] sm:$0xff]  ;;  %v1024_v53 = vld [vmem:[%s5569_s23 + $0xd10] sm:$0xff] }
 0x247   : > { %2101 = vmatprep.subr.mxu0 %v676_v8  ;;  %2168 = vmatprep.subr.mxu1 %v816_v21  ;;  %v1094_v47 = vld [vmem:[%s5569_s23 + $0xf40] sm:$0xff]  ;;  %v1509_v50 = vld [vmem:[%s5569_s23 + $0x1c38] sm:$0xff]  ;;  %v1440_v54 = vld [vmem:[%s5569_s23 + $0x1a10] sm:$0xff] }
 0x248   : > { %2102 = vmatpush1.msra.mxu0 %v675_v10  ;;  %2169 = vmatpush1.msra.mxu1 %v815_v23  ;;  %v1510_v48 = vld [vmem:[%s5569_s23 + $0x1c40] sm:$0xff]  ;;  %v1025_v51 = vld [vmem:[%s5569_s23 + $0xd18] sm:$0xff]  ;;  %v956_v55 = vld [vmem:[%s5569_s23 + $0xaf0] sm:$0xff] }
 0x249   : > { %2103 = vmatprep.subr.mxu0 %v607_v12  ;;  %2170 = vmatprep.subr.mxu1 %v747_v25  ;;  %v1441_v52 = vld [vmem:[%s5569_s23 + $0x1a18] sm:$0xff]  ;;  %v1372_v56 = vld [vmem:[%s5569_s23 + $0x17f0] sm:$0xff]  ;;  %v955_v57 = vld [vmem:[%s5569_s23 + $0xae8] sm:$0xff] }
 0x24a   : > { %2104 = vmatpush1.msra.mxu0 %v606_v14  ;;  %2171 = vmatpush1.msra.mxu1 %v746_v27  ;;  %v1371_v58 = vld [vmem:[%s5569_s23 + $0x17e8] sm:$0xff]  ;;  %v886_v61 = vld [vmem:[%s5569_s23 + $0x8c0] sm:$0xff]  ;;  %v817_v1 = vld [vmem:[%s5569_s23 + $0x698] sm:$0xff] }
 0x24b   : > { %2138 = vmatmul.mubr.f32.vlgmr.msra.gmra.mxu0 %v5641_v16  ;;  %2215 = vmatprep.subr.mxu0 %v1646_v17  ;;  %v887_v59 = vld [vmem:[%s5569_s23 + $0x8c8] sm:$0xff]  ;;  %v1302_v62 = vld [vmem:[%s5569_s23 + $0x15c0] sm:$0xff]  ;;  %v1233_v2 = vld [vmem:[%s5569_s23 + $0x1398] sm:$0xff] }
 0x24c   : > { %2216 = vmatpush1.msra.mxu0 %v1645_v18  ;;  %2172 = vmatprep.subr.mxu1 %v678_v30  ;;  %v1303_v60 = vld [vmem:[%s5569_s23 + $0x15c8] sm:$0xff]  ;;  %v818_v63 = vld [vmem:[%s5569_s23 + $0x6a0] sm:$0xff]  ;;  %v749_v3 = vld [vmem:[%s5569_s23 + $0x478] sm:$0xff] }
 0x24d   : > { %2217 = vmatprep.subr.mxu0 %v1577_v20  ;;  %2173 = vmatpush1.msra.mxu1 %v677_v32  ;;  %v1234_v0 = vld [vmem:[%s5569_s23 + $0x13a0] sm:$0xff]  ;;  %v1165_v4 = vld [vmem:[%s5569_s23 + $0x1178] sm:$0xff]  ;;  %v748_v5 = vld [vmem:[%s5569_s23 + $0x470] sm:$0xff] }
 0x24e   : > { %2218 = vmatpush1.msra.mxu0 %v1576_v22  ;;  %2174 = vmatprep.subr.mxu1 %v609_v34  ;;  %v1164_v6 = vld [vmem:[%s5569_s23 + $0x1170] sm:$0xff]  ;;  %v679_v9 = vld [vmem:[%s5569_s23 + $0x248] sm:$0xff]  ;;  %v610_v13 = vld [vmem:[%s5569_s23 + $0x20] sm:$0xff] }
 0x24f   : > { %2219 = vmatprep.subr.mxu0 %v1508_v24  ;;  %2175 = vmatpush1.msra.mxu1 %v608_v36  ;;  %v680_v7 = vld [vmem:[%s5569_s23 + $0x250] sm:$0xff]  ;;  %v1095_v10 = vld [vmem:[%s5569_s23 + $0xf48] sm:$0xff]  ;;  %v1026_v14 = vld [vmem:[%s5569_s23 + $0xd20] sm:$0xff] }
 0x250   : > { %2220 = vmatpush1.msra.mxu0 %v1507_v26  ;;  %2286 = vmatprep.subr.mxu1 %v1648_v38  ;;  %v1096_v8 = vld [vmem:[%s5569_s23 + $0xf50] sm:$0xff]  ;;  %v611_v11 = vld [vmem:[%s5569_s23 + $0x28] sm:$0xff]  ;;  %v1650_v15 = vld [vmem:[%s5569_s23 + $0x20a0] sm:$0xff] }
 0x251   : > { %2221 = vmatprep.subr.mxu0 %v1439_v29  ;;  %2209 = vmatmul.mubr.f32.vlgmr.msra.gmra.mxu1 %v5641_v16  ;;  %v1027_v12 = vld [vmem:[%s5569_s23 + $0xd28] sm:$0xff]  ;;  %v1649_v17 = vld [vmem:[%s5569_s23 + $0x2098] sm:$0xff]  ;;  %v958_v18 = vld [vmem:[%s5569_s23 + $0xb00] sm:$0xff] }
 0x252   : > { %2222 = vmatpush1.msra.mxu0 %v1438_v31  ;;  %2287 = vmatpush1.msra.mxu1 %v1647_v41  ;;  %v1581_v19 = vld [vmem:[%s5569_s23 + $0x1e78] sm:$0xff]  ;;  %v1580_v21 = vld [vmem:[%s5569_s23 + $0x1e70] sm:$0xff]  ;;  %v1511_v25 = vld [vmem:[%s5569_s23 + $0x1c48] sm:$0xff] }
 0x253   : > { %2223 = vmatprep.subr.mxu0 %v1370_v33  ;;  %2288 = vmatprep.subr.mxu1 %v1579_v43  ;;  %v957_v20 = vld [vmem:[%s5569_s23 + $0xaf8] sm:$0xff]  ;;  %v1512_v23 = vld [vmem:[%s5569_s23 + $0x1c50] sm:$0xff]  ;;  %v1443_v27 = vld [vmem:[%s5569_s23 + $0x1a28] sm:$0xff] }
 0x254   : > { %2224 = vmatpush1.msra.mxu0 %v1369_v35  ;;  %2279 = vmatprep.mubr.f32.mxu0 %v5350_v28  ;;  %v889_v22 = vld [vmem:[%s5569_s23 + $0x8d8] sm:$0xff]  ;;  %v888_v24 = vld [vmem:[%s5569_s23 + $0x8d0] sm:$0xff]  ;;  %v819_v29 = vld [vmem:[%s5569_s23 + $0x6a8] sm:$0xff] }
 0x255   : > { %2225 = vmatprep.subr.mxu0 %v1301_v37  ;;  %2289 = vmatpush1.msra.mxu1 %v1578_v46  ;;  %v820_v26 = vld [vmem:[%s5569_s23 + $0x6b0] sm:$0xff]  ;;  %v1442_v30 = vld [vmem:[%s5569_s23 + $0x1a20] sm:$0xff]  ;;  %v751_v31 = vld [vmem:[%s5569_s23 + $0x488] sm:$0xff] }
 0x256   : > { %2226 = vmatpush1.msra.mxu0 %v1300_v39  ;;  %2290 = vmatprep.subr.mxu1 %v1510_v48  ;;  %v1374_v32 = vld [vmem:[%s5569_s23 + $0x1800] sm:$0xff]  ;;  %v1373_v34 = vld [vmem:[%s5569_s23 + $0x17f8] sm:$0xff]  ;;  %v1304_v38 = vld [vmem:[%s5569_s23 + $0x15d0] sm:$0xff] }
 0x257   : > { %2227 = vmatprep.subr.mxu0 %v1232_v40  ;;  %2291 = vmatpush1.msra.mxu1 %v1509_v50  ;;  %v750_v33 = vld [vmem:[%s5569_s23 + $0x480] sm:$0xff]  ;;  %v1305_v36 = vld [vmem:[%s5569_s23 + $0x15d8] sm:$0xff]  ;;  %v1236_v40 = vld [vmem:[%s5569_s23 + $0x13b0] sm:$0xff] }
 0x258   : > { %2228 = vmatpush1.msra.mxu0 %v1231_v42  ;;  %2292 = vmatprep.subr.mxu1 %v1441_v52  ;;  %v682_v35 = vld [vmem:[%s5569_s23 + $0x260] sm:$0xff]  ;;  %v681_v37 = vld [vmem:[%s5569_s23 + $0x258] sm:$0xff]  ;;  %v612_v41 = vld [vmem:[%s5569_s23 + $0x30] sm:$0xff] }
 0x259   : > { %2229 = vmatprep.subr.mxu0 %v1163_v44  ;;  %2293 = vmatpush1.msra.mxu1 %v1440_v54  ;;  %v613_v39 = vld [vmem:[%s5569_s23 + $0x38] sm:$0xff]  ;;  %v1235_v42 = vld [vmem:[%s5569_s23 + $0x13a8] sm:$0xff]  ;;  %v1652_v44 = vld [vmem:[%s5569_s23 + $0x20b0] sm:$0xff] }
 0x25a   : > { %2230 = vmatpush1.msra.mxu0 %v1162_v45  ;;  %2294 = vmatprep.subr.mxu1 %v1372_v56  ;;  %v1167_v43 = vld [vmem:[%s5569_s23 + $0x1188] sm:$0xff]  ;;  %v1166_v45 = vld [vmem:[%s5569_s23 + $0x1180] sm:$0xff]  ;;  %v1097_v48 = vld [vmem:[%s5569_s23 + $0xf58] sm:$0xff] }
 0x25b   : > { %2231 = vmatprep.subr.mxu0 %v1094_v47  ;;  %2295 = vmatpush1.msra.mxu1 %v1371_v58  ;;  %v1098_v46 = vld [vmem:[%s5569_s23 + $0xf60] sm:$0xff]  ;;  %v1651_v47 = vld [vmem:[%s5569_s23 + $0x20a8] sm:$0xff]  ;;  %v1029_v50 = vld [vmem:[%s5569_s23 + $0xd38] sm:$0xff] }
 0x25c   : > { %2232 = vmatpush1.msra.mxu0 %v1093_v49  ;;  %2296 = vmatprep.subr.mxu1 %v1303_v60  ;;  %v1583_v49 = vld [vmem:[%s5569_s23 + $0x1e88] sm:$0xff]  ;;  %v1582_v52 = vld [vmem:[%s5569_s23 + $0x1e80] sm:$0xff]  ;;  %v1513_v56 = vld [vmem:[%s5569_s23 + $0x1c58] sm:$0xff] }
 0x25d   : > { %2233 = vmatprep.subr.mxu0 %v1025_v51  ;;  %2297 = vmatpush1.msra.mxu1 %v1302_v62  ;;  %v1028_v51 = vld [vmem:[%s5569_s23 + $0xd30] sm:$0xff]  ;;  %v1514_v54 = vld [vmem:[%s5569_s23 + $0x1c60] sm:$0xff]  ;;  %v1445_v58 = vld [vmem:[%s5569_s23 + $0x1a38] sm:$0xff] }
 0x25e   : > { %2234 = vmatpush1.msra.mxu0 %v1024_v53  ;;  %2298 = vmatprep.subr.mxu1 %v1234_v0  ;;  %v960_v53 = vld [vmem:[%s5569_s23 + $0xb10] sm:$0xff]  ;;  %v1375_v0 = vld [vmem:[%s5569_s23 + $0x1808] sm:$0xff] }
 0x25f   : > { %2235 = vmatprep.subr.mxu0 %v956_v55  ;;  %2299 = vmatpush1.msra.mxu1 %v1233_v2  ;;  %v959_v55 = vld [vmem:[%s5569_s23 + $0xb08] sm:$0xff]  ;;  %v1444_v60 = vld [vmem:[%s5569_s23 + $0x1a30] sm:$0xff] }
 0x260   : > { %2236 = vmatpush1.msra.mxu0 %v955_v57  ;;  %2300 = vmatprep.subr.mxu1 %v1165_v4  ;;  %v891_v57 = vld [vmem:[%s5569_s23 + $0x8e8] sm:$0xff]  ;;  %v1376_v62 = vld [vmem:[%s5569_s23 + $0x1810] sm:$0xff]  ;;  %v1306_v4 = vld [vmem:[%s5569_s23 + $0x15e0] sm:$0xff] }
 0x261   : > { %2237 = vmatprep.subr.mxu0 %v887_v59  ;;  %2301 = vmatpush1.msra.mxu1 %v1164_v6  ;;  %v890_v59 = vld [vmem:[%s5569_s23 + $0x8e0] sm:$0xff]  ;;  %v1307_v2 = vld [vmem:[%s5569_s23 + $0x15e8] sm:$0xff] }
 0x262   : > { %2238 = vmatpush1.msra.mxu0 %v886_v61  ;;  %2302 = vmatprep.subr.mxu1 %v1096_v8  ;;  %v822_v61 = vld [vmem:[%s5569_s23 + $0x6c0] sm:$0xff]  ;;  %v1237_v8 = vld [vmem:[%s5569_s23 + $0x13b8] sm:$0xff] }
 0x263   : > { %2239 = vmatprep.subr.mxu0 %v818_v63  ;;  %2303 = vmatpush1.msra.mxu1 %v1095_v10  ;;  %v821_v63 = vld [vmem:[%s5569_s23 + $0x6b8] sm:$0xff]  ;;  %v1238_v6 = vld [vmem:[%s5569_s23 + $0x13c0] sm:$0xff] }
 0x264   : > { %2240 = vmatpush1.msra.mxu0 %v817_v1  ;;  %2304 = vmatprep.subr.mxu1 %v1027_v12  ;;  %v753_v1 = vld [vmem:[%s5569_s23 + $0x498] sm:$0xff]  ;;  %v1168_v12 = vld [vmem:[%s5569_s23 + $0x1190] sm:$0xff] }
 0x265   : > { %2241 = vmatprep.subr.mxu0 %v749_v3  ;;  %2305 = vmatpush1.msra.mxu1 %v1026_v14  ;;  %v752_v3 = vld [vmem:[%s5569_s23 + $0x490] sm:$0xff]  ;;  %v1169_v10 = vld [vmem:[%s5569_s23 + $0x1198] sm:$0xff] }
 0x266   : > { %2242 = vmatpush1.msra.mxu0 %v748_v5  ;;  %2306 = vmatprep.subr.mxu1 %v958_v18  ;;  %v684_v5 = vld [vmem:[%s5569_s23 + $0x270] sm:$0xff]  ;;  %v1653_v14 = vld [vmem:[%s5569_s23 + $0x20b8] sm:$0xff]  ;;  %v1099_v18 = vld [vmem:[%s5569_s23 + $0xf68] sm:$0xff] }
 0x267   : > { %2243 = vmatprep.subr.mxu0 %v680_v7  ;;  %2307 = vmatpush1.msra.mxu1 %v957_v20  ;;  %v683_v7 = vld [vmem:[%s5569_s23 + $0x268] sm:$0xff] }
 0x268   : > { %2244 = vmatpush1.msra.mxu0 %v679_v9  ;;  %2308 = vmatprep.subr.mxu1 %v889_v22  ;;  %v615_v9 = vld [vmem:[%s5569_s23 + $0x48] sm:$0xff]  ;;  %v1030_v22 = vld [vmem:[%s5569_s23 + $0xd40] sm:$0xff] }
 0x269   : > { %2245 = vmatprep.subr.mxu0 %v611_v11  ;;  %2309 = vmatpush1.msra.mxu1 %v888_v24  ;;  %v614_v11 = vld [vmem:[%s5569_s23 + $0x40] sm:$0xff]  ;;  %v1031_v20 = vld [vmem:[%s5569_s23 + $0xd48] sm:$0xff] }
 0x26a   : > { %2246 = vmatpush1.msra.mxu0 %v610_v13  ;;  %2310 = vmatprep.subr.mxu1 %v820_v26  ;;  %v1654_v13 = vld [vmem:[%s5569_s23 + $0x20c0] sm:$0xff]  ;;  %v961_v26 = vld [vmem:[%s5569_s23 + $0xb18] sm:$0xff] }
 0x26b   : > { %2280 = vmatmul.mubr.f32.vlgmr.msra.gmra.mxu0 %v5641_v16  ;;  %2357 = vmatprep.subr.mxu0 %v1650_v15  ;;  %v1100_v15 = vld [vmem:[%s5569_s23 + $0xf70] sm:$0xff]  ;;  %v962_v24 = vld [vmem:[%s5569_s23 + $0xb20] sm:$0xff] }
 0x26c   : > { %2358 = vmatpush1.msra.mxu0 %v1649_v17  ;;  %2311 = vmatpush1.msra.mxu1 %v819_v29  ;;  %v1585_v17 = vld [vmem:[%s5569_s23 + $0x1e98] sm:$0xff] }
 0x26d   : > { %2359 = vmatprep.subr.mxu0 %v1581_v19  ;;  %2312 = vmatprep.subr.mxu1 %v751_v31  ;;  %v1584_v19 = vld [vmem:[%s5569_s23 + $0x1e90] sm:$0xff]  ;;  %v893_v29 = vld [vmem:[%s5569_s23 + $0x8f8] sm:$0xff] }
 0x26e   : > { %2360 = vmatpush1.msra.mxu0 %v1580_v21  ;;  %2313 = vmatpush1.msra.mxu1 %v750_v33  ;;  %v1516_v21 = vld [vmem:[%s5569_s23 + $0x1c70] sm:$0xff] }
 0x26f   : > { %2361 = vmatprep.subr.mxu0 %v1512_v23  ;;  %2314 = vmatprep.subr.mxu1 %v682_v35  ;;  %v1515_v23 = vld [vmem:[%s5569_s23 + $0x1c68] sm:$0xff]  ;;  %v892_v31 = vld [vmem:[%s5569_s23 + $0x8f0] sm:$0xff] }
 0x270   : > { %2362 = vmatpush1.msra.mxu0 %v1511_v25  ;;  %2315 = vmatpush1.msra.mxu1 %v681_v37  ;;  %v1447_v25 = vld [vmem:[%s5569_s23 + $0x1a48] sm:$0xff]  ;;  %v824_v33 = vld [vmem:[%s5569_s23 + $0x6d0] sm:$0xff] }
 0x271   : > { %2363 = vmatprep.subr.mxu0 %v1443_v27  ;;  %2316 = vmatprep.subr.mxu1 %v613_v39  ;;  %v1446_v27 = vld [vmem:[%s5569_s23 + $0x1a40] sm:$0xff]  ;;  %v823_v35 = vld [vmem:[%s5569_s23 + $0x6c8] sm:$0xff] }
 0x272   : > { %2364 = vmatpush1.msra.mxu0 %v1442_v30  ;;  %2317 = vmatpush1.msra.mxu1 %v612_v41  ;;  %v1378_v30 = vld [vmem:[%s5569_s23 + $0x1820] sm:$0xff]  ;;  %v755_v37 = vld [vmem:[%s5569_s23 + $0x4a8] sm:$0xff] }
 0x273   : > { %2365 = vmatprep.subr.mxu0 %v1374_v32  ;;  %2350 = vmatprep.mubr.f32.mxu1 %v5350_v28  ;;  %v1377_v32 = vld [vmem:[%s5569_s23 + $0x1818] sm:$0xff]  ;;  %v754_v39 = vld [vmem:[%s5569_s23 + $0x4a0] sm:$0xff] }
 0x274   : > { %2366 = vmatpush1.msra.mxu0 %v1373_v34  ;;  %2428 = vmatprep.subr.mxu1 %v1652_v44  ;;  %v1309_v34 = vld [vmem:[%s5569_s23 + $0x15f8] sm:$0xff]  ;;  %v686_v41 = vld [vmem:[%s5569_s23 + $0x280] sm:$0xff] }
 0x275   : > { %2367 = vmatprep.subr.mxu0 %v1305_v36  ;;  %2351 = vmatmul.mubr.f32.vlgmr.msra.gmra.mxu1 %v5641_v16  ;;  %v1308_v36 = vld [vmem:[%s5569_s23 + $0x15f0] sm:$0xff]  ;;  %v1170_v44 = vld [vmem:[%s5569_s23 + $0x11a0] sm:$0xff] }
 0x276   : > { %2368 = vmatpush1.msra.mxu0 %v1304_v38  ;;  %2429 = vmatpush1.msra.mxu1 %v1651_v47  ;;  %v1240_v38 = vld [vmem:[%s5569_s23 + $0x13d0] sm:$0xff] }
 0x277   : > { %2369 = vmatprep.subr.mxu0 %v1236_v40  ;;  %2430 = vmatprep.subr.mxu1 %v1583_v49  ;;  %v1239_v40 = vld [vmem:[%s5569_s23 + $0x13c8] sm:$0xff]  ;;  %v616_v47 = vld [vmem:[%s5569_s23 + $0x50] sm:$0xff]  ;;  %v1033_v49 = vld [vmem:[%s5569_s23 + $0xd58] sm:$0xff] }
 0x278   : > { %2370 = vmatpush1.msra.mxu0 %v1235_v42  ;;  %2421 = vmatprep.mubr.f32.mxu0 %v5350_v28  ;;  %v1171_v42 = vld [vmem:[%s5569_s23 + $0x11a8] sm:$0xff] }
 0x279   : > { %2371 = vmatprep.subr.mxu0 %v1167_v43  ;;  %2431 = vmatpush1.msra.mxu1 %v1582_v52  ;;  %v685_v43 = vld [vmem:[%s5569_s23 + $0x278] sm:$0xff]  ;;  %v964_v52 = vld [vmem:[%s5569_s23 + $0xb30] sm:$0xff] }
 0x27a   : > { %2372 = vmatpush1.msra.mxu0 %v1166_v45  ;;  %2432 = vmatprep.subr.mxu1 %v1514_v54  ;;  %v617_v45 = vld [vmem:[%s5569_s23 + $0x58] sm:$0xff]  ;;  %v963_v54 = vld [vmem:[%s5569_s23 + $0xb28] sm:$0xff] }
 0x27b   : > { %2373 = vmatprep.subr.mxu0 %v1098_v46  ;;  %2433 = vmatpush1.msra.mxu1 %v1513_v56  ;;  %v1102_v46 = vld [vmem:[%s5569_s23 + $0xf80] sm:$0xff]  ;;  %v895_v56 = vld [vmem:[%s5569_s23 + $0x908] sm:$0xff] }
 0x27c   : > { %2374 = vmatpush1.msra.mxu0 %v1097_v48  ;;  %2434 = vmatprep.subr.mxu1 %v1445_v58  ;;  %v1101_v48 = vld [vmem:[%s5569_s23 + $0xf78] sm:$0xff]  ;;  %v1586_v58 = vld [vmem:[%s5569_s23 + $0x1ea0] sm:$0xff] }
 0x27d   : > { %2375 = vmatprep.subr.mxu0 %v1029_v50  ;;  %2435 = vmatpush1.msra.mxu1 %v1444_v60  ;;  %v1656_v50 = vld [vmem:[%s5569_s23 + $0x20d0] sm:$0xff]  ;;  %v1518_v60 = vld [vmem:[%s5569_s23 + $0x1c80] sm:$0xff] }
 0x27e   : > { %2376 = vmatpush1.msra.mxu0 %v1028_v51  ;;  %2436 = vmatprep.subr.mxu1 %v1376_v62  ;;  %v1032_v51 = vld [vmem:[%s5569_s23 + $0xd50] sm:$0xff]  ;;  %v1517_v62 = vld [vmem:[%s5569_s23 + $0x1c78] sm:$0xff] }
 0x27f   : > { %2377 = vmatprep.subr.mxu0 %v960_v53  ;;  %2437 = vmatpush1.msra.mxu1 %v1375_v0  ;;  %v1655_v53 = vld [vmem:[%s5569_s23 + $0x20c8] sm:$0xff]  ;;  %v1449_v0 = vld [vmem:[%s5569_s23 + $0x1a58] sm:$0xff] }
 0x280   : > { %2378 = vmatpush1.msra.mxu0 %v959_v55  ;;  %2438 = vmatprep.subr.mxu1 %v1307_v2  ;;  %v1587_v55 = vld [vmem:[%s5569_s23 + $0x1ea8] sm:$0xff]  ;;  %v1448_v2 = vld [vmem:[%s5569_s23 + $0x1a50] sm:$0xff] }
 0x281   : > { %2379 = vmatprep.subr.mxu0 %v891_v57  ;;  %2439 = vmatpush1.msra.mxu1 %v1306_v4  ;;  %v894_v57 = vld [vmem:[%s5569_s23 + $0x900] sm:$0xff]  ;;  %v1380_v4 = vld [vmem:[%s5569_s23 + $0x1830] sm:$0xff] }
 0x282   : > { %2380 = vmatpush1.msra.mxu0 %v890_v59  ;;  %2440 = vmatprep.subr.mxu1 %v1238_v6  ;;  %v826_v59 = vld [vmem:[%s5569_s23 + $0x6e0] sm:$0xff]  ;;  %v1379_v6 = vld [vmem:[%s5569_s23 + $0x1828] sm:$0xff] }
 0x283   : > { %2381 = vmatprep.subr.mxu0 %v822_v61  ;;  %2441 = vmatpush1.msra.mxu1 %v1237_v8  ;;  %v825_v61 = vld [vmem:[%s5569_s23 + $0x6d8] sm:$0xff]  ;;  %v1311_v8 = vld [vmem:[%s5569_s23 + $0x1608] sm:$0xff] }
 0x284   : > { %2382 = vmatpush1.msra.mxu0 %v821_v63  ;;  %2442 = vmatprep.subr.mxu1 %v1169_v10  ;;  %v757_v63 = vld [vmem:[%s5569_s23 + $0x4b8] sm:$0xff]  ;;  %v1310_v10 = vld [vmem:[%s5569_s23 + $0x1600] sm:$0xff] }
 0x285   : > { %2383 = vmatprep.subr.mxu0 %v753_v1  ;;  %2443 = vmatpush1.msra.mxu1 %v1168_v12  ;;  %v756_v1 = vld [vmem:[%s5569_s23 + $0x4b0] sm:$0xff]  ;;  %v1657_v12 = vld [vmem:[%s5569_s23 + $0x20d8] sm:$0xff] }
 0x286   : > { %2384 = vmatpush1.msra.mxu0 %v752_v3  ;;  %2444 = vmatprep.subr.mxu1 %v1100_v15  ;;  %v688_v3 = vld [vmem:[%s5569_s23 + $0x290] sm:$0xff]  ;;  %v1241_v15 = vld [vmem:[%s5569_s23 + $0x13d8] sm:$0xff] }
 0x287   : > { %2385 = vmatprep.subr.mxu0 %v684_v5  ;;  %2445 = vmatpush1.msra.mxu1 %v1099_v18  ;;  %v687_v5 = vld [vmem:[%s5569_s23 + $0x288] sm:$0xff]  ;;  %v1173_v18 = vld [vmem:[%s5569_s23 + $0x11b8] sm:$0xff] }
 0x288   : > { %2386 = vmatpush1.msra.mxu0 %v683_v7  ;;  %2446 = vmatprep.subr.mxu1 %v1031_v20  ;;  %v619_v7 = vld [vmem:[%s5569_s23 + $0x68] sm:$0xff]  ;;  %v1172_v20 = vld [vmem:[%s5569_s23 + $0x11b0] sm:$0xff] }
 0x289   : > { %2387 = vmatprep.subr.mxu0 %v615_v9  ;;  %2447 = vmatpush1.msra.mxu1 %v1030_v22  ;;  %v618_v9 = vld [vmem:[%s5569_s23 + $0x60] sm:$0xff]  ;;  %v1104_v22 = vld [vmem:[%s5569_s23 + $0xf90] sm:$0xff] }
 0x28a   : > { %2388 = vmatpush1.msra.mxu0 %v614_v11  ;;  %2448 = vmatprep.subr.mxu1 %v962_v24  ;;  %v1658_v11 = vld [vmem:[%s5569_s23 + $0x20e0] sm:$0xff]  ;;  %v1103_v24 = vld [vmem:[%s5569_s23 + $0xf88] sm:$0xff] }
 0x28b   : > { %2422 = vmatmul.mubr.f32.vlgmr.msra.gmra.mxu0 %v5641_v16  ;;  %2499 = vmatprep.subr.mxu0 %v1654_v13  ;;  %v1242_v13 = vld [vmem:[%s5569_s23 + $0x13e0] sm:$0xff] }
 0x28c   : > { %2500 = vmatpush1.msra.mxu0 %v1653_v14  ;;  %2449 = vmatpush1.msra.mxu1 %v961_v26  ;;  %v1589_v14 = vld [vmem:[%s5569_s23 + $0x1eb8] sm:$0xff]  ;;  %v1035_v26 = vld [vmem:[%s5569_s23 + $0xd68] sm:$0xff] }
 0x28d   : > { %2501 = vmatprep.subr.mxu0 %v1585_v17  ;;  %2450 = vmatprep.subr.mxu1 %v893_v29  ;;  %v1588_v17 = vld [vmem:[%s5569_s23 + $0x1eb0] sm:$0xff]  ;;  %v1034_v29 = vld [vmem:[%s5569_s23 + $0xd60] sm:$0xff] }
 0x28e   : > { %2502 = vmatpush1.msra.mxu0 %v1584_v19  ;;  %2451 = vmatpush1.msra.mxu1 %v892_v31  ;;  %v1520_v19 = vld [vmem:[%s5569_s23 + $0x1c90] sm:$0xff]  ;;  %v966_v31 = vld [vmem:[%s5569_s23 + $0xb40] sm:$0xff] }
 0x28f   : > { %2503 = vmatprep.subr.mxu0 %v1516_v21  ;;  %2452 = vmatprep.subr.mxu1 %v824_v33  ;;  %v1519_v21 = vld [vmem:[%s5569_s23 + $0x1c88] sm:$0xff]  ;;  %v965_v33 = vld [vmem:[%s5569_s23 + $0xb38] sm:$0xff] }
 0x290   : > { %2504 = vmatpush1.msra.mxu0 %v1515_v23  ;;  %2453 = vmatpush1.msra.mxu1 %v823_v35  ;;  %v1451_v23 = vld [vmem:[%s5569_s23 + $0x1a68] sm:$0xff]  ;;  %v897_v35 = vld [vmem:[%s5569_s23 + $0x918] sm:$0xff] }
 0x291   : > { %2505 = vmatprep.subr.mxu0 %v1447_v25  ;;  %2454 = vmatprep.subr.mxu1 %v755_v37  ;;  %v1450_v25 = vld [vmem:[%s5569_s23 + $0x1a60] sm:$0xff]  ;;  %v896_v37 = vld [vmem:[%s5569_s23 + $0x910] sm:$0xff] }
 0x292   : > { %2506 = vmatpush1.msra.mxu0 %v1446_v27  ;;  %2455 = vmatpush1.msra.mxu1 %v754_v39  ;;  %v1382_v27 = vld [vmem:[%s5569_s23 + $0x1840] sm:$0xff]  ;;  %v828_v39 = vld [vmem:[%s5569_s23 + $0x6f0] sm:$0xff] }
 0x293   : > { %2507 = vmatprep.subr.mxu0 %v1378_v30  ;;  %2456 = vmatprep.subr.mxu1 %v686_v41  ;;  %v1381_v30 = vld [vmem:[%s5569_s23 + $0x1838] sm:$0xff]  ;;  %v827_v41 = vld [vmem:[%s5569_s23 + $0x6e8] sm:$0xff] }
 0x294   : > { %2508 = vmatpush1.msra.mxu0 %v1377_v32  ;;  %2457 = vmatpush1.msra.mxu1 %v685_v43  ;;  %v1313_v32 = vld [vmem:[%s5569_s23 + $0x1618] sm:$0xff]  ;;  %v759_v43 = vld [vmem:[%s5569_s23 + $0x4c8] sm:$0xff] }
 0x295   : > { %2509 = vmatprep.subr.mxu0 %v1309_v34  ;;  %2458 = vmatprep.subr.mxu1 %v617_v45  ;;  %v1312_v34 = vld [vmem:[%s5569_s23 + $0x1610] sm:$0xff]  ;;  %v758_v45 = vld [vmem:[%s5569_s23 + $0x4c0] sm:$0xff] }
 0x296   : > { %2510 = vmatpush1.msra.mxu0 %v1308_v36  ;;  %2459 = vmatpush1.msra.mxu1 %v616_v47  ;;  %v1244_v36 = vld [vmem:[%s5569_s23 + $0x13f0] sm:$0xff]  ;;  %v690_v47 = vld [vmem:[%s5569_s23 + $0x2a0] sm:$0xff] }
 0x297   : > { %2511 = vmatprep.subr.mxu0 %v1240_v38  ;;  %2492 = vmatprep.mubr.f32.mxu1 %v5350_v28  ;;  %v1243_v38 = vld [vmem:[%s5569_s23 + $0x13e8] sm:$0xff] }
 0x298   : > { %2512 = vmatpush1.msra.mxu0 %v1239_v40  ;;  %2570 = vmatprep.subr.mxu1 %v1656_v50  ;;  %v1175_v40 = vld [vmem:[%s5569_s23 + $0x11c8] sm:$0xff]  ;;  %v1036_v50 = vld [vmem:[%s5569_s23 + $0xd70] sm:$0xff] }
 0x299   : > { %2513 = vmatprep.subr.mxu0 %v1171_v42  ;;  %2493 = vmatmul.mubr.f32.vlgmr.msra.gmra.mxu1 %v5641_v16  ;;  %v1174_v42 = vld [vmem:[%s5569_s23 + $0x11c0] sm:$0xff] }
 0x29a   : > { %2514 = vmatpush1.msra.mxu0 %v1170_v44  ;;  %2571 = vmatpush1.msra.mxu1 %v1655_v53  ;;  %v1106_v44 = vld [vmem:[%s5569_s23 + $0xfa0] sm:$0xff]  ;;  %v620_v53 = vld [vmem:[%s5569_s23 + $0x70] sm:$0xff] }
 0x29b   : > { %2515 = vmatprep.subr.mxu0 %v1102_v46  ;;  %2572 = vmatprep.subr.mxu1 %v1587_v55  ;;  %v1105_v46 = vld [vmem:[%s5569_s23 + $0xf98] sm:$0xff]  ;;  %v899_v55 = vld [vmem:[%s5569_s23 + $0x928] sm:$0xff] }
 0x29c   : > { %2516 = vmatpush1.msra.mxu0 %v1101_v48  ;;  %2563 = vmatprep.mubr.f32.mxu0 %v5350_v28  ;;  %v1037_v48 = vld [vmem:[%s5569_s23 + $0xd78] sm:$0xff] }
 0x29d   : > { %2517 = vmatprep.subr.mxu0 %v1033_v49  ;;  %2573 = vmatpush1.msra.mxu1 %v1586_v58  ;;  %v689_v49 = vld [vmem:[%s5569_s23 + $0x298] sm:$0xff]  ;;  %v830_v58 = vld [vmem:[%s5569_s23 + $0x700] sm:$0xff] }
 0x29e   : > { %2518 = vmatpush1.msra.mxu0 %v1032_v51  ;;  %2574 = vmatprep.subr.mxu1 %v1518_v60  ;;  %v621_v51 = vld [vmem:[%s5569_s23 + $0x78] sm:$0xff] }
 0x29f   : > { %2519 = vmatprep.subr.mxu0 %v964_v52  ;;  %2575 = vmatpush1.msra.mxu1 %v1517_v62  ;;  %v968_v52 = vld [vmem:[%s5569_s23 + $0xb50] sm:$0xff]  ;;  %v829_v60 = vld [vmem:[%s5569_s23 + $0x6f8] sm:$0xff] }
 0x2a0   : > { %2520 = vmatpush1.msra.mxu0 %v963_v54  ;;  %2576 = vmatprep.subr.mxu1 %v1449_v0  ;;  %v967_v54 = vld [vmem:[%s5569_s23 + $0xb48] sm:$0xff]  ;;  %v761_v62 = vld [vmem:[%s5569_s23 + $0x4d8] sm:$0xff]  ;;  %v1590_v0 = vld [vmem:[%s5569_s23 + $0x1ec0] sm:$0xff] }
 0x2a1   : > { %2521 = vmatprep.subr.mxu0 %v895_v56  ;;  %2577 = vmatpush1.msra.mxu1 %v1448_v2  ;;  %v1660_v56 = vld [vmem:[%s5569_s23 + $0x20f0] sm:$0xff]  ;;  %v1522_v2 = vld [vmem:[%s5569_s23 + $0x1ca0] sm:$0xff] }
 0x2a2   : > { %2522 = vmatpush1.msra.mxu0 %v894_v57  ;;  %2578 = vmatprep.subr.mxu1 %v1380_v4  ;;  %v898_v57 = vld [vmem:[%s5569_s23 + $0x920] sm:$0xff]  ;;  %v1521_v4 = vld [vmem:[%s5569_s23 + $0x1c98] sm:$0xff] }
 0x2a3   : > { %2523 = vmatprep.subr.mxu0 %v826_v59  ;;  %2579 = vmatpush1.msra.mxu1 %v1379_v6  ;;  %v1659_v59 = vld [vmem:[%s5569_s23 + $0x20e8] sm:$0xff]  ;;  %v1453_v6 = vld [vmem:[%s5569_s23 + $0x1a78] sm:$0xff] }
 0x2a4   : > { %2524 = vmatpush1.msra.mxu0 %v825_v61  ;;  %2580 = vmatprep.subr.mxu1 %v1311_v8  ;;  %v1591_v61 = vld [vmem:[%s5569_s23 + $0x1ec8] sm:$0xff]  ;;  %v1452_v8 = vld [vmem:[%s5569_s23 + $0x1a70] sm:$0xff] }
 0x2a5   : > { %2525 = vmatprep.subr.mxu0 %v757_v63  ;;  %2581 = vmatpush1.msra.mxu1 %v1310_v10  ;;  %v760_v63 = vld [vmem:[%s5569_s23 + $0x4d0] sm:$0xff]  ;;  %v1661_v10 = vld [vmem:[%s5569_s23 + $0x20f8] sm:$0xff] }
 0x2a6   : > { %2526 = vmatpush1.msra.mxu0 %v756_v1  ;;  %2582 = vmatprep.subr.mxu1 %v1242_v13  ;;  %v692_v1 = vld [vmem:[%s5569_s23 + $0x2b0] sm:$0xff]  ;;  %v1383_v13 = vld [vmem:[%s5569_s23 + $0x1848] sm:$0xff] }
 0x2a7   : > { %2527 = vmatprep.subr.mxu0 %v688_v3  ;;  %2583 = vmatpush1.msra.mxu1 %v1241_v15  ;;  %v691_v3 = vld [vmem:[%s5569_s23 + $0x2a8] sm:$0xff] }
 0x2a8   : > { %2528 = vmatpush1.msra.mxu0 %v687_v5  ;;  %2584 = vmatprep.subr.mxu1 %v1173_v18  ;;  %v623_v5 = vld [vmem:[%s5569_s23 + $0x88] sm:$0xff]  ;;  %v1314_v18 = vld [vmem:[%s5569_s23 + $0x1620] sm:$0xff] }
 0x2a9   : > { %2529 = vmatprep.subr.mxu0 %v619_v7  ;;  %2585 = vmatpush1.msra.mxu1 %v1172_v20  ;;  %v622_v7 = vld [vmem:[%s5569_s23 + $0x80] sm:$0xff]  ;;  %v1315_v15 = vld [vmem:[%s5569_s23 + $0x1628] sm:$0xff] }
 0x2aa   : > { %2530 = vmatpush1.msra.mxu0 %v618_v9  ;;  %2586 = vmatprep.subr.mxu1 %v1104_v22  ;;  %v1662_v9 = vld [vmem:[%s5569_s23 + $0x2100] sm:$0xff] }
 0x2ab   : > { %2564 = vmatmul.mubr.f32.vlgmr.msra.gmra.mxu0 %v5641_v16  ;;  %2641 = vmatprep.subr.mxu0 %v1658_v11  ;;  %v1384_v11 = vld [vmem:[%s5569_s23 + $0x1850] sm:$0xff]  ;;  %v1246_v20 = vld [vmem:[%s5569_s23 + $0x1400] sm:$0xff] }
 0x2ac   : > { %2642 = vmatpush1.msra.mxu0 %v1657_v12  ;;  %2587 = vmatpush1.msra.mxu1 %v1103_v24  ;;  %v1593_v12 = vld [vmem:[%s5569_s23 + $0x1ed8] sm:$0xff]  ;;  %v1454_v22 = vld [vmem:[%s5569_s23 + $0x1a80] sm:$0xff] }
 0x2ad   : > { %2643 = vmatprep.subr.mxu0 %v1589_v14  ;;  %2588 = vmatprep.subr.mxu1 %v1035_v26  ;;  %v1592_v14 = vld [vmem:[%s5569_s23 + $0x1ed0] sm:$0xff]  ;;  %v1386_v24 = vld [vmem:[%s5569_s23 + $0x1860] sm:$0xff]  ;;  %v1385_v26 = vld [vmem:[%s5569_s23 + $0x1858] sm:$0xff] }
 0x2ae   : > { %2644 = vmatpush1.msra.mxu0 %v1588_v17  ;;  %2589 = vmatpush1.msra.mxu1 %v1034_v29  ;;  %v1524_v17 = vld [vmem:[%s5569_s23 + $0x1cb0] sm:$0xff]  ;;  %v1317_v29 = vld [vmem:[%s5569_s23 + $0x1638] sm:$0xff] }
 0x2af   : > { %2645 = vmatprep.subr.mxu0 %v1520_v19  ;;  %2590 = vmatprep.subr.mxu1 %v966_v31  ;;  %v1523_v19 = vld [vmem:[%s5569_s23 + $0x1ca8] sm:$0xff]  ;;  %v1316_v31 = vld [vmem:[%s5569_s23 + $0x1630] sm:$0xff] }
 0x2b0   : > { %2646 = vmatpush1.msra.mxu0 %v1519_v21  ;;  %2591 = vmatpush1.msra.mxu1 %v965_v33  ;;  %v1245_v21 = vld [vmem:[%s5569_s23 + $0x13f8] sm:$0xff]  ;;  %v1248_v33 = vld [vmem:[%s5569_s23 + $0x1410] sm:$0xff] }
 0x2b1   : > { %2647 = vmatprep.subr.mxu0 %v1451_v23  ;;  %2592 = vmatprep.subr.mxu1 %v897_v35  ;;  %v1177_v23 = vld [vmem:[%s5569_s23 + $0x11d8] sm:$0xff]  ;;  %v1247_v35 = vld [vmem:[%s5569_s23 + $0x1408] sm:$0xff] }
 0x2b2   : > { %2648 = vmatpush1.msra.mxu0 %v1450_v25  ;;  %2593 = vmatpush1.msra.mxu1 %v896_v37  ;;  %v1176_v25 = vld [vmem:[%s5569_s23 + $0x11d0] sm:$0xff]  ;;  %v1179_v37 = vld [vmem:[%s5569_s23 + $0x11e8] sm:$0xff] }
 0x2b3   : > { %2649 = vmatprep.subr.mxu0 %v1382_v27  ;;  %2594 = vmatprep.subr.mxu1 %v828_v39  ;;  %v1108_v27 = vld [vmem:[%s5569_s23 + $0xfb0] sm:$0xff]  ;;  %v1178_v39 = vld [vmem:[%s5569_s23 + $0x11e0] sm:$0xff] }
 0x2b4   : > { %2650 = vmatpush1.msra.mxu0 %v1381_v30  ;;  %2595 = vmatpush1.msra.mxu1 %v827_v41  ;;  %v1107_v30 = vld [vmem:[%s5569_s23 + $0xfa8] sm:$0xff]  ;;  %v1110_v41 = vld [vmem:[%s5569_s23 + $0xfc0] sm:$0xff] }
 0x2b5   : > { %2651 = vmatprep.subr.mxu0 %v1313_v32  ;;  %2596 = vmatprep.subr.mxu1 %v759_v43  ;;  %v1039_v32 = vld [vmem:[%s5569_s23 + $0xd88] sm:$0xff]  ;;  %v1109_v43 = vld [vmem:[%s5569_s23 + $0xfb8] sm:$0xff] }
 0x2b6   : > { %2652 = vmatpush1.msra.mxu0 %v1312_v34  ;;  %2597 = vmatpush1.msra.mxu1 %v758_v45  ;;  %v1038_v34 = vld [vmem:[%s5569_s23 + $0xd80] sm:$0xff]  ;;  %v1041_v45 = vld [vmem:[%s5569_s23 + $0xd98] sm:$0xff] }
 0x2b7   : > { %2653 = vmatprep.subr.mxu0 %v1244_v36  ;;  %2598 = vmatprep.subr.mxu1 %v690_v47  ;;  %v970_v36 = vld [vmem:[%s5569_s23 + $0xb60] sm:$0xff]  ;;  %v1040_v47 = vld [vmem:[%s5569_s23 + $0xd90] sm:$0xff] }
 0x2b8   : > { %2654 = vmatpush1.msra.mxu0 %v1243_v38  ;;  %2599 = vmatpush1.msra.mxu1 %v689_v49  ;;  %v969_v38 = vld [vmem:[%s5569_s23 + $0xb58] sm:$0xff]  ;;  %v972_v49 = vld [vmem:[%s5569_s23 + $0xb70] sm:$0xff] }
 0x2b9   : > { %2655 = vmatprep.subr.mxu0 %v1175_v40  ;;  %2600 = vmatprep.subr.mxu1 %v621_v51  ;;  %v901_v40 = vld [vmem:[%s5569_s23 + $0x938] sm:$0xff]  ;;  %v971_v51 = vld [vmem:[%s5569_s23 + $0xb68] sm:$0xff] }
 0x2ba   : > { %2656 = vmatpush1.msra.mxu0 %v1174_v42  ;;  %2601 = vmatpush1.msra.mxu1 %v620_v53  ;;  %v900_v42 = vld [vmem:[%s5569_s23 + $0x930] sm:$0xff]  ;;  %v903_v53 = vld [vmem:[%s5569_s23 + $0x948] sm:$0xff] }
 0x2bb   : > { %2657 = vmatprep.subr.mxu0 %v1106_v44  ;;  %2634 = vmatprep.mubr.f32.mxu1 %v5350_v28  ;;  %v832_v44 = vld [vmem:[%s5569_s23 + $0x710] sm:$0xff] }
 0x2bc   : > { %2658 = vmatpush1.msra.mxu0 %v1105_v46  ;;  %2712 = vmatprep.subr.mxu1 %v1660_v56  ;;  %v831_v46 = vld [vmem:[%s5569_s23 + $0x708] sm:$0xff]  ;;  %v625_v56 = vld [vmem:[%s5569_s23 + $0x98] sm:$0xff] }
 0x2bd   : > { %2659 = vmatprep.subr.mxu0 %v1037_v48  ;;  %2635 = vmatmul.mubr.f32.vlgmr.msra.gmra.mxu1 %v5641_v16  ;;  %v763_v48 = vld [vmem:[%s5569_s23 + $0x4e8] sm:$0xff] }
 0x2be   : > { %2660 = vmatpush1.msra.mxu0 %v1036_v50  ;;  %2713 = vmatpush1.msra.mxu1 %v1659_v59  ;;  %v762_v50 = vld [vmem:[%s5569_s23 + $0x4e0] sm:$0xff]  ;;  %v833_v59 = vld [vmem:[%s5569_s23 + $0x718] sm:$0xff] }
 0x2bf   : > { %2661 = vmatprep.subr.mxu0 %v968_v52  ;;  %2714 = vmatprep.subr.mxu1 %v1591_v61  ;;  %v694_v52 = vld [vmem:[%s5569_s23 + $0x2c0] sm:$0xff]  ;;  %v1664_v61 = vld [vmem:[%s5569_s23 + $0x2110] sm:$0xff] }
 0x2c0   : > { %2662 = vmatpush1.msra.mxu0 %v967_v54  ;;  %2705 = vmatprep.mubr.f32.mxu0 %v5350_v28  ;;  %v693_v54 = vld [vmem:[%s5569_s23 + $0x2b8] sm:$0xff] }
 0x2c1   : > { %2663 = vmatprep.subr.mxu0 %v899_v55  ;;  %2715 = vmatpush1.msra.mxu1 %v1590_v0  ;;  %v902_v55 = vld [vmem:[%s5569_s23 + $0x940] sm:$0xff]  ;;  %v1663_v0 = vld [vmem:[%s5569_s23 + $0x2108] sm:$0xff] }
 0x2c2   : > { %2664 = vmatpush1.msra.mxu0 %v898_v57  ;;  %2716 = vmatprep.subr.mxu1 %v1522_v2  ;;  %v834_v57 = vld [vmem:[%s5569_s23 + $0x720] sm:$0xff]  ;;  %v1595_v2 = vld [vmem:[%s5569_s23 + $0x1ee8] sm:$0xff] }
 0x2c3   : > { %2665 = vmatprep.subr.mxu0 %v830_v58  ;;  %2717 = vmatpush1.msra.mxu1 %v1521_v4  ;;  %v624_v58 = vld [vmem:[%s5569_s23 + $0x90] sm:$0xff]  ;;  %v627_v4 = vld [vmem:[%s5569_s23 + $0xa8] sm:$0xff] }
 0x2c4   : > { %2666 = vmatpush1.msra.mxu0 %v829_v60  ;;  %2718 = vmatprep.subr.mxu1 %v1453_v6  ;;  %v765_v60 = vld [vmem:[%s5569_s23 + $0x4f8] sm:$0xff]  ;;  %v1594_v6 = vld [vmem:[%s5569_s23 + $0x1ee0] sm:$0xff] }
 0x2c5   : > { %2667 = vmatprep.subr.mxu0 %v761_v62  ;;  %2719 = vmatpush1.msra.mxu1 %v1452_v8  ;;  %v764_v62 = vld [vmem:[%s5569_s23 + $0x4f0] sm:$0xff]  ;;  %v1666_v8 = vld [vmem:[%s5569_s23 + $0x2120] sm:$0xff] }
 0x2c6   : > { %2668 = vmatpush1.msra.mxu0 %v760_v63  ;;  %2720 = vmatprep.subr.mxu1 %v1384_v11  ;;  %v696_v63 = vld [vmem:[%s5569_s23 + $0x2d0] sm:$0xff]  ;;  %v1457_v11 = vld [vmem:[%s5569_s23 + $0x1a98] sm:$0xff] }
 0x2c7   : > { %2669 = vmatprep.subr.mxu0 %v692_v1  ;;  %2721 = vmatpush1.msra.mxu1 %v1383_v13  ;;  %v695_v1 = vld [vmem:[%s5569_s23 + $0x2c8] sm:$0xff]  ;;  %v1456_v13 = vld [vmem:[%s5569_s23 + $0x1a90] sm:$0xff] }
 0x2c8   : > { %2670 = vmatpush1.msra.mxu0 %v691_v3  ;;  %2722 = vmatprep.subr.mxu1 %v1315_v15  ;;  %v5958_v3 = vld [vmem:[#allocation2] sm:$0xff] }
 0x2c9   : > { %2671 = vmatprep.subr.mxu0 %v623_v5  ;;  %2723 = vmatpush1.msra.mxu1 %v1314_v18  ;;  %v626_v5 = vld [vmem:[%s5569_s23 + $0xa0] sm:$0xff]  ;;  %v1388_v15 = vld [vmem:[%s5569_s23 + $0x1870] sm:$0xff]  ;;  %v1387_v18 = vld [vmem:[%s5569_s23 + $0x1868] sm:$0xff] }
 0x2ca   : > { %2672 = vmatpush1.msra.mxu0 %v622_v7  ;;  %2724 = vmatprep.subr.mxu1 %v1246_v20  ;;  %v1526_v7 = vld [vmem:[%s5569_s23 + $0x1cc0] sm:$0xff]  ;;  %v1319_v20 = vld [vmem:[%s5569_s23 + $0x1648] sm:$0xff] }
 0x2cb   : > { %2706 = vmatmul.mubr.f32.vlgmr.msra.gmra.mxu0 %v5641_v16  ;;  %2783 = vmatprep.subr.mxu0 %v1662_v9  ;;  %v1455_v16 = vld [vmem:[%s5569_s23 + $0x1a88] sm:$0xff]  ;;  %v1525_v9 = vld [vmem:[%s5569_s23 + $0x1cb8] sm:$0xff] }
 0x2cc   : > { %2784 = vmatpush1.msra.mxu0 %v1661_v10  ;;  %2725 = vmatpush1.msra.mxu1 %v1245_v21  ;;  %v1665_v10 = vld [vmem:[%s5569_s23 + $0x2118] sm:$0xff]  ;;  %v1318_v21 = vld [vmem:[%s5569_s23 + $0x1640] sm:$0xff] }
 0x2cd   : > { %2785 = vmatprep.subr.mxu0 %v1593_v12  ;;  %2726 = vmatprep.subr.mxu1 %v1177_v23  ;;  %v1597_v12 = vld [vmem:[%s5569_s23 + $0x1ef8] sm:$0xff]  ;;  %v1250_v23 = vld [vmem:[%s5569_s23 + $0x1420] sm:$0xff] }
 0x2ce   : > { %2786 = vmatpush1.msra.mxu0 %v1592_v14  ;;  %2727 = vmatpush1.msra.mxu1 %v1176_v25  ;;  %v1596_v14 = vld [vmem:[%s5569_s23 + $0x1ef0] sm:$0xff]  ;;  %v1249_v25 = vld [vmem:[%s5569_s23 + $0x1418] sm:$0xff] }
 0x2cf   : > { %2787 = vmatprep.subr.mxu0 %v1524_v17  ;;  %2728 = vmatprep.subr.mxu1 %v1108_v27  ;;  %v1528_v17 = vld [vmem:[%s5569_s23 + $0x1cd0] sm:$0xff]  ;;  %v1181_v27 = vld [vmem:[%s5569_s23 + $0x11f8] sm:$0xff] }
 0x2d0   : > { %2788 = vmatpush1.msra.mxu0 %v1523_v19  ;;  %2729 = vmatpush1.msra.mxu1 %v1107_v30  ;;  %v1527_v19 = vld [vmem:[%s5569_s23 + $0x1cc8] sm:$0xff]  ;;  %v1180_v30 = vld [vmem:[%s5569_s23 + $0x11f0] sm:$0xff] }
 0x2d1   : > { %2789 = vmatprep.subr.mxu0 %v1455_v16  ;;  %2730 = vmatprep.subr.mxu1 %v1039_v32  ;;  %v1459_v16 = vld [vmem:[%s5569_s23 + $0x1aa8] sm:$0xff]  ;;  %v1112_v32 = vld [vmem:[%s5569_s23 + $0xfd0] sm:$0xff] }
 0x2d2   : > { %2790 = vmatpush1.msra.mxu0 %v1454_v22  ;;  %2731 = vmatpush1.msra.mxu1 %v1038_v34  ;;  %v1458_v22 = vld [vmem:[%s5569_s23 + $0x1aa0] sm:$0xff]  ;;  %v1111_v34 = vld [vmem:[%s5569_s23 + $0xfc8] sm:$0xff] }
 0x2d3   : > { %2791 = vmatprep.subr.mxu0 %v1386_v24  ;;  %2732 = vmatprep.subr.mxu1 %v970_v36  ;;  %v1390_v24 = vld [vmem:[%s5569_s23 + $0x1880] sm:$0xff]  ;;  %v1043_v36 = vld [vmem:[%s5569_s23 + $0xda8] sm:$0xff] }
 0x2d4   : > { %2792 = vmatpush1.msra.mxu0 %v1385_v26  ;;  %2733 = vmatpush1.msra.mxu1 %v969_v38  ;;  %v1389_v26 = vld [vmem:[%s5569_s23 + $0x1878] sm:$0xff]  ;;  %v1042_v38 = vld [vmem:[%s5569_s23 + $0xda0] sm:$0xff] }
 0x2d5   : > { %2793 = vmatprep.subr.mxu0 %v1317_v29  ;;  %2734 = vmatprep.subr.mxu1 %v901_v40  ;;  %v1321_v29 = vld [vmem:[%s5569_s23 + $0x1658] sm:$0xff]  ;;  %v974_v40 = vld [vmem:[%s5569_s23 + $0xb80] sm:$0xff] }
 0x2d6   : > { %2794 = vmatpush1.msra.mxu0 %v1316_v31  ;;  %2735 = vmatpush1.msra.mxu1 %v900_v42  ;;  %v1320_v31 = vld [vmem:[%s5569_s23 + $0x1650] sm:$0xff]  ;;  %v973_v42 = vld [vmem:[%s5569_s23 + $0xb78] sm:$0xff] }
 0x2d7   : > { %2795 = vmatprep.subr.mxu0 %v1248_v33  ;;  %2736 = vmatprep.subr.mxu1 %v832_v44  ;;  %v1252_v33 = vld [vmem:[%s5569_s23 + $0x1430] sm:$0xff]  ;;  %v905_v44 = vld [vmem:[%s5569_s23 + $0x958] sm:$0xff] }
 0x2d8   : > { %2796 = vmatpush1.msra.mxu0 %v1247_v35  ;;  %2737 = vmatpush1.msra.mxu1 %v831_v46  ;;  %v1251_v35 = vld [vmem:[%s5569_s23 + $0x1428] sm:$0xff]  ;;  %v904_v46 = vld [vmem:[%s5569_s23 + $0x950] sm:$0xff] }
 0x2d9   : > { %2797 = vmatprep.subr.mxu0 %v1179_v37  ;;  %2738 = vmatprep.subr.mxu1 %v763_v48  ;;  %v1183_v37 = vld [vmem:[%s5569_s23 + $0x1208] sm:$0xff]  ;;  %v836_v48 = vld [vmem:[%s5569_s23 + $0x730] sm:$0xff] }
 0x2da   : > { %2798 = vmatpush1.msra.mxu0 %v1178_v39  ;;  %2739 = vmatpush1.msra.mxu1 %v762_v50  ;;  %v1182_v39 = vld [vmem:[%s5569_s23 + $0x1200] sm:$0xff]  ;;  %v976_v50 = vld [vmem:[%s5569_s23 + $0xb90] sm:$0xff] }
 0x2db   : > { %2799 = vmatprep.subr.mxu0 %v1110_v41  ;;  %2740 = vmatprep.subr.mxu1 %v694_v52  ;;  %v1114_v41 = vld [vmem:[%s5569_s23 + $0xfe0] sm:$0xff]  ;;  %v975_v52 = vld [vmem:[%s5569_s23 + $0xb88] sm:$0xff] }
 0x2dc   : > { %2800 = vmatpush1.msra.mxu0 %v1109_v43  ;;  %2741 = vmatpush1.msra.mxu1 %v693_v54  ;;  %v1113_v43 = vld [vmem:[%s5569_s23 + $0xfd8] sm:$0xff]  ;;  %v907_v54 = vld [vmem:[%s5569_s23 + $0x968] sm:$0xff] }
 0x2dd   : > { %2801 = vmatprep.subr.mxu0 %v1041_v45  ;;  %2742 = vmatprep.subr.mxu1 %v625_v56  ;;  %v1045_v45 = vld [vmem:[%s5569_s23 + $0xdb8] sm:$0xff]  ;;  %v906_v56 = vld [vmem:[%s5569_s23 + $0x960] sm:$0xff] }
 0x2de   : > { %2802 = vmatpush1.msra.mxu0 %v1040_v47  ;;  %2743 = vmatpush1.msra.mxu1 %v624_v58  ;;  %v1044_v47 = vld [vmem:[%s5569_s23 + $0xdb0] sm:$0xff] }
 0x2df   : > { %2803 = vmatprep.subr.mxu0 %v972_v49  ;;  %2776 = vmatprep.mubr.f32.mxu1 %v5350_v28  ;;  %v1728_v49 = vlaneseq }
 0x2e0   : > { %2804 = vmatpush1.msra.mxu0 %v971_v51  ;;  %2854 = vmatprep.subr.mxu1 %v1664_v61  ;;  %v835_v51 = vld [vmem:[%s5569_s23 + $0x728] sm:$0xff]  ;;  %v837_v61 = vld [vmem:[%s5569_s23 + $0x738] sm:$0xff] }
 0x2e1   : > { %2805 = vmatprep.subr.mxu0 %v903_v53  ;;  %2777 = vmatmul.mubr.f32.vlgmr.msra.gmra.mxu1 %v5958_v3  ;;  %v767_v53 = vld [vmem:[%s5569_s23 + $0x508] sm:$0xff]  ;;  %v6015_v58 = vshrl.u32 %v1728_v49, 7  ;;  %v1116_v49 = vld [vmem:[%s5569_s23 + $0xff0] sm:$0xff] }
 0x2e2   : > { %2806 = vmatpush1.msra.mxu0 %v902_v55  ;;  %2855 = vmatpush1.msra.mxu1 %v1663_v0  ;;  %v766_v55 = vld [vmem:[%s5569_s23 + $0x500] sm:$0xff]  ;;  %v628_v0 = vld [vmem:[%s5569_s23 + $0xb0] sm:$0xff] }
 0x2e3   : > { %2807 = vmatprep.subr.mxu0 %v834_v57  ;;  %2856 = vmatprep.subr.mxu1 %v1595_v2  ;;  %v698_v57 = vld [vmem:[%s5569_s23 + $0x2e0] sm:$0xff]  ;;  %v6025_v2 = vsub.s32 0, %v6015_v58 }
 0x2e4   : > { %2808 = vmatpush1.msra.mxu0 %v833_v59  ;;  %2847 = vmatprep.mubr.f32.mxu0 %v5350_v28  ;;  %v838_v59 = vld [vmem:[%s5569_s23 + $0x740] sm:$0xff] }
 0x2e5   : > { %2809 = vmatprep.subr.mxu0 %v765_v60  ;;  %2857 = vmatpush1.msra.mxu1 %v1594_v6  ;;  %v697_v60 = vld [vmem:[%s5569_s23 + $0x2d8] sm:$0xff]  ;;  %v6030_v6 = vld [vmem:[%s5577_s13] sm:$0xff] }
 0x2e6   : > { %2810 = vmatpush1.msra.mxu0 %v764_v62  ;;  %2858 = vmatprep.subr.mxu1 %v1526_v7  ;;  %v629_v62 = vld [vmem:[%s5569_s23 + $0xb8] sm:$0xff]  ;;  %v699_v7 = vld [vmem:[%s5569_s23 + $0x2e8] sm:$0xff] }
 0x2e7   : > { %2811 = vmatprep.subr.mxu0 %v696_v63  ;;  %2859 = vmatpush1.msra.mxu1 %v1525_v9  ;;  %v769_v63 = vld [vmem:[%s5569_s23 + $0x518] sm:$0xff]  ;;  %v1667_v9 = vld [vmem:[%s5569_s23 + $0x2128] sm:$0xff] }
 0x2e8   : > { %2812 = vmatpush1.msra.mxu0 %v695_v1  ;;  %2860 = vmatprep.subr.mxu1 %v1457_v11  ;;  %v768_v1 = vld [vmem:[%s5569_s23 + $0x510] sm:$0xff]  ;;  %v1599_v11 = vld [vmem:[%s5569_s23 + $0x1f08] sm:$0xff] }
 0x2e9   : > { %2813 = vmatprep.subr.mxu0 %v627_v4  ;;  %2861 = vmatpush1.msra.mxu1 %v1456_v13  ;;  %v700_v4 = vld [vmem:[%s5569_s23 + $0x2f0] sm:$0xff]  ;;  %v1731_v13 = vrot.slane %v6030_v6, %v6025_v2 }
 0x2ea   : > { %2814 = vmatpush1.msra.mxu0 %v626_v5  ;;  %2862 = vmatprep.subr.mxu1 %v1388_v15  ;;  %v1668_v5 = vld [vmem:[%s5569_s23 + $0x2130] sm:$0xff]  ;;  %v1530_v15 = vld [vmem:[%s5569_s23 + $0x1ce0] sm:$0xff] }
 0x2eb   : > { %2848 = vmatmul.mubr.f32.vlgmr.msra.gmra.mxu0 %v5958_v3  ;;  %2925 = vmatprep.subr.mxu0 %v1666_v8  ;;  %v6034_v8 = vsub.s32 1, %v6015_v58 }
 0x2ec   : > { %2926 = vmatpush1.msra.mxu0 %v1665_v10  ;;  %2863 = vmatpush1.msra.mxu1 %v1387_v18  ;;  %v631_v10 = vld [vmem:[%s5569_s23 + $0xc8] sm:$0xff] }
 0x2ed   : > { %2927 = vmatprep.subr.mxu0 %v1597_v12  ;;  %2864 = vmatprep.subr.mxu1 %v1319_v20  ;;  %v630_v12 = vld [vmem:[%s5569_s23 + $0xc0] sm:$0xff]  ;;  %v1529_v20 = vld [vmem:[%s5569_s23 + $0x1cd8] sm:$0xff] }
 0x2ee   : > { %2928 = vmatpush1.msra.mxu0 %v1596_v14  ;;  %2865 = vmatpush1.msra.mxu1 %v1318_v21  ;;  %v1598_v14 = vld [vmem:[%s5569_s23 + $0x1f00] sm:$0xff]  ;;  %v1669_v21 = vld [vmem:[%s5569_s23 + $0x2138] sm:$0xff] }
 0x2ef   : > { %2929 = vmatprep.subr.mxu0 %v1528_v17  ;;  %2866 = vmatprep.subr.mxu1 %v1250_v23  ;;  %v1735_v17 = vrot.slane %v6030_v6, %v6034_v8 }
 0x2f0   : > { %2930 = vmatpush1.msra.mxu0 %v1527_v19  ;;  %2867 = vmatpush1.msra.mxu1 %v1249_v25  ;;  %v1670_v19 = vld [vmem:[%s5569_s23 + $0x2140] sm:$0xff]  ;;  %v1460_v25 = vld [vmem:[%s5569_s23 + $0x1ab0] sm:$0xff] }
 0x2f1   : > { %2931 = vmatprep.subr.mxu0 %v1459_v16  ;;  %2868 = vmatprep.subr.mxu1 %v1181_v27  ;;  %v1600_v27 = vld [vmem:[%s5569_s23 + $0x1f10] sm:$0xff] }
 0x2f2   : > { %2932 = vmatpush1.msra.mxu0 %v1458_v22  ;;  %2869 = vmatpush1.msra.mxu1 %v1180_v30  ;;  %v1461_v22 = vld [vmem:[%s5569_s23 + $0x1ab8] sm:$0xff]  ;;  %v1532_v30 = vld [vmem:[%s5569_s23 + $0x1cf0] sm:$0xff] }
 0x2f3   : > { %2933 = vmatprep.subr.mxu0 %v1390_v24  ;;  %2870 = vmatprep.subr.mxu1 %v1112_v32  ;;  %v1601_v24 = vld [vmem:[%s5569_s23 + $0x1f18] sm:$0xff]  ;;  %v6062_v32 = vsub.s32 2, %v6015_v58 }
 0x2f4   : > { %2934 = vmatpush1.msra.mxu0 %v1389_v26  ;;  %2871 = vmatpush1.msra.mxu1 %v1111_v34  ;;  %v1323_v34 = vld [vmem:[%s5569_s23 + $0x1668] sm:$0xff] }
 0x2f5   : > { %2935 = vmatprep.subr.mxu0 %v1321_v29  ;;  %2872 = vmatprep.subr.mxu1 %v1043_v36  ;;  %v1392_v29 = vld [vmem:[%s5569_s23 + $0x1890] sm:$0xff]  ;;  %v1322_v36 = vld [vmem:[%s5569_s23 + $0x1660] sm:$0xff] }
 0x2f6   : > { %2936 = vmatpush1.msra.mxu0 %v1320_v31  ;;  %2873 = vmatpush1.msra.mxu1 %v1042_v38  ;;  %v1391_v31 = vld [vmem:[%s5569_s23 + $0x1888] sm:$0xff]  ;;  %v1462_v38 = vld [vmem:[%s5569_s23 + $0x1ac0] sm:$0xff] }
 0x2f7   : > { %2937 = vmatprep.subr.mxu0 %v1252_v33  ;;  %2874 = vmatprep.subr.mxu1 %v974_v40  ;;  %v1531_v33 = vld [vmem:[%s5569_s23 + $0x1ce8] sm:$0xff]  ;;  %v1394_v40 = vld [vmem:[%s5569_s23 + $0x18a0] sm:$0xff] }
 0x2f8   : > { %2938 = vmatpush1.msra.mxu0 %v1251_v35  ;;  %2875 = vmatpush1.msra.mxu1 %v973_v42  ;;  %v1463_v35 = vld [vmem:[%s5569_s23 + $0x1ac8] sm:$0xff]  ;;  %v1739_v42 = vrot.slane %v6030_v6, %v6062_v32 }
 0x2f9   : > { %2939 = vmatprep.subr.mxu0 %v1183_v37  ;;  %2876 = vmatprep.subr.mxu1 %v905_v44  ;;  %v6070_v37 = vsub.s32 3, %v6015_v58  ;;  %v1185_v44 = vld [vmem:[%s5569_s23 + $0x1218] sm:$0xff] }
 0x2fa   : > { %2940 = vmatpush1.msra.mxu0 %v1182_v39  ;;  %2877 = vmatpush1.msra.mxu1 %v904_v46  ;;  %v1254_v39 = vld [vmem:[%s5569_s23 + $0x1440] sm:$0xff]  ;;  %v1184_v46 = vld [vmem:[%s5569_s23 + $0x1210] sm:$0xff] }
 0x2fb   : > { %2941 = vmatprep.subr.mxu0 %v1114_v41  ;;  %2878 = vmatprep.subr.mxu1 %v836_v48  ;;  %v1253_v41 = vld [vmem:[%s5569_s23 + $0x1438] sm:$0xff]  ;;  %v1324_v48 = vld [vmem:[%s5569_s23 + $0x1670] sm:$0xff] }
 0x2fc   : > { %2942 = vmatpush1.msra.mxu0 %v1113_v43  ;;  %2879 = vmatpush1.msra.mxu1 %v835_v51  ;;  %v1393_v43 = vld [vmem:[%s5569_s23 + $0x1898] sm:$0xff]  ;;  %v1256_v51 = vld [vmem:[%s5569_s23 + $0x1450] sm:$0xff] }
 0x2fd   : > { %2943 = vmatprep.subr.mxu0 %v1045_v45  ;;  %2880 = vmatprep.subr.mxu1 %v767_v53  ;;  %v1325_v45 = vld [vmem:[%s5569_s23 + $0x1678] sm:$0xff] }
 0x2fe   : > { %2944 = vmatpush1.msra.mxu0 %v1044_v47  ;;  %2881 = vmatpush1.msra.mxu1 %v766_v55  ;;  %v1743_v47 = vrot.slane %v6030_v6, %v6070_v37  ;;  %v1047_v55 = vld [vmem:[%s5569_s23 + $0xdc8] sm:$0xff] }
 0x2ff   : > { %2945 = vmatprep.subr.mxu0 %v976_v50  ;;  %2882 = vmatprep.subr.mxu1 %v698_v57  ;;  %v1187_v57 = vld [vmem:[%s5569_s23 + $0x1228] sm:$0xff] }
 0x300   : > { %2946 = vmatpush1.msra.mxu0 %v975_v52  ;;  %2883 = vmatpush1.msra.mxu1 %v697_v60  ;;  %v1115_v52 = vld [vmem:[%s5569_s23 + $0xfe8] sm:$0xff] }
 0x301   : > { %2947 = vmatprep.subr.mxu0 %v907_v54  ;;  %2884 = vmatprep.subr.mxu1 %v629_v62  ;;  %v1255_v54 = vld [vmem:[%s5569_s23 + $0x1448] sm:$0xff]  ;;  %v978_v62 = vld [vmem:[%s5569_s23 + $0xba0] sm:$0xff] }
 0x302   : > { %2948 = vmatpush1.msra.mxu0 %v906_v56  ;;  %2885 = vmatpush1.msra.mxu1 %v628_v0  ;;  %v977_v0 = vld [vmem:[%s5569_s23 + $0xb98] sm:$0xff] }
 0x303   : > { %2949 = vmatprep.subr.mxu0 %v838_v59  ;;  %2918 = vmatprep.mubr.f32.mxu1 %v5350_v28  ;;  %v1046_v59 = vld [vmem:[%s5569_s23 + $0xdc0] sm:$0xff] }
 0x304   : > { %2950 = vmatpush1.msra.mxu0 %v837_v61  ;;  %2996 = vmatprep.subr.mxu1 %v1668_v5  ;;  %v1186_v61 = vld [vmem:[%s5569_s23 + $0x1220] sm:$0xff]  ;;  %v1049_v5 = vld [vmem:[%s5569_s23 + $0xdd8] sm:$0xff] }
 0x305   : > { %2951 = vmatprep.subr.mxu0 %v769_v63  ;;  %2919 = vmatmul.mubr.f32.vlgmr.msra.gmra.mxu1 %v5958_v3  ;;  %v1118_v63 = vld [vmem:[%s5569_s23 + $0x1000] sm:$0xff] }
 0x306   : > { %2952 = vmatpush1.msra.mxu0 %v768_v1  ;;  %2997 = vmatpush1.msra.mxu1 %v1667_v9  ;;  %v1117_v1 = vld [vmem:[%s5569_s23 + $0xff8] sm:$0xff]  ;;  %v1048_v9 = vld [vmem:[%s5569_s23 + $0xdd0] sm:$0xff] }
 0x307   : > { %2953 = vmatprep.subr.mxu0 %v700_v4  ;;  %2998 = vmatprep.subr.mxu1 %v1599_v11  ;;  %v909_v4 = vld [vmem:[%s5569_s23 + $0x978] sm:$0xff]  ;;  %v980_v11 = vld [vmem:[%s5569_s23 + $0xbb0] sm:$0xff] }
 0x308   : > { %2954 = vmatpush1.msra.mxu0 %v699_v7  ;;  %2989 = vmatprep.mubr.f32.mxu0 %v5350_v28  ;;  %v908_v7 = vld [vmem:[%s5569_s23 + $0x970] sm:$0xff] }
 0x309   : > { %2955 = vmatprep.subr.mxu0 %v631_v10  ;;  %2999 = vmatpush1.msra.mxu1 %v1598_v14  ;;  %v840_v10 = vld [vmem:[%s5569_s23 + $0x750] sm:$0xff]  ;;  %v771_v14 = vld [vmem:[%s5569_s23 + $0x528] sm:$0xff] }
 0x30a   : > { %2956 = vmatpush1.msra.mxu0 %v630_v12  ;;  %3000 = vmatprep.subr.mxu1 %v1530_v15  ;;  %v839_v12 = vld [vmem:[%s5569_s23 + $0x748] sm:$0xff] }
 0x30b   : > { %v2139_v18 = vpop.f32.mrf.mxu0  ;;  %2990 = vmatmul.mubr.f32.vlgmr.msra.gmra.mxu0 %v5958_v3  ;;  %3067 = vmatprep.subr.mxu0 %v1670_v19  ;;  %v911_v15 = vld [vmem:[%s5569_s23 + $0x988] sm:$0xff]  ;;  %v702_v19 = vld [vmem:[%s5569_s23 + $0x300] sm:$0xff] }
 0x30c   : > { %v2140_v16 = vadd.f32 %v2139_v18, %v1731_v13  ;;  %3001 = vmatpush1.msra.mxu1 %v1529_v20  ;;  %3068 = vmatpush1.msra.mxu0 %v1669_v21  ;;  %v979_v13 = vld [vmem:[%s5569_s23 + $0xba8] sm:$0xff]  ;;  %v910_v18 = vld [vmem:[%s5569_s23 + $0x980] sm:$0xff]  ;;  %v841_v21 = vld [vmem:[%s5569_s23 + $0x758] sm:$0xff] }
 0x30d   : > { %v2141_v23 = vpop.f32.mrf.mxu0  ;;  %3002 = vmatprep.subr.mxu1 %v1461_v22  ;;  %3069 = vmatprep.subr.mxu0 %v1601_v24  ;;  %v842_v20 = vld [vmem:[%s5569_s23 + $0x760] sm:$0xff]  ;;  %v633_v22 = vld [vmem:[%s5569_s23 + $0xd8] sm:$0xff] }
 0x30e   : > { %4557 = vst [vmem:[%s5579_s12] sm:$0xff] %v2140_v16  ;;  %v2142_v26 = vadd.f32 %v2141_v23, %v1735_v17  ;;  %3003 = vmatpush1.msra.mxu1 %v1460_v25  ;;  %3070 = vmatpush1.msra.mxu0 %v1600_v27  ;;  %v770_v17 = vld [vmem:[%s5569_s23 + $0x520] sm:$0xff]  ;;  %v701_v16 = vld [vmem:[%s5569_s23 + $0x2f8] sm:$0xff]  ;;  %v6117_v23 = vsub.s32 4, %v6015_v58  ;;  %v632_v25 = vld [vmem:[%s5569_s23 + $0xd0] sm:$0xff]  ;;  %v6123_v27 = vsub.s32 5, %v6015_v58 }
 0x30f   : > { %3004 = vmatprep.subr.mxu1 %v1392_v29  ;;  %3071 = vmatprep.subr.mxu0 %v1532_v30  ;;  %v773_v24 = vld [vmem:[%s5569_s23 + $0x538] sm:$0xff]  ;;  %v704_v29 = vld [vmem:[%s5569_s23 + $0x310] sm:$0xff] }
 0x310   : > { %4558 = vst [vmem:[%s5579_s12 + $0x8] sm:$0xff] %v2142_v26  ;;  %3005 = vmatpush1.msra.mxu1 %v1391_v31  ;;  %3072 = vmatpush1.msra.mxu0 %v1531_v33  ;;  %v772_v26 = vld [vmem:[%s5569_s23 + $0x530] sm:$0xff]  ;;  %v703_v31 = vld [vmem:[%s5569_s23 + $0x308] sm:$0xff]  ;;  %v1747_v33 = vrot.slane %v6030_v6, %v6117_v23 }
 0x311   : > { %3006 = vmatprep.subr.mxu1 %v1323_v34  ;;  %3073 = vmatprep.subr.mxu0 %v1463_v35  ;;  %v2210_v50 = vpop.f32.mrf.mxu1  ;;  %v1672_v30 = vld [vmem:[%s5569_s23 + $0x2150] sm:$0xff]  ;;  %v1671_v34 = vld [vmem:[%s5569_s23 + $0x2148] sm:$0xff] }
 0x312   : > { %3007 = vmatpush1.msra.mxu1 %v1322_v36  ;;  %3074 = vmatpush1.msra.mxu0 %v1462_v38  ;;  %v2211_v53 = vadd.f32 %v2210_v50, %v1739_v42  ;;  %v635_v35 = vld [vmem:[%s5569_s23 + $0xe8] sm:$0xff]  ;;  %v634_v38 = vld [vmem:[%s5569_s23 + $0xe0] sm:$0xff]  ;;  %v1605_v50 = vld [vmem:[%s5569_s23 + $0x1f38] sm:$0xff] }
 0x313   : > { %3008 = vmatprep.subr.mxu1 %v1254_v39  ;;  %3075 = vmatprep.subr.mxu0 %v1394_v40  ;;  %v2212_v56 = vpop.f32.mrf.mxu1  ;;  %v1603_v36 = vld [vmem:[%s5569_s23 + $0x1f28] sm:$0xff]  ;;  %v1751_v39 = vrot.slane %v6030_v6, %v6123_v27  ;;  %v1602_v40 = vld [vmem:[%s5569_s23 + $0x1f20] sm:$0xff] }
 0x314   : > { %3009 = vmatpush1.msra.mxu1 %v1253_v41  ;;  %3076 = vmatpush1.msra.mxu0 %v1393_v43  ;;  %4559 = vst [vmem:[%s5579_s12 + $0x10] sm:$0xff] %v2211_v53  ;;  %v2213_v60 = vadd.f32 %v2212_v56, %v1743_v47  ;;  %v1534_v43 = vld [vmem:[%s5569_s23 + $0x1d00] sm:$0xff]  ;;  %v1673_v47 = vld [vmem:[%s5569_s23 + $0x2158] sm:$0xff]  ;;  %v1396_v53 = vld [vmem:[%s5569_s23 + $0x18b0] sm:$0xff] }
 0x315   : > { %3010 = vmatprep.subr.mxu1 %v1185_v44  ;;  %3077 = vmatprep.subr.mxu0 %v1325_v45  ;;  %v1674_v44 = vld [vmem:[%s5569_s23 + $0x2160] sm:$0xff]  ;;  %v1533_v45 = vld [vmem:[%s5569_s23 + $0x1cf8] sm:$0xff]  ;;  %v1535_v56 = vld [vmem:[%s5569_s23 + $0x1d08] sm:$0xff] }
 0x316   : > { %3011 = vmatpush1.msra.mxu1 %v1184_v46  ;;  %3078 = vmatpush1.msra.mxu0 %v1324_v48  ;;  %4560 = vst [vmem:[%s5579_s12 + $0x18] sm:$0xff] %v2213_v60  ;;  %v1326_v60 = vld [vmem:[%s5569_s23 + $0x1680] sm:$0xff] }
 0x317   : > { %3012 = vmatprep.subr.mxu1 %v1116_v49  ;;  %3079 = vmatprep.subr.mxu0 %v1256_v51  ;;  %v1465_v49 = vld [vmem:[%s5569_s23 + $0x1ad8] sm:$0xff]  ;;  %v1464_v51 = vld [vmem:[%s5569_s23 + $0x1ad0] sm:$0xff] }
 0x318   : > { %3013 = vmatpush1.msra.mxu1 %v1115_v52  ;;  %3080 = vmatpush1.msra.mxu0 %v1255_v54  ;;  %v1604_v52 = vld [vmem:[%s5569_s23 + $0x1f30] sm:$0xff] }
 0x319   : > { %3014 = vmatprep.subr.mxu1 %v1047_v55  ;;  %3081 = vmatprep.subr.mxu0 %v1187_v57  ;;  %v1536_v54 = vld [vmem:[%s5569_s23 + $0x1d10] sm:$0xff]  ;;  %v1395_v55 = vld [vmem:[%s5569_s23 + $0x18a8] sm:$0xff] }
 0x31a   : > { %3015 = vmatpush1.msra.mxu1 %v1046_v59  ;;  %3082 = vmatpush1.msra.mxu0 %v1186_v61  ;;  %v1327_v57 = vld [vmem:[%s5569_s23 + $0x1688] sm:$0xff]  ;;  %v6159_v61 = vsub.s32 6, %v6015_v58 }
 0x31b   : > { %3016 = vmatprep.subr.mxu1 %v978_v62  ;;  %3083 = vmatprep.subr.mxu0 %v1118_v63  ;;  %v1467_v59 = vld [vmem:[%s5569_s23 + $0x1ae8] sm:$0xff]  ;;  %v1466_v62 = vld [vmem:[%s5569_s23 + $0x1ae0] sm:$0xff] }
 0x31c   : > { %3017 = vmatpush1.msra.mxu1 %v977_v0  ;;  %3084 = vmatpush1.msra.mxu0 %v1117_v1  ;;  %v1258_v63 = vld [vmem:[%s5569_s23 + $0x1460] sm:$0xff]  ;;  %v1257_v1 = vld [vmem:[%s5569_s23 + $0x1458] sm:$0xff] }
 0x31d   : > { %3018 = vmatprep.subr.mxu1 %v909_v4  ;;  %3085 = vmatprep.subr.mxu0 %v1049_v5  ;;  %v1398_v0 = vld [vmem:[%s5569_s23 + $0x18c0] sm:$0xff]  ;;  %v6166_v4 = vsub.s32 7, %v6015_v58  ;;  %v1397_v5 = vld [vmem:[%s5569_s23 + $0x18b8] sm:$0xff]  ;;  %v1328_v58 = vld [vmem:[%s5569_s23 + $0x1690] sm:$0xff] }
 0x31e   : > { %3019 = vmatpush1.msra.mxu1 %v908_v7  ;;  %3086 = vmatpush1.msra.mxu0 %v1048_v9  ;;  %v1189_v7 = vld [vmem:[%s5569_s23 + $0x1238] sm:$0xff] }
 0x31f   : > { %3020 = vmatprep.subr.mxu1 %v840_v10  ;;  %3087 = vmatprep.subr.mxu0 %v980_v11  ;;  %v1329_v9 = vld [vmem:[%s5569_s23 + $0x1698] sm:$0xff]  ;;  %v1188_v10 = vld [vmem:[%s5569_s23 + $0x1230] sm:$0xff]  ;;  %v1755_v11 = vrot.slane %v6030_v6, %v6159_v61 }
 0x320   : > { %3021 = vmatpush1.msra.mxu1 %v839_v12  ;;  %3088 = vmatpush1.msra.mxu0 %v979_v13  ;;  %v1120_v12 = vld [vmem:[%s5569_s23 + $0x1010] sm:$0xff] }
 0x321   : > { %3022 = vmatprep.subr.mxu1 %v771_v14  ;;  %3089 = vmatprep.subr.mxu0 %v911_v15  ;;  %v1260_v13 = vld [vmem:[%s5569_s23 + $0x1470] sm:$0xff]  ;;  %v1119_v14 = vld [vmem:[%s5569_s23 + $0x1008] sm:$0xff]  ;;  %v1759_v15 = vrot.slane %v6030_v6, %v6166_v4  ;;  %v982_v6 = vld [vmem:[%s5569_s23 + $0xbc0] sm:$0xff] }
 0x322   : > { %3023 = vmatpush1.msra.mxu1 %v770_v17  ;;  %3090 = vmatpush1.msra.mxu0 %v910_v18  ;;  %v1259_v17 = vld [vmem:[%s5569_s23 + $0x1468] sm:$0xff] }
 0x323   : > { %3024 = vmatprep.subr.mxu1 %v702_v19  ;;  %3091 = vmatprep.subr.mxu0 %v842_v20  ;;  %v1051_v18 = vld [vmem:[%s5569_s23 + $0xde8] sm:$0xff] }
 0x324   : > { %3025 = vmatpush1.msra.mxu1 %v701_v16  ;;  %3092 = vmatpush1.msra.mxu0 %v841_v21  ;;  %v1191_v20 = vld [vmem:[%s5569_s23 + $0x1248] sm:$0xff]  ;;  %v1050_v16 = vld [vmem:[%s5569_s23 + $0xde0] sm:$0xff] }
 0x325   : > { %3026 = vmatprep.subr.mxu1 %v633_v22  ;;  %3093 = vmatprep.subr.mxu0 %v773_v24  ;;  %v1190_v22 = vld [vmem:[%s5569_s23 + $0x1240] sm:$0xff] }
 0x326   : > { %3027 = vmatpush1.msra.mxu1 %v632_v25  ;;  %3094 = vmatpush1.msra.mxu0 %v772_v26  ;;  %v1122_v25 = vld [vmem:[%s5569_s23 + $0x1020] sm:$0xff]  ;;  %v981_v26 = vld [vmem:[%s5569_s23 + $0xbb8] sm:$0xff] }
 0x327   : > { %3060 = vmatprep.mubr.f32.mxu1 %v5350_v28  ;;  %3095 = vmatprep.subr.mxu0 %v704_v29 }
 0x328   : > { %3138 = vmatprep.subr.mxu1 %v1672_v30  ;;  %3061 = vmatmul.mubr.f32.vlgmr.msra.gmra.mxu1 %v5958_v3  ;;  %v1121_v30 = vld [vmem:[%s5569_s23 + $0x1018] sm:$0xff] }
 0x329   : > { %3096 = vmatpush1.msra.mxu0 %v703_v31  ;;  %3139 = vmatpush1.msra.mxu1 %v1671_v34  ;;  %v913_v31 = vld [vmem:[%s5569_s23 + $0x998] sm:$0xff]  ;;  %v912_v34 = vld [vmem:[%s5569_s23 + $0x990] sm:$0xff] }
 0x32a   : > { %3097 = vmatprep.subr.mxu0 %v635_v35  ;;  %3140 = vmatprep.subr.mxu1 %v1603_v36  ;;  %v1052_v35 = vld [vmem:[%s5569_s23 + $0xdf0] sm:$0xff] }
 0x32b   : > { %v2281_v41 = vpop.f32.mrf.mxu0  ;;  %3098 = vmatpush1.msra.mxu0 %v634_v38  ;;  %3131 = vmatprep.mubr.f32.mxu0 %v5350_v28  ;;  %v844_v36 = vld [vmem:[%s5569_s23 + $0x770] sm:$0xff] }
 0x32c   : > { %v2282_v42 = vadd.f32 %v2281_v41, %v1747_v33  ;;  %3141 = vmatpush1.msra.mxu1 %v1602_v40  ;;  %3132 = vmatmul.mubr.f32.vlgmr.msra.gmra.mxu0 %v5958_v3  ;;  %v1053_v33 = vld [vmem:[%s5569_s23 + $0xdf8] sm:$0xff]  ;;  %v984_v38 = vld [vmem:[%s5569_s23 + $0xbd0] sm:$0xff]  ;;  %v983_v40 = vld [vmem:[%s5569_s23 + $0xbc8] sm:$0xff] }
 0x32d   : > { %v2283_v46 = vpop.f32.mrf.mxu0  ;;  %3142 = vmatprep.subr.mxu1 %v1534_v43  ;;  %3209 = vmatprep.subr.mxu0 %v1674_v44  ;;  %v775_v41 = vld [vmem:[%s5569_s23 + $0x548] sm:$0xff]  ;;  %v774_v43 = vld [vmem:[%s5569_s23 + $0x540] sm:$0xff] }
 0x32e   : > { %4561 = vst [vmem:[%s5579_s12 + $0x20] sm:$0xff] %v2282_v42  ;;  %v2284_v48 = vadd.f32 %v2283_v46, %v1751_v39  ;;  %3143 = vmatpush1.msra.mxu1 %v1533_v45  ;;  %3210 = vmatpush1.msra.mxu0 %v1673_v47  ;;  %v843_v39 = vld [vmem:[%s5569_s23 + $0x768] sm:$0xff]  ;;  %v914_v44 = vld [vmem:[%s5569_s23 + $0x9a0] sm:$0xff]  ;;  %v705_v47 = vld [vmem:[%s5569_s23 + $0x318] sm:$0xff] }
 0x32f   : > { %3144 = vmatprep.subr.mxu1 %v1465_v49  ;;  %3211 = vmatprep.subr.mxu0 %v1605_v50  ;;  %v915_v42 = vld [vmem:[%s5569_s23 + $0x9a8] sm:$0xff]  ;;  %v706_v45 = vld [vmem:[%s5569_s23 + $0x320] sm:$0xff]  ;;  %v845_v49 = vld [vmem:[%s5569_s23 + $0x778] sm:$0xff] }
 0x330   : > { %4562 = vst [vmem:[%s5579_s12 + $0x28] sm:$0xff] %v2284_v48  ;;  %3145 = vmatpush1.msra.mxu1 %v1464_v51  ;;  %3212 = vmatpush1.msra.mxu0 %v1604_v52  ;;  %v846_v46 = vld [vmem:[%s5569_s23 + $0x780] sm:$0xff]  ;;  %v6207_v48 = vld [vmem:[%s5577_s13 + $0x8] sm:$0xff]  ;;  %v637_v50 = vld [vmem:[%s5569_s23 + $0xf8] sm:$0xff] }
 0x331   : > { %3146 = vmatprep.subr.mxu1 %v1396_v53  ;;  %3213 = vmatprep.subr.mxu0 %v1536_v54  ;;  %v777_v51 = vld [vmem:[%s5569_s23 + $0x558] sm:$0xff]  ;;  %v636_v52 = vld [vmem:[%s5569_s23 + $0xf0] sm:$0xff]  ;;  %v1763_v54 = vrot.slane %v6207_v48, %v6025_v2 }
 0x332   : > { %3147 = vmatpush1.msra.mxu1 %v1395_v55  ;;  %3214 = vmatpush1.msra.mxu0 %v1535_v56  ;;  %v776_v53 = vld [vmem:[%s5569_s23 + $0x550] sm:$0xff] }
 0x333   : > { %3148 = vmatprep.subr.mxu1 %v1327_v57  ;;  %3215 = vmatprep.subr.mxu0 %v1467_v59  ;;  %v708_v55 = vld [vmem:[%s5569_s23 + $0x330] sm:$0xff]  ;;  %v707_v57 = vld [vmem:[%s5569_s23 + $0x328] sm:$0xff]  ;;  %v1767_v59 = vrot.slane %v6207_v48, %v6034_v8 }
 0x334   : > { %3149 = vmatpush1.msra.mxu1 %v1326_v60  ;;  %3216 = vmatpush1.msra.mxu0 %v1466_v62  ;;  %v1676_v56 = vld [vmem:[%s5569_s23 + $0x2170] sm:$0xff]  ;;  %v1675_v60 = vld [vmem:[%s5569_s23 + $0x2168] sm:$0xff] }
 0x335   : > { %3150 = vmatprep.subr.mxu1 %v1258_v63  ;;  %3217 = vmatprep.subr.mxu0 %v1398_v0  ;;  %v2352_v19 = vpop.f32.mrf.mxu1  ;;  %v639_v62 = vld [vmem:[%s5569_s23 + $0x108] sm:$0xff] }
 0x336   : > { %3151 = vmatpush1.msra.mxu1 %v1257_v1  ;;  %3218 = vmatpush1.msra.mxu0 %v1397_v5  ;;  %v2353_v21 = vadd.f32 %v2352_v19, %v1755_v11  ;;  %v1607_v0 = vld [vmem:[%s5569_s23 + $0x1f48] sm:$0xff]  ;;  %v638_v1 = vld [vmem:[%s5569_s23 + $0x100] sm:$0xff]  ;;  %v1400_v19 = vld [vmem:[%s5569_s23 + $0x18d0] sm:$0xff] }
 0x337   : > { %3152 = vmatprep.subr.mxu1 %v1189_v7  ;;  %3219 = vmatprep.subr.mxu0 %v1329_v9  ;;  %v2354_v24 = vpop.f32.mrf.mxu1  ;;  %v1606_v7 = vld [vmem:[%s5569_s23 + $0x1f40] sm:$0xff] }
 0x338   : > { %3153 = vmatpush1.msra.mxu1 %v1188_v10  ;;  %3220 = vmatpush1.msra.mxu0 %v1328_v58  ;;  %4563 = vst [vmem:[%s5579_s12 + $0x30] sm:$0xff] %v2353_v21  ;;  %v2355_v29 = vadd.f32 %v2354_v24, %v1759_v15  ;;  %v1538_v10 = vld [vmem:[%s5569_s23 + $0x1d20] sm:$0xff]  ;;  %v1609_v15 = vld [vmem:[%s5569_s23 + $0x1f58] sm:$0xff]  ;;  %v1331_v21 = vld [vmem:[%s5569_s23 + $0x16a8] sm:$0xff] }
 0x339   : > { %3154 = vmatprep.subr.mxu1 %v1120_v12  ;;  %3221 = vmatprep.subr.mxu0 %v1260_v13  ;;  %v1678_v58 = vld [vmem:[%s5569_s23 + $0x2180] sm:$0xff]  ;;  %v1537_v12 = vld [vmem:[%s5569_s23 + $0x1d18] sm:$0xff] }
 0x33a   : > { %3155 = vmatpush1.msra.mxu1 %v1119_v14  ;;  %3222 = vmatpush1.msra.mxu0 %v1259_v17  ;;  %4564 = vst [vmem:[%s5579_s12 + $0x38] sm:$0xff] %v2355_v29  ;;  %v1677_v13 = vld [vmem:[%s5569_s23 + $0x2178] sm:$0xff]  ;;  %v1468_v17 = vld [vmem:[%s5569_s23 + $0x1af0] sm:$0xff]  ;;  %v1470_v24 = vld [vmem:[%s5569_s23 + $0x1b00] sm:$0xff] }
 0x33b   : > { %3156 = vmatprep.subr.mxu1 %v1051_v18  ;;  %3223 = vmatprep.subr.mxu0 %v1191_v20  ;;  %v1469_v14 = vld [vmem:[%s5569_s23 + $0x1af8] sm:$0xff]  ;;  %v1608_v18 = vld [vmem:[%s5569_s23 + $0x1f50] sm:$0xff] }
 0x33c   : > { %3157 = vmatpush1.msra.mxu1 %v1050_v16  ;;  %3224 = vmatpush1.msra.mxu0 %v1190_v22  ;;  %v1540_v20 = vld [vmem:[%s5569_s23 + $0x1d30] sm:$0xff]  ;;  %v1399_v16 = vld [vmem:[%s5569_s23 + $0x18c8] sm:$0xff]  ;;  %v1261_v29 = vld [vmem:[%s5569_s23 + $0x1478] sm:$0xff] }
 0x33d   : > { %3158 = vmatprep.subr.mxu1 %v982_v6  ;;  %3225 = vmatprep.subr.mxu0 %v1122_v25  ;;  %v1471_v22 = vld [vmem:[%s5569_s23 + $0x1b08] sm:$0xff]  ;;  %v1330_v6 = vld [vmem:[%s5569_s23 + $0x16a0] sm:$0xff] }
 0x33e   : > { %3159 = vmatpush1.msra.mxu1 %v981_v26  ;;  %3226 = vmatpush1.msra.mxu0 %v1121_v30  ;;  %v1262_v25 = vld [vmem:[%s5569_s23 + $0x1480] sm:$0xff]  ;;  %v1401_v30 = vld [vmem:[%s5569_s23 + $0x18d8] sm:$0xff] }
 0x33f   : > { %3160 = vmatprep.subr.mxu1 %v913_v31  ;;  %3227 = vmatprep.subr.mxu0 %v1053_v33  ;;  %v1402_v26 = vld [vmem:[%s5569_s23 + $0x18e0] sm:$0xff]  ;;  %v1193_v31 = vld [vmem:[%s5569_s23 + $0x1258] sm:$0xff] }
 0x340   : > { %3161 = vmatpush1.msra.mxu1 %v912_v34  ;;  %3228 = vmatpush1.msra.mxu0 %v1052_v35  ;;  %v1333_v33 = vld [vmem:[%s5569_s23 + $0x16b8] sm:$0xff]  ;;  %v1192_v34 = vld [vmem:[%s5569_s23 + $0x1250] sm:$0xff] }
 0x341   : > { %3162 = vmatprep.subr.mxu1 %v844_v36  ;;  %3229 = vmatprep.subr.mxu0 %v984_v38  ;;  %v1332_v35 = vld [vmem:[%s5569_s23 + $0x16b0] sm:$0xff] }
 0x342   : > { %3163 = vmatpush1.msra.mxu1 %v843_v39  ;;  %3230 = vmatpush1.msra.mxu0 %v983_v40  ;;  %v1124_v36 = vld [vmem:[%s5569_s23 + $0x1030] sm:$0xff]  ;;  %v1123_v39 = vld [vmem:[%s5569_s23 + $0x1028] sm:$0xff]  ;;  %v1771_v40 = vrot.slane %v6207_v48, %v6062_v32 }
 0x343   : > { %3164 = vmatprep.subr.mxu1 %v775_v41  ;;  %3231 = vmatprep.subr.mxu0 %v915_v42  ;;  %v1264_v38 = vld [vmem:[%s5569_s23 + $0x1490] sm:$0xff]  ;;  %v1263_v41 = vld [vmem:[%s5569_s23 + $0x1488] sm:$0xff] }
 0x344   : > { %3165 = vmatpush1.msra.mxu1 %v774_v43  ;;  %3232 = vmatpush1.msra.mxu0 %v914_v44  ;;  %v1055_v42 = vld [vmem:[%s5569_s23 + $0xe08] sm:$0xff]  ;;  %v1054_v44 = vld [vmem:[%s5569_s23 + $0xe00] sm:$0xff] }
 0x345   : > { %3166 = vmatprep.subr.mxu1 %v706_v45  ;;  %3233 = vmatprep.subr.mxu0 %v846_v46  ;;  %v1195_v43 = vld [vmem:[%s5569_s23 + $0x1268] sm:$0xff]  ;;  %v1775_v45 = vrot.slane %v6207_v48, %v6070_v37  ;;  %v1194_v46 = vld [vmem:[%s5569_s23 + $0x1260] sm:$0xff] }
 0x346   : > { %3167 = vmatpush1.msra.mxu1 %v705_v47  ;;  %3234 = vmatpush1.msra.mxu0 %v845_v49  ;;  %v986_v47 = vld [vmem:[%s5569_s23 + $0xbe0] sm:$0xff] }
 0x347   : > { %3168 = vmatprep.subr.mxu1 %v637_v50  ;;  %3235 = vmatprep.subr.mxu0 %v777_v51  ;;  %v1126_v50 = vld [vmem:[%s5569_s23 + $0x1040] sm:$0xff]  ;;  %v985_v51 = vld [vmem:[%s5569_s23 + $0xbd8] sm:$0xff] }
 0x348   : > { %3169 = vmatpush1.msra.mxu1 %v636_v52  ;;  %3236 = vmatpush1.msra.mxu0 %v776_v53  ;;  %v1125_v53 = vld [vmem:[%s5569_s23 + $0x1038] sm:$0xff] }
 0x349   : > { %3202 = vmatprep.mubr.f32.mxu1 %v5350_v28  ;;  %3237 = vmatprep.subr.mxu0 %v708_v55 }
 0x34a   : > { %3280 = vmatprep.subr.mxu1 %v1676_v56  ;;  %3203 = vmatmul.mubr.f32.vlgmr.msra.gmra.mxu1 %v5958_v3  ;;  %v1057_v56 = vld [vmem:[%s5569_s23 + $0xe18] sm:$0xff] }
 0x34b   : > { %v2423_v63 = vpop.f32.mrf.mxu0  ;;  %3238 = vmatpush1.msra.mxu0 %v707_v57  ;;  %3281 = vmatpush1.msra.mxu1 %v1675_v60  ;;  %v916_v57 = vld [vmem:[%s5569_s23 + $0x9b0] sm:$0xff] }
 0x34c   : > { %v2424_v5 = vadd.f32 %v2423_v63, %v1763_v54  ;;  %3239 = vmatprep.subr.mxu0 %v639_v62  ;;  %3282 = vmatprep.subr.mxu1 %v1607_v0  ;;  %v917_v54 = vld [vmem:[%s5569_s23 + $0x9b8] sm:$0xff]  ;;  %v1056_v60 = vld [vmem:[%s5569_s23 + $0xe10] sm:$0xff]  ;;  %v847_v0 = vld [vmem:[%s5569_s23 + $0x788] sm:$0xff] }
 0x34d   : > { %v2425_v9 = vpop.f32.mrf.mxu0  ;;  %3240 = vmatpush1.msra.mxu0 %v638_v1  ;;  %3273 = vmatprep.mubr.f32.mxu0 %v5350_v28  ;;  %v848_v62 = vld [vmem:[%s5569_s23 + $0x790] sm:$0xff]  ;;  %v987_v1 = vld [vmem:[%s5569_s23 + $0xbe8] sm:$0xff] }
 0x34e   : > { %4565 = vst [vmem:[%s5579_s12 + $0x40] sm:$0xff] %v2424_v5  ;;  %v2426_v11 = vadd.f32 %v2425_v9, %v1767_v59  ;;  %3283 = vmatpush1.msra.mxu1 %v1606_v7  ;;  %3274 = vmatmul.mubr.f32.vlgmr.msra.gmra.mxu0 %v5958_v3  ;;  %v1539_v3 = vld [vmem:[%s5569_s23 + $0x1d28] sm:$0xff]  ;;  %v988_v63 = vld [vmem:[%s5569_s23 + $0xbf0] sm:$0xff]  ;;  %v778_v9 = vld [vmem:[%s5569_s23 + $0x560] sm:$0xff] }
 0x34f   : > { %3284 = vmatprep.subr.mxu1 %v1538_v10  ;;  %3351 = vmatprep.subr.mxu0 %v1678_v58  ;;  %v779_v5 = vld [vmem:[%s5569_s23 + $0x568] sm:$0xff]  ;;  %v918_v10 = vld [vmem:[%s5569_s23 + $0x9c0] sm:$0xff] }
 0x350   : > { %4566 = vst [vmem:[%s5579_s12 + $0x48] sm:$0xff] %v2426_v11  ;;  %3285 = vmatpush1.msra.mxu1 %v1537_v12  ;;  %3352 = vmatpush1.msra.mxu0 %v1677_v13  ;;  %v919_v7 = vld [vmem:[%s5569_s23 + $0x9c8] sm:$0xff]  ;;  %v710_v11 = vld [vmem:[%s5569_s23 + $0x340] sm:$0xff]  ;;  %v709_v12 = vld [vmem:[%s5569_s23 + $0x338] sm:$0xff] }
 0x351   : > { %3286 = vmatprep.subr.mxu1 %v1469_v14  ;;  %3353 = vmatprep.subr.mxu0 %v1609_v15  ;;  %v850_v58 = vld [vmem:[%s5569_s23 + $0x7a0] sm:$0xff]  ;;  %v849_v13 = vld [vmem:[%s5569_s23 + $0x798] sm:$0xff]  ;;  %v1779_v15 = vrot.slane %v6207_v48, %v6117_v23 }
 0x352   : > { %3287 = vmatpush1.msra.mxu1 %v1468_v17  ;;  %3354 = vmatpush1.msra.mxu0 %v1608_v18  ;;  %v641_v14 = vld [vmem:[%s5569_s23 + $0x118] sm:$0xff]  ;;  %v640_v18 = vld [vmem:[%s5569_s23 + $0x110] sm:$0xff] }
 0x353   : > { %3288 = vmatprep.subr.mxu1 %v1400_v19  ;;  %3355 = vmatprep.subr.mxu0 %v1540_v20  ;;  %v781_v17 = vld [vmem:[%s5569_s23 + $0x578] sm:$0xff]  ;;  %v780_v19 = vld [vmem:[%s5569_s23 + $0x570] sm:$0xff]  ;;  %v1783_v20 = vrot.slane %v6207_v48, %v6123_v27 }
 0x354   : > { %3289 = vmatpush1.msra.mxu1 %v1399_v16  ;;  %3356 = vmatpush1.msra.mxu0 %v1539_v3  ;;  %v712_v16 = vld [vmem:[%s5569_s23 + $0x350] sm:$0xff] }
 0x355   : > { %3290 = vmatprep.subr.mxu1 %v1331_v21  ;;  %3357 = vmatprep.subr.mxu0 %v1471_v22  ;;  %v1680_v3 = vld [vmem:[%s5569_s23 + $0x2190] sm:$0xff]  ;;  %v711_v22 = vld [vmem:[%s5569_s23 + $0x348] sm:$0xff] }
 0x356   : > { %3291 = vmatpush1.msra.mxu1 %v1330_v6  ;;  %3358 = vmatpush1.msra.mxu0 %v1470_v24  ;;  %v1679_v24 = vld [vmem:[%s5569_s23 + $0x2188] sm:$0xff] }
 0x357   : > { %3292 = vmatprep.subr.mxu1 %v1262_v25  ;;  %3359 = vmatprep.subr.mxu0 %v1402_v26  ;;  %v643_v25 = vld [vmem:[%s5569_s23 + $0x128] sm:$0xff] }
 0x358   : > { %3293 = vmatpush1.msra.mxu1 %v1261_v29  ;;  %3360 = vmatpush1.msra.mxu0 %v1401_v30  ;;  %v1611_v29 = vld [vmem:[%s5569_s23 + $0x1f68] sm:$0xff]  ;;  %v642_v30 = vld [vmem:[%s5569_s23 + $0x120] sm:$0xff] }
 0x359   : > { %3294 = vmatprep.subr.mxu1 %v1193_v31  ;;  %3361 = vmatprep.subr.mxu0 %v1333_v33  ;;  %v2494_v49 = vpop.f32.mrf.mxu1  ;;  %v6307_v33 = vld [vmem:[#allocation2] sm:$0xff] }
 0x35a   : > { %3295 = vmatpush1.msra.mxu1 %v1192_v34  ;;  %3362 = vmatpush1.msra.mxu0 %v1332_v35  ;;  %v2495_v52 = vadd.f32 %v2494_v49, %v1771_v40  ;;  %v1610_v34 = vld [vmem:[%s5569_s23 + $0x1f60] sm:$0xff]  ;;  %v1473_v40 = vld [vmem:[%s5569_s23 + $0x1b18] sm:$0xff]  ;;  %v1335_v49 = vld [vmem:[%s5569_s23 + $0x16c8] sm:$0xff] }
 0x35b   : > { %3296 = vmatprep.subr.mxu1 %v1124_v36  ;;  %3363 = vmatprep.subr.mxu0 %v1264_v38  ;;  %v2496_v55 = vpop.f32.mrf.mxu1  ;;  %v1542_v35 = vld [vmem:[%s5569_s23 + $0x1d40] sm:$0xff]  ;;  %v1541_v38 = vld [vmem:[%s5569_s23 + $0x1d38] sm:$0xff] }
 0x35c   : > { %3297 = vmatpush1.msra.mxu1 %v1123_v39  ;;  %3364 = vmatpush1.msra.mxu0 %v1263_v41  ;;  %4567 = vst [vmem:[%s5579_s12 + $0x50] sm:$0xff] %v2495_v52  ;;  %v2497_v59 = vadd.f32 %v2496_v55, %v1775_v45  ;;  %v1682_v36 = vld [vmem:[%s5569_s23 + $0x21a0] sm:$0xff]  ;;  %v1681_v39 = vld [vmem:[%s5569_s23 + $0x2198] sm:$0xff]  ;;  %v1544_v45 = vld [vmem:[%s5569_s23 + $0x1d50] sm:$0xff] }
 0x35d   : > { %3298 = vmatprep.subr.mxu1 %v1055_v42  ;;  %3365 = vmatprep.subr.mxu0 %v1195_v43  ;;  %v1613_v41 = vld [vmem:[%s5569_s23 + $0x1f78] sm:$0xff]  ;;  %v1472_v42 = vld [vmem:[%s5569_s23 + $0x1b10] sm:$0xff]  ;;  %v1474_v52 = vld [vmem:[%s5569_s23 + $0x1b20] sm:$0xff] }
 0x35e   : > { %3299 = vmatpush1.msra.mxu1 %v1054_v44  ;;  %3366 = vmatpush1.msra.mxu0 %v1194_v46  ;;  %4568 = vst [vmem:[%s5579_s12 + $0x58] sm:$0xff] %v2497_v59  ;;  %v1612_v43 = vld [vmem:[%s5569_s23 + $0x1f70] sm:$0xff]  ;;  %v1403_v46 = vld [vmem:[%s5569_s23 + $0x18e8] sm:$0xff]  ;;  %v1265_v55 = vld [vmem:[%s5569_s23 + $0x1498] sm:$0xff] }
 0x35f   : > { %3300 = vmatprep.subr.mxu1 %v986_v47  ;;  %3367 = vmatprep.subr.mxu0 %v1126_v50  ;;  %v1404_v44 = vld [vmem:[%s5569_s23 + $0x18f0] sm:$0xff]  ;;  %v1543_v47 = vld [vmem:[%s5569_s23 + $0x1d48] sm:$0xff]  ;;  %v1337_v59 = vld [vmem:[%s5569_s23 + $0x16d8] sm:$0xff] }
 0x360   : > { %3301 = vmatpush1.msra.mxu1 %v985_v51  ;;  %3368 = vmatpush1.msra.mxu0 %v1125_v53  ;;  %v1475_v50 = vld [vmem:[%s5569_s23 + $0x1b28] sm:$0xff]  ;;  %v1334_v51 = vld [vmem:[%s5569_s23 + $0x16c0] sm:$0xff] }
 0x361   : > { %3302 = vmatprep.subr.mxu1 %v917_v54  ;;  %3369 = vmatprep.subr.mxu0 %v1057_v56  ;;  %v1266_v53 = vld [vmem:[%s5569_s23 + $0x14a0] sm:$0xff]  ;;  %v1405_v56 = vld [vmem:[%s5569_s23 + $0x18f8] sm:$0xff] }
 0x362   : > { %3303 = vmatpush1.msra.mxu1 %v916_v57  ;;  %3370 = vmatpush1.msra.mxu0 %v1056_v60  ;;  %v1406_v54 = vld [vmem:[%s5569_s23 + $0x1900] sm:$0xff]  ;;  %v1197_v57 = vld [vmem:[%s5569_s23 + $0x1278] sm:$0xff]  ;;  %v1196_v60 = vld [vmem:[%s5569_s23 + $0x1270] sm:$0xff] }
 0x363   : > { %3304 = vmatprep.subr.mxu1 %v848_v62  ;;  %3371 = vmatprep.subr.mxu0 %v988_v63  ;;  %v1336_v62 = vld [vmem:[%s5569_s23 + $0x16d0] sm:$0xff] }
 0x364   : > { %3305 = vmatpush1.msra.mxu1 %v847_v0  ;;  %3372 = vmatpush1.msra.mxu0 %v987_v1  ;;  %v1128_v63 = vld [vmem:[%s5569_s23 + $0x1050] sm:$0xff]  ;;  %v1127_v1 = vld [vmem:[%s5569_s23 + $0x1048] sm:$0xff] }
 0x365   : > { %3306 = vmatprep.subr.mxu1 %v779_v5  ;;  %3373 = vmatprep.subr.mxu0 %v919_v7  ;;  %v1268_v0 = vld [vmem:[%s5569_s23 + $0x14b0] sm:$0xff]  ;;  %v1267_v5 = vld [vmem:[%s5569_s23 + $0x14a8] sm:$0xff] }
 0x366   : > { %3307 = vmatpush1.msra.mxu1 %v778_v9  ;;  %3374 = vmatpush1.msra.mxu0 %v918_v10  ;;  %v1059_v7 = vld [vmem:[%s5569_s23 + $0xe28] sm:$0xff]  ;;  %v1058_v10 = vld [vmem:[%s5569_s23 + $0xe20] sm:$0xff] }
 0x367   : > { %3308 = vmatprep.subr.mxu1 %v710_v11  ;;  %3375 = vmatprep.subr.mxu0 %v850_v58  ;;  %v1199_v9 = vld [vmem:[%s5569_s23 + $0x1288] sm:$0xff]  ;;  %v1787_v11 = vrot.slane %v6207_v48, %v6159_v61  ;;  %v1198_v58 = vld [vmem:[%s5569_s23 + $0x1280] sm:$0xff] }
 0x368   : > { %3309 = vmatpush1.msra.mxu1 %v709_v12  ;;  %3376 = vmatpush1.msra.mxu0 %v849_v13  ;;  %v990_v12 = vld [vmem:[%s5569_s23 + $0xc00] sm:$0xff] }
 0x369   : > { %3310 = vmatprep.subr.mxu1 %v641_v14  ;;  %3377 = vmatprep.subr.mxu0 %v781_v17  ;;  %v1130_v13 = vld [vmem:[%s5569_s23 + $0x1060] sm:$0xff]  ;;  %v989_v14 = vld [vmem:[%s5569_s23 + $0xbf8] sm:$0xff] }
 0x36a   : > { %3311 = vmatpush1.msra.mxu1 %v640_v18  ;;  %3378 = vmatpush1.msra.mxu0 %v780_v19  ;;  %v1129_v17 = vld [vmem:[%s5569_s23 + $0x1058] sm:$0xff] }
 0x36b   : > { %v2565_v21 = vpop.f32.mrf.mxu0  ;;  %3344 = vmatprep.mubr.f32.mxu1 %v5350_v28  ;;  %3379 = vmatprep.subr.mxu0 %v712_v16  ;;  %v921_v18 = vld [vmem:[%s5569_s23 + $0x9d8] sm:$0xff]  ;;  %v920_v16 = vld [vmem:[%s5569_s23 + $0x9d0] sm:$0xff] }
 0x36c   : > { %v2566_v6 = vadd.f32 %v2565_v21, %v1779_v15  ;;  %3422 = vmatprep.subr.mxu1 %v1680_v3  ;;  %3345 = vmatmul.mubr.f32.vlgmr.msra.gmra.mxu1 %v6307_v33  ;;  %v1791_v15 = vrot.slane %v6207_v48, %v6166_v4  ;;  %v1060_v21 = vld [vmem:[%s5569_s23 + $0xe30] sm:$0xff] }
 0x36d   : > { %v2567_v26 = vpop.f32.mrf.mxu0  ;;  %3380 = vmatpush1.msra.mxu0 %v711_v22  ;;  %3423 = vmatpush1.msra.mxu1 %v1679_v24  ;;  %v852_v48 = vld [vmem:[%s5569_s23 + $0x7b0] sm:$0xff]  ;;  %v851_v24 = vld [vmem:[%s5569_s23 + $0x7a8] sm:$0xff] }
 0x36e   : > { %4569 = vst [vmem:[%s5579_s12 + $0x60] sm:$0xff] %v2566_v6  ;;  %v2568_v31 = vadd.f32 %v2567_v26, %v1783_v20  ;;  %3381 = vmatprep.subr.mxu0 %v643_v25  ;;  %3424 = vmatprep.subr.mxu1 %v1611_v29  ;;  %v1061_v20 = vld [vmem:[%s5569_s23 + $0xe38] sm:$0xff]  ;;  %v992_v6 = vld [vmem:[%s5569_s23 + $0xc10] sm:$0xff]  ;;  %v991_v29 = vld [vmem:[%s5569_s23 + $0xc08] sm:$0xff] }
 0x36f   : > { %3382 = vmatpush1.msra.mxu0 %v642_v30  ;;  %3415 = vmatprep.mubr.f32.mxu0 %v5350_v28  ;;  %v6363_v26 = vld [vmem:[%s5577_s13 + $0x10] sm:$0xff]  ;;  %v783_v30 = vld [vmem:[%s5569_s23 + $0x588] sm:$0xff] }
 0x370   : > { %4570 = vst [vmem:[%s5579_s12 + $0x68] sm:$0xff] %v2568_v31  ;;  %3425 = vmatpush1.msra.mxu1 %v1610_v34  ;;  %3416 = vmatmul.mubr.f32.vlgmr.msra.gmra.mxu0 %v6307_v33  ;;  %v923_v31 = vld [vmem:[%s5569_s23 + $0x9e8] sm:$0xff]  ;;  %v782_v34 = vld [vmem:[%s5569_s23 + $0x580] sm:$0xff] }
 0x371   : > { %3426 = vmatprep.subr.mxu1 %v1542_v35  ;;  %3493 = vmatprep.subr.mxu0 %v1682_v36  ;;  %v922_v35 = vld [vmem:[%s5569_s23 + $0x9e0] sm:$0xff] }
 0x372   : > { %3427 = vmatpush1.msra.mxu1 %v1541_v38  ;;  %3494 = vmatpush1.msra.mxu0 %v1681_v39  ;;  %v714_v36 = vld [vmem:[%s5569_s23 + $0x360] sm:$0xff]  ;;  %v1795_v38 = vrot.slane %v6363_v26, %v6025_v2 }
 0x373   : > { %3428 = vmatprep.subr.mxu1 %v1473_v40  ;;  %3495 = vmatprep.subr.mxu0 %v1613_v41  ;;  %v854_v39 = vld [vmem:[%s5569_s23 + $0x7c0] sm:$0xff]  ;;  %v713_v40 = vld [vmem:[%s5569_s23 + $0x358] sm:$0xff] }
 0x374   : > { %3429 = vmatpush1.msra.mxu1 %v1472_v42  ;;  %3496 = vmatpush1.msra.mxu0 %v1612_v43  ;;  %v853_v41 = vld [vmem:[%s5569_s23 + $0x7b8] sm:$0xff]  ;;  %v1799_v43 = vrot.slane %v6363_v26, %v6034_v8 }
 0x375   : > { %3430 = vmatprep.subr.mxu1 %v1404_v44  ;;  %3497 = vmatprep.subr.mxu0 %v1544_v45  ;;  %v645_v42 = vld [vmem:[%s5569_s23 + $0x138] sm:$0xff]  ;;  %v644_v45 = vld [vmem:[%s5569_s23 + $0x130] sm:$0xff] }
 0x376   : > { %3431 = vmatpush1.msra.mxu1 %v1403_v46  ;;  %3498 = vmatpush1.msra.mxu0 %v1543_v47  ;;  %v785_v44 = vld [vmem:[%s5569_s23 + $0x598] sm:$0xff]  ;;  %v784_v47 = vld [vmem:[%s5569_s23 + $0x590] sm:$0xff] }
 0x377   : > { %3432 = vmatprep.subr.mxu1 %v1335_v49  ;;  %3499 = vmatprep.subr.mxu0 %v1475_v50  ;;  %v716_v50 = vld [vmem:[%s5569_s23 + $0x370] sm:$0xff] }
 0x378   : > { %3433 = vmatpush1.msra.mxu1 %v1334_v51  ;;  %3500 = vmatpush1.msra.mxu0 %v1474_v52  ;;  %v1684_v51 = vld [vmem:[%s5569_s23 + $0x21b0] sm:$0xff] }
 0x379   : > { %3434 = vmatprep.subr.mxu1 %v1266_v53  ;;  %3501 = vmatprep.subr.mxu0 %v1406_v54  ;;  %v715_v53 = vld [vmem:[%s5569_s23 + $0x368] sm:$0xff] }
 0x37a   : > { %3435 = vmatpush1.msra.mxu1 %v1265_v55  ;;  %3502 = vmatpush1.msra.mxu0 %v1405_v56  ;;  %v1683_v55 = vld [vmem:[%s5569_s23 + $0x21a8] sm:$0xff] }
 0x37b   : > { %3436 = vmatprep.subr.mxu1 %v1197_v57  ;;  %3503 = vmatprep.subr.mxu0 %v1337_v59  ;;  %v647_v56 = vld [vmem:[%s5569_s23 + $0x148] sm:$0xff]  ;;  %v646_v59 = vld [vmem:[%s5569_s23 + $0x140] sm:$0xff] }
 0x37c   : > { %3437 = vmatpush1.msra.mxu1 %v1196_v60  ;;  %3504 = vmatpush1.msra.mxu0 %v1336_v62  ;;  %v1615_v57 = vld [vmem:[%s5569_s23 + $0x1f88] sm:$0xff]  ;;  %v1614_v60 = vld [vmem:[%s5569_s23 + $0x1f80] sm:$0xff] }
 0x37d   : > { %3438 = vmatprep.subr.mxu1 %v1128_v63  ;;  %3505 = vmatprep.subr.mxu0 %v1268_v0  ;;  %v2636_v19 = vpop.f32.mrf.mxu1  ;;  %v1546_v62 = vld [vmem:[%s5569_s23 + $0x1d60] sm:$0xff]  ;;  %v1545_v0 = vld [vmem:[%s5569_s23 + $0x1d58] sm:$0xff] }
 0x37e   : > { %3439 = vmatpush1.msra.mxu1 %v1127_v1  ;;  %3506 = vmatpush1.msra.mxu0 %v1267_v5  ;;  %v2637_v3 = vadd.f32 %v2636_v19, %v1787_v11  ;;  %v1686_v63 = vld [vmem:[%s5569_s23 + $0x21c0] sm:$0xff]  ;;  %v1685_v1 = vld [vmem:[%s5569_s23 + $0x21b8] sm:$0xff]  ;;  %v1408_v11 = vld [vmem:[%s5569_s23 + $0x1910] sm:$0xff] }
 0x37f   : > { %3440 = vmatprep.subr.mxu1 %v1059_v7  ;;  %3507 = vmatprep.subr.mxu0 %v1199_v9  ;;  %v2638_v22 = vpop.f32.mrf.mxu1  ;;  %v1477_v5 = vld [vmem:[%s5569_s23 + $0x1b38] sm:$0xff]  ;;  %v1476_v9 = vld [vmem:[%s5569_s23 + $0x1b30] sm:$0xff]  ;;  %v1270_v19 = vld [vmem:[%s5569_s23 + $0x14c0] sm:$0xff] }
 0x380   : > { %3441 = vmatpush1.msra.mxu1 %v1058_v10  ;;  %3508 = vmatpush1.msra.mxu0 %v1198_v58  ;;  %4571 = vst [vmem:[%s5579_s12 + $0x70] sm:$0xff] %v2637_v3  ;;  %v2639_v25 = vadd.f32 %v2638_v22, %v1791_v15  ;;  %v1617_v7 = vld [vmem:[%s5569_s23 + $0x1f98] sm:$0xff]  ;;  %v1616_v10 = vld [vmem:[%s5569_s23 + $0x1f90] sm:$0xff]  ;;  %v1479_v15 = vld [vmem:[%s5569_s23 + $0x1b48] sm:$0xff] }
 0x381   : > { %3442 = vmatprep.subr.mxu1 %v990_v12  ;;  %3509 = vmatprep.subr.mxu0 %v1130_v13  ;;  %v1548_v58 = vld [vmem:[%s5569_s23 + $0x1d70] sm:$0xff]  ;;  %v1407_v12 = vld [vmem:[%s5569_s23 + $0x1908] sm:$0xff]  ;;  %v1409_v3 = vld [vmem:[%s5569_s23 + $0x1918] sm:$0xff] }
 0x382   : > { %3443 = vmatpush1.msra.mxu1 %v989_v14  ;;  %3510 = vmatpush1.msra.mxu0 %v1129_v17  ;;  %4572 = vst [vmem:[%s5579_s12 + $0x78] sm:$0xff] %v2639_v25  ;;  %v1547_v13 = vld [vmem:[%s5569_s23 + $0x1d68] sm:$0xff]  ;;  %v1338_v17 = vld [vmem:[%s5569_s23 + $0x16e0] sm:$0xff]  ;;  %v1200_v22 = vld [vmem:[%s5569_s23 + $0x1290] sm:$0xff] }
 0x383   : > { %3444 = vmatprep.subr.mxu1 %v921_v18  ;;  %3511 = vmatprep.subr.mxu0 %v1061_v20  ;;  %v1339_v14 = vld [vmem:[%s5569_s23 + $0x16e8] sm:$0xff]  ;;  %v1478_v18 = vld [vmem:[%s5569_s23 + $0x1b40] sm:$0xff]  ;;  %v1272_v25 = vld [vmem:[%s5569_s23 + $0x14d0] sm:$0xff] }
 0x384   : > { %3445 = vmatpush1.msra.mxu1 %v920_v16  ;;  %3512 = vmatpush1.msra.mxu0 %v1060_v21  ;;  %v1410_v20 = vld [vmem:[%s5569_s23 + $0x1920] sm:$0xff]  ;;  %v1269_v16 = vld [vmem:[%s5569_s23 + $0x14b8] sm:$0xff] }
 0x385   : > { %3446 = vmatprep.subr.mxu1 %v852_v48  ;;  %3513 = vmatprep.subr.mxu0 %v992_v6  ;;  %v1201_v21 = vld [vmem:[%s5569_s23 + $0x1298] sm:$0xff]  ;;  %v1340_v6 = vld [vmem:[%s5569_s23 + $0x16f0] sm:$0xff] }
 0x386   : > { %3447 = vmatpush1.msra.mxu1 %v851_v24  ;;  %3514 = vmatpush1.msra.mxu0 %v991_v29  ;;  %v1341_v48 = vld [vmem:[%s5569_s23 + $0x16f8] sm:$0xff]  ;;  %v1132_v24 = vld [vmem:[%s5569_s23 + $0x1070] sm:$0xff]  ;;  %v1131_v29 = vld [vmem:[%s5569_s23 + $0x1068] sm:$0xff] }
 0x387   : > { %3448 = vmatprep.subr.mxu1 %v783_v30  ;;  %3515 = vmatprep.subr.mxu0 %v923_v31  ;;  %v1271_v30 = vld [vmem:[%s5569_s23 + $0x14c8] sm:$0xff] }
 0x388   : > { %3449 = vmatpush1.msra.mxu1 %v782_v34  ;;  %3516 = vmatpush1.msra.mxu0 %v922_v35  ;;  %v1063_v31 = vld [vmem:[%s5569_s23 + $0xe48] sm:$0xff]  ;;  %v1062_v35 = vld [vmem:[%s5569_s23 + $0xe40] sm:$0xff] }
 0x389   : > { %3450 = vmatprep.subr.mxu1 %v714_v36  ;;  %3517 = vmatprep.subr.mxu0 %v854_v39  ;;  %v1203_v34 = vld [vmem:[%s5569_s23 + $0x12a8] sm:$0xff]  ;;  %v1202_v36 = vld [vmem:[%s5569_s23 + $0x12a0] sm:$0xff] }
 0x38a   : > { %3451 = vmatpush1.msra.mxu1 %v713_v40  ;;  %3518 = vmatpush1.msra.mxu0 %v853_v41  ;;  %v1134_v39 = vld [vmem:[%s5569_s23 + $0x1080] sm:$0xff]  ;;  %v993_v40 = vld [vmem:[%s5569_s23 + $0xc18] sm:$0xff]  ;;  %v1803_v41 = vrot.slane %v6363_v26, %v6062_v32 }
 0x38b   : > { %v2707_v46 = vpop.f32.mrf.mxu0  ;;  %3452 = vmatprep.subr.mxu1 %v645_v42  ;;  %3519 = vmatprep.subr.mxu0 %v785_v44  ;;  %v1133_v42 = vld [vmem:[%s5569_s23 + $0x1078] sm:$0xff] }
 0x38c   : > { %v2708_v49 = vadd.f32 %v2707_v46, %v1795_v38  ;;  %3453 = vmatpush1.msra.mxu1 %v644_v45  ;;  %3520 = vmatpush1.msra.mxu0 %v784_v47  ;;  %v994_v38 = vld [vmem:[%s5569_s23 + $0xc20] sm:$0xff]  ;;  %v1065_v44 = vld [vmem:[%s5569_s23 + $0xe58] sm:$0xff]  ;;  %v924_v45 = vld [vmem:[%s5569_s23 + $0x9f0] sm:$0xff]  ;;  %v1807_v46 = vrot.slane %v6363_v26, %v6070_v37 }
 0x38d   : > { %v2709_v52 = vpop.f32.mrf.mxu0  ;;  %3486 = vmatprep.mubr.f32.mxu1 %v5350_v28  ;;  %3521 = vmatprep.subr.mxu0 %v716_v50  ;;  %v1064_v47 = vld [vmem:[%s5569_s23 + $0xe50] sm:$0xff] }
 0x38e   : > { %4573 = vst [vmem:[%s5579_s12 + $0x80] sm:$0xff] %v2708_v49  ;;  %v2710_v54 = vadd.f32 %v2709_v52, %v1799_v43  ;;  %3564 = vmatprep.subr.mxu1 %v1684_v51  ;;  %3487 = vmatmul.mubr.f32.vlgmr.msra.gmra.mxu1 %v6307_v33  ;;  %v925_v43 = vld [vmem:[%s5569_s23 + $0x9f8] sm:$0xff]  ;;  %v856_v49 = vld [vmem:[%s5569_s23 + $0x7d0] sm:$0xff]  ;;  %v855_v52 = vld [vmem:[%s5569_s23 + $0x7c8] sm:$0xff] }
 0x38f   : > { %3522 = vmatpush1.msra.mxu0 %v715_v53  ;;  %3565 = vmatpush1.msra.mxu1 %v1683_v55  ;;  %v996_v51 = vld [vmem:[%s5569_s23 + $0xc30] sm:$0xff]  ;;  %v787_v55 = vld [vmem:[%s5569_s23 + $0x5a8] sm:$0xff] }
 0x390   : > { %4574 = vst [vmem:[%s5579_s12 + $0x88] sm:$0xff] %v2710_v54  ;;  %3523 = vmatprep.subr.mxu0 %v647_v56  ;;  %3566 = vmatprep.subr.mxu1 %v1615_v57  ;;  %v995_v54 = vld [vmem:[%s5569_s23 + $0xc28] sm:$0xff]  ;;  %v1811_v57 = vrot.slane %v6363_v26, %v6117_v23 }
 0x391   : > { %3524 = vmatpush1.msra.mxu0 %v646_v59  ;;  %3557 = vmatprep.mubr.f32.mxu0 %v5350_v28  ;;  %v927_v59 = vld [vmem:[%s5569_s23 + $0xa08] sm:$0xff] }
 0x392   : > { %3567 = vmatpush1.msra.mxu1 %v1614_v60  ;;  %3558 = vmatmul.mubr.f32.vlgmr.msra.gmra.mxu0 %v6307_v33  ;;  %v786_v60 = vld [vmem:[%s5569_s23 + $0x5a0] sm:$0xff] }
 0x393   : > { %3568 = vmatprep.subr.mxu1 %v1546_v62  ;;  %3635 = vmatprep.subr.mxu0 %v1686_v63  ;;  %v926_v63 = vld [vmem:[%s5569_s23 + $0xa00] sm:$0xff] }
 0x394   : > { %3569 = vmatpush1.msra.mxu1 %v1545_v0  ;;  %3636 = vmatpush1.msra.mxu0 %v1685_v1  ;;  %v718_v0 = vld [vmem:[%s5569_s23 + $0x380] sm:$0xff]  ;;  %v1815_v1 = vrot.slane %v6363_v26, %v6123_v27 }
 0x395   : > { %3570 = vmatprep.subr.mxu1 %v1477_v5  ;;  %3637 = vmatprep.subr.mxu0 %v1617_v7  ;;  %v858_v5 = vld [vmem:[%s5569_s23 + $0x7e0] sm:$0xff]  ;;  %v717_v7 = vld [vmem:[%s5569_s23 + $0x378] sm:$0xff] }
 0x396   : > { %3571 = vmatpush1.msra.mxu1 %v1476_v9  ;;  %3638 = vmatpush1.msra.mxu0 %v1616_v10  ;;  %v857_v10 = vld [vmem:[%s5569_s23 + $0x7d8] sm:$0xff] }
 0x397   : > { %3572 = vmatprep.subr.mxu1 %v1408_v11  ;;  %3639 = vmatprep.subr.mxu0 %v1548_v58  ;;  %v649_v11 = vld [vmem:[%s5569_s23 + $0x158] sm:$0xff] }
 0x398   : > { %3573 = vmatpush1.msra.mxu1 %v1407_v12  ;;  %3640 = vmatpush1.msra.mxu0 %v1547_v13  ;;  %v789_v12 = vld [vmem:[%s5569_s23 + $0x5b8] sm:$0xff]  ;;  %v648_v13 = vld [vmem:[%s5569_s23 + $0x150] sm:$0xff] }
 0x399   : > { %3574 = vmatprep.subr.mxu1 %v1339_v14  ;;  %3641 = vmatprep.subr.mxu0 %v1479_v15  ;;  %v788_v15 = vld [vmem:[%s5569_s23 + $0x5b0] sm:$0xff] }
 0x39a   : > { %3575 = vmatpush1.msra.mxu1 %v1338_v17  ;;  %3642 = vmatpush1.msra.mxu0 %v1478_v18  ;;  %v720_v18 = vld [vmem:[%s5569_s23 + $0x390] sm:$0xff] }
 0x39b   : > { %3576 = vmatprep.subr.mxu1 %v1270_v19  ;;  %3643 = vmatprep.subr.mxu0 %v1410_v20  ;;  %v1688_v19 = vld [vmem:[%s5569_s23 + $0x21d0] sm:$0xff]  ;;  %v719_v20 = vld [vmem:[%s5569_s23 + $0x388] sm:$0xff] }
 0x39c   : > { %3577 = vmatpush1.msra.mxu1 %v1269_v16  ;;  %3644 = vmatpush1.msra.mxu0 %v1409_v3  ;;  %v1687_v16 = vld [vmem:[%s5569_s23 + $0x21c8] sm:$0xff] }
 0x39d   : > { %3578 = vmatprep.subr.mxu1 %v1201_v21  ;;  %3645 = vmatprep.subr.mxu0 %v1341_v48  ;;  %v651_v3 = vld [vmem:[%s5569_s23 + $0x168] sm:$0xff]  ;;  %v650_v48 = vld [vmem:[%s5569_s23 + $0x160] sm:$0xff] }
 0x39e   : > { %3579 = vmatpush1.msra.mxu1 %v1200_v22  ;;  %3646 = vmatpush1.msra.mxu0 %v1340_v6  ;;  %v1619_v21 = vld [vmem:[%s5569_s23 + $0x1fa8] sm:$0xff]  ;;  %v1618_v22 = vld [vmem:[%s5569_s23 + $0x1fa0] sm:$0xff] }
 0x39f   : > { %3580 = vmatprep.subr.mxu1 %v1132_v24  ;;  %3647 = vmatprep.subr.mxu0 %v1272_v25  ;;  %v1550_v6 = vld [vmem:[%s5569_s23 + $0x1d80] sm:$0xff]  ;;  %v1549_v25 = vld [vmem:[%s5569_s23 + $0x1d78] sm:$0xff] }
 0x3a0   : > { %3581 = vmatpush1.msra.mxu1 %v1131_v29  ;;  %3648 = vmatpush1.msra.mxu0 %v1271_v30  ;;  %v1690_v24 = vld [vmem:[%s5569_s23 + $0x21e0] sm:$0xff]  ;;  %v1689_v29 = vld [vmem:[%s5569_s23 + $0x21d8] sm:$0xff] }
 0x3a1   : > { %3582 = vmatprep.subr.mxu1 %v1063_v31  ;;  %3649 = vmatprep.subr.mxu0 %v1203_v34  ;;  %v2778_v50 = vpop.f32.mrf.mxu1  ;;  %v1481_v30 = vld [vmem:[%s5569_s23 + $0x1b58] sm:$0xff]  ;;  %v1480_v34 = vld [vmem:[%s5569_s23 + $0x1b50] sm:$0xff] }
 0x3a2   : > { %3583 = vmatpush1.msra.mxu1 %v1062_v35  ;;  %3650 = vmatpush1.msra.mxu0 %v1202_v36  ;;  %v2779_v53 = vadd.f32 %v2778_v50, %v1803_v41  ;;  %v1621_v31 = vld [vmem:[%s5569_s23 + $0x1fb8] sm:$0xff]  ;;  %v1620_v35 = vld [vmem:[%s5569_s23 + $0x1fb0] sm:$0xff]  ;;  %v1343_v41 = vld [vmem:[%s5569_s23 + $0x1708] sm:$0xff] }
 0x3a3   : > { %3584 = vmatprep.subr.mxu1 %v994_v38  ;;  %3651 = vmatprep.subr.mxu0 %v1134_v39  ;;  %v2780_v56 = vpop.f32.mrf.mxu1  ;;  %v1412_v36 = vld [vmem:[%s5569_s23 + $0x1930] sm:$0xff]  ;;  %v1411_v39 = vld [vmem:[%s5569_s23 + $0x1928] sm:$0xff]  ;;  %v1205_v50 = vld [vmem:[%s5569_s23 + $0x12b8] sm:$0xff] }
 0x3a4   : > { %3585 = vmatpush1.msra.mxu1 %v993_v40  ;;  %3652 = vmatpush1.msra.mxu0 %v1133_v42  ;;  %4575 = vst [vmem:[%s5579_s12 + $0x90] sm:$0xff] %v2779_v53  ;;  %v2781_v62 = vadd.f32 %v2780_v56, %v1807_v46  ;;  %v1552_v38 = vld [vmem:[%s5569_s23 + $0x1d90] sm:$0xff]  ;;  %v1551_v40 = vld [vmem:[%s5569_s23 + $0x1d88] sm:$0xff]  ;;  %v1414_v46 = vld [vmem:[%s5569_s23 + $0x1940] sm:$0xff] }
 0x3a5   : > { %3586 = vmatprep.subr.mxu1 %v925_v43  ;;  %3653 = vmatprep.subr.mxu0 %v1065_v44  ;;  %v1483_v42 = vld [vmem:[%s5569_s23 + $0x1b68] sm:$0xff]  ;;  %v1342_v43 = vld [vmem:[%s5569_s23 + $0x1700] sm:$0xff]  ;;  %v1344_v53 = vld [vmem:[%s5569_s23 + $0x1710] sm:$0xff] }
 0x3a6   : > { %3587 = vmatpush1.msra.mxu1 %v924_v45  ;;  %3654 = vmatpush1.msra.mxu0 %v1064_v47  ;;  %4576 = vst [vmem:[%s5579_s12 + $0x98] sm:$0xff] %v2781_v62  ;;  %v1482_v44 = vld [vmem:[%s5569_s23 + $0x1b60] sm:$0xff]  ;;  %v1273_v47 = vld [vmem:[%s5569_s23 + $0x14d8] sm:$0xff]  ;;  %v1135_v56 = vld [vmem:[%s5569_s23 + $0x1088] sm:$0xff] }
 0x3a7   : > { %3588 = vmatprep.subr.mxu1 %v856_v49  ;;  %3655 = vmatprep.subr.mxu0 %v996_v51  ;;  %v1274_v45 = vld [vmem:[%s5569_s23 + $0x14e0] sm:$0xff]  ;;  %v1413_v49 = vld [vmem:[%s5569_s23 + $0x1938] sm:$0xff] }
 0x3a8   : > { %3589 = vmatpush1.msra.mxu1 %v855_v52  ;;  %3656 = vmatpush1.msra.mxu0 %v995_v54  ;;  %v1345_v51 = vld [vmem:[%s5569_s23 + $0x1718] sm:$0xff]  ;;  %v1204_v52 = vld [vmem:[%s5569_s23 + $0x12b0] sm:$0xff]  ;;  %v1066_v62 = vld [vmem:[%s5569_s23 + $0xe60] sm:$0xff] }
 0x3a9   : > { %3590 = vmatprep.subr.mxu1 %v787_v55  ;;  %3657 = vmatprep.subr.mxu0 %v927_v59  ;;  %v1136_v54 = vld [vmem:[%s5569_s23 + $0x1090] sm:$0xff]  ;;  %v1067_v59 = vld [vmem:[%s5569_s23 + $0xe68] sm:$0xff] }
 0x3aa   : > { %3591 = vmatpush1.msra.mxu1 %v786_v60  ;;  %3658 = vmatpush1.msra.mxu0 %v926_v63  ;;  %v1276_v55 = vld [vmem:[%s5569_s23 + $0x14f0] sm:$0xff]  ;;  %v1207_v60 = vld [vmem:[%s5569_s23 + $0x12c8] sm:$0xff]  ;;  %v1206_v63 = vld [vmem:[%s5569_s23 + $0x12c0] sm:$0xff] }
 0x3ab   : > { %v2849_v9 = vpop.f32.mrf.mxu0  ;;  %3592 = vmatprep.subr.mxu1 %v718_v0  ;;  %3659 = vmatprep.subr.mxu0 %v858_v5  ;;  %v998_v0 = vld [vmem:[%s5569_s23 + $0xc40] sm:$0xff]  ;;  %v997_v5 = vld [vmem:[%s5569_s23 + $0xc38] sm:$0xff] }
 0x3ac   : > { %v2850_v58 = vadd.f32 %v2849_v9, %v1811_v57  ;;  %3593 = vmatpush1.msra.mxu1 %v717_v7  ;;  %3660 = vmatpush1.msra.mxu0 %v857_v10  ;;  %v1275_v57 = vld [vmem:[%s5569_s23 + $0x14e8] sm:$0xff]  ;;  %v1137_v7 = vld [vmem:[%s5569_s23 + $0x1098] sm:$0xff]  ;;  %v1819_v10 = vrot.slane %v6363_v26, %v6159_v61 }
 0x3ad   : > { %v2851_v14 = vpop.f32.mrf.mxu0  ;;  %3594 = vmatprep.subr.mxu1 %v649_v11  ;;  %3661 = vmatprep.subr.mxu0 %v789_v12  ;;  %v929_v9 = vld [vmem:[%s5569_s23 + $0xa18] sm:$0xff] }
 0x3ae   : > { %4577 = vst [vmem:[%s5579_s12 + $0xa0] sm:$0xff] %v2850_v58  ;;  %v2852_v17 = vadd.f32 %v2851_v14, %v1815_v1  ;;  %3595 = vmatpush1.msra.mxu1 %v648_v13  ;;  %3662 = vmatpush1.msra.mxu0 %v788_v15  ;;  %v1138_v1 = vld [vmem:[%s5569_s23 + $0x10a0] sm:$0xff]  ;;  %v1069_v11 = vld [vmem:[%s5569_s23 + $0xe78] sm:$0xff]  ;;  %v928_v58 = vld [vmem:[%s5569_s23 + $0xa10] sm:$0xff]  ;;  %v1823_v15 = vrot.slane %v6363_v26, %v6166_v4 }
 0x3af   : > { %3628 = vmatprep.mubr.f32.mxu1 %v5350_v28  ;;  %3663 = vmatprep.subr.mxu0 %v720_v18  ;;  %v6519_v12 = vld [vmem:[%s5577_s13 + $0x18] sm:$0xff]  ;;  %v1068_v13 = vld [vmem:[%s5569_s23 + $0xe70] sm:$0xff]  ;;  %v859_v18 = vld [vmem:[%s5569_s23 + $0x7e8] sm:$0xff] }
 0x3b0   : > { %4578 = vst [vmem:[%s5579_s12 + $0xa8] sm:$0xff] %v2852_v17  ;;  %3706 = vmatprep.subr.mxu1 %v1688_v19  ;;  %3629 = vmatmul.mubr.f32.vlgmr.msra.gmra.mxu1 %v6307_v33  ;;  %v860_v14 = vld [vmem:[%s5569_s23 + $0x7f0] sm:$0xff]  ;;  %v931_v26 = vld [vmem:[%s5569_s23 + $0xa28] sm:$0xff] }
 0x3b1   : > { %3664 = vmatpush1.msra.mxu0 %v719_v20  ;;  %3707 = vmatpush1.msra.mxu1 %v1687_v16  ;;  %v1000_v17 = vld [vmem:[%s5569_s23 + $0xc50] sm:$0xff]  ;;  %v999_v20 = vld [vmem:[%s5569_s23 + $0xc48] sm:$0xff] }
 0x3b2   : > { %3665 = vmatprep.subr.mxu0 %v651_v3  ;;  %3708 = vmatprep.subr.mxu1 %v1619_v21  ;;  %v791_v16 = vld [vmem:[%s5569_s23 + $0x5c8] sm:$0xff]  ;;  %v1827_v21 = vrot.slane %v6519_v12, %v6025_v2 }
 0x3b3   : > { %3666 = vmatpush1.msra.mxu0 %v650_v48  ;;  %3699 = vmatprep.mubr.f32.mxu0 %v5350_v28  ;;  %v790_v48 = vld [vmem:[%s5569_s23 + $0x5c0] sm:$0xff] }
 0x3b4   : > { %3709 = vmatpush1.msra.mxu1 %v1618_v22  ;;  %3700 = vmatmul.mubr.f32.vlgmr.msra.gmra.mxu0 %v6307_v33 }
 0x3b5   : > { %3710 = vmatprep.subr.mxu1 %v1550_v6  ;;  %3777 = vmatprep.subr.mxu0 %v1690_v24  ;;  %v930_v6 = vld [vmem:[%s5569_s23 + $0xa20] sm:$0xff] }
 0x3b6   : > { %3711 = vmatpush1.msra.mxu1 %v1549_v25  ;;  %3778 = vmatpush1.msra.mxu0 %v1689_v29  ;;  %v722_v24 = vld [vmem:[%s5569_s23 + $0x3a0] sm:$0xff]  ;;  %v1831_v29 = vrot.slane %v6519_v12, %v6034_v8 }
 0x3b7   : > { %3712 = vmatprep.subr.mxu1 %v1481_v30  ;;  %3779 = vmatprep.subr.mxu0 %v1621_v31  ;;  %v862_v30 = vld [vmem:[%s5569_s23 + $0x800] sm:$0xff]  ;;  %v721_v31 = vld [vmem:[%s5569_s23 + $0x398] sm:$0xff] }
 0x3b8   : > { %3713 = vmatpush1.msra.mxu1 %v1480_v34  ;;  %3780 = vmatpush1.msra.mxu0 %v1620_v35  ;;  %v861_v35 = vld [vmem:[%s5569_s23 + $0x7f8] sm:$0xff] }
 0x3b9   : > { %3714 = vmatprep.subr.mxu1 %v1412_v36  ;;  %3781 = vmatprep.subr.mxu0 %v1552_v38  ;;  %v653_v36 = vld [vmem:[%s5569_s23 + $0x178] sm:$0xff] }
 0x3ba   : > { %3715 = vmatpush1.msra.mxu1 %v1411_v39  ;;  %3782 = vmatpush1.msra.mxu0 %v1551_v40  ;;  %v793_v39 = vld [vmem:[%s5569_s23 + $0x5d8] sm:$0xff]  ;;  %v652_v40 = vld [vmem:[%s5569_s23 + $0x170] sm:$0xff] }
 0x3bb   : > { %3716 = vmatprep.subr.mxu1 %v1343_v41  ;;  %3783 = vmatprep.subr.mxu0 %v1483_v42  ;;  %v792_v42 = vld [vmem:[%s5569_s23 + $0x5d0] sm:$0xff] }
 0x3bc   : > { %3717 = vmatpush1.msra.mxu1 %v1342_v43  ;;  %3784 = vmatpush1.msra.mxu0 %v1482_v44  ;;  %v724_v44 = vld [vmem:[%s5569_s23 + $0x3b0] sm:$0xff] }
 0x3bd   : > { %3718 = vmatprep.subr.mxu1 %v1274_v45  ;;  %3785 = vmatprep.subr.mxu0 %v1414_v46  ;;  %v1692_v45 = vld [vmem:[%s5569_s23 + $0x21f0] sm:$0xff]  ;;  %v723_v46 = vld [vmem:[%s5569_s23 + $0x3a8] sm:$0xff] }
 0x3be   : > { %3719 = vmatpush1.msra.mxu1 %v1273_v47  ;;  %3786 = vmatpush1.msra.mxu0 %v1413_v49  ;;  %v1691_v47 = vld [vmem:[%s5569_s23 + $0x21e8] sm:$0xff] }
 0x3bf   : > { %3720 = vmatprep.subr.mxu1 %v1205_v50  ;;  %3787 = vmatprep.subr.mxu0 %v1345_v51  ;;  %v655_v49 = vld [vmem:[%s5569_s23 + $0x188] sm:$0xff]  ;;  %v654_v51 = vld [vmem:[%s5569_s23 + $0x180] sm:$0xff] }
 0x3c0   : > { %3721 = vmatpush1.msra.mxu1 %v1204_v52  ;;  %3788 = vmatpush1.msra.mxu0 %v1344_v53  ;;  %v1623_v50 = vld [vmem:[%s5569_s23 + $0x1fc8] sm:$0xff]  ;;  %v1622_v52 = vld [vmem:[%s5569_s23 + $0x1fc0] sm:$0xff] }
 0x3c1   : > { %3722 = vmatprep.subr.mxu1 %v1136_v54  ;;  %3789 = vmatprep.subr.mxu0 %v1276_v55  ;;  %v1554_v53 = vld [vmem:[%s5569_s23 + $0x1da0] sm:$0xff]  ;;  %v1553_v55 = vld [vmem:[%s5569_s23 + $0x1d98] sm:$0xff] }
 0x3c2   : > { %3723 = vmatpush1.msra.mxu1 %v1135_v56  ;;  %3790 = vmatpush1.msra.mxu0 %v1275_v57  ;;  %v1694_v54 = vld [vmem:[%s5569_s23 + $0x2200] sm:$0xff]  ;;  %v1693_v56 = vld [vmem:[%s5569_s23 + $0x21f8] sm:$0xff] }
 0x3c3   : > { %3724 = vmatprep.subr.mxu1 %v1067_v59  ;;  %3791 = vmatprep.subr.mxu0 %v1207_v60  ;;  %v1485_v57 = vld [vmem:[%s5569_s23 + $0x1b78] sm:$0xff]  ;;  %v1484_v60 = vld [vmem:[%s5569_s23 + $0x1b70] sm:$0xff] }
 0x3c4   : > { %3725 = vmatpush1.msra.mxu1 %v1066_v62  ;;  %3792 = vmatpush1.msra.mxu0 %v1206_v63  ;;  %v1625_v59 = vld [vmem:[%s5569_s23 + $0x1fd8] sm:$0xff]  ;;  %v1624_v62 = vld [vmem:[%s5569_s23 + $0x1fd0] sm:$0xff] }
 0x3c5   : > { %3726 = vmatprep.subr.mxu1 %v998_v0  ;;  %3793 = vmatprep.subr.mxu0 %v1138_v1  ;;  %v2920_v19 = vpop.f32.mrf.mxu1  ;;  %v1416_v63 = vld [vmem:[%s5569_s23 + $0x1950] sm:$0xff]  ;;  %v1415_v1 = vld [vmem:[%s5569_s23 + $0x1948] sm:$0xff] }
 0x3c6   : > { %3727 = vmatpush1.msra.mxu1 %v997_v5  ;;  %3794 = vmatpush1.msra.mxu0 %v1137_v7  ;;  %v2921_v3 = vadd.f32 %v2920_v19, %v1819_v10  ;;  %v1556_v0 = vld [vmem:[%s5569_s23 + $0x1db0] sm:$0xff]  ;;  %v1347_v5 = vld [vmem:[%s5569_s23 + $0x1728] sm:$0xff]  ;;  %v1486_v10 = vld [vmem:[%s5569_s23 + $0x1b80] sm:$0xff] }
 0x3c7   : > { %3728 = vmatprep.subr.mxu1 %v929_v9  ;;  %3795 = vmatprep.subr.mxu0 %v1069_v11  ;;  %v2922_v22 = vpop.f32.mrf.mxu1  ;;  %v1487_v7 = vld [vmem:[%s5569_s23 + $0x1b88] sm:$0xff]  ;;  %v1346_v9 = vld [vmem:[%s5569_s23 + $0x1720] sm:$0xff]  ;;  %v1348_v19 = vld [vmem:[%s5569_s23 + $0x1730] sm:$0xff] }
 0x3c8   : > { %3729 = vmatpush1.msra.mxu1 %v928_v58  ;;  %3796 = vmatpush1.msra.mxu0 %v1068_v13  ;;  %4579 = vst [vmem:[%s5579_s12 + $0xb0] sm:$0xff] %v2921_v3  ;;  %v2923_v25 = vadd.f32 %v2922_v22, %v1823_v15  ;;  %v1278_v11 = vld [vmem:[%s5569_s23 + $0x1500] sm:$0xff]  ;;  %v1277_v13 = vld [vmem:[%s5569_s23 + $0x14f8] sm:$0xff]  ;;  %v1139_v3 = vld [vmem:[%s5569_s23 + $0x10a8] sm:$0xff] }
 0x3c9   : > { %3730 = vmatprep.subr.mxu1 %v860_v14  ;;  %3797 = vmatprep.subr.mxu0 %v1000_v17  ;;  %v1418_v58 = vld [vmem:[%s5569_s23 + $0x1960] sm:$0xff]  ;;  %v1417_v14 = vld [vmem:[%s5569_s23 + $0x1958] sm:$0xff] }
 0x3ca   : > { %3731 = vmatpush1.msra.mxu1 %v859_v18  ;;  %3798 = vmatpush1.msra.mxu0 %v999_v20  ;;  %4580 = vst [vmem:[%s5579_s12 + $0xb8] sm:$0xff] %v2923_v25  ;;  %v1209_v15 = vld [vmem:[%s5569_s23 + $0x12d8] sm:$0xff]  ;;  %v1208_v18 = vld [vmem:[%s5569_s23 + $0x12d0] sm:$0xff]  ;;  %v1070_v22 = vld [vmem:[%s5569_s23 + $0xe80] sm:$0xff] }
 0x3cb   : > { %3732 = vmatprep.subr.mxu1 %v791_v16  ;;  %v2991_v34 = vpop.f32.mrf.mxu0  ;;  %3799 = vmatprep.subr.mxu0 %v931_v26  ;;  %v1349_v17 = vld [vmem:[%s5569_s23 + $0x1738] sm:$0xff]  ;;  %v1140_v20 = vld [vmem:[%s5569_s23 + $0x10b0] sm:$0xff]  ;;  %v1071_v26 = vld [vmem:[%s5569_s23 + $0xe88] sm:$0xff] }
 0x3cc   : > { %3733 = vmatpush1.msra.mxu1 %v790_v48  ;;  %v2992_v38 = vadd.f32 %v2991_v34, %v1827_v21  ;;  %3800 = vmatpush1.msra.mxu0 %v930_v6  ;;  %v1280_v16 = vld [vmem:[%s5569_s23 + $0x1510] sm:$0xff]  ;;  %v1279_v21 = vld [vmem:[%s5569_s23 + $0x1508] sm:$0xff]  ;;  %v1210_v6 = vld [vmem:[%s5569_s23 + $0x12e0] sm:$0xff]  ;;  %v1835_v34 = vrot.slane %v6519_v12, %v6062_v32 }
 0x3cd   : > { %3734 = vmatprep.subr.mxu1 %v722_v24  ;;  %v2993_v41 = vpop.f32.mrf.mxu0  ;;  %3801 = vmatprep.subr.mxu0 %v862_v30  ;;  %v1211_v48 = vld [vmem:[%s5569_s23 + $0x12e8] sm:$0xff]  ;;  %v1002_v24 = vld [vmem:[%s5569_s23 + $0xc60] sm:$0xff]  ;;  %v1141_v30 = vld [vmem:[%s5569_s23 + $0x10b8] sm:$0xff] }
 0x3ce   : > { %3735 = vmatpush1.msra.mxu1 %v721_v31  ;;  %4581 = vst [vmem:[%s5579_s12 + $0xc0] sm:$0xff] %v2992_v38  ;;  %v2994_v43 = vadd.f32 %v2993_v41, %v1831_v29  ;;  %3802 = vmatpush1.msra.mxu0 %v861_v35  ;;  %v1142_v25 = vld [vmem:[%s5569_s23 + $0x10c0] sm:$0xff]  ;;  %v1001_v29 = vld [vmem:[%s5569_s23 + $0xc58] sm:$0xff]  ;;  %v1072_v38 = vld [vmem:[%s5569_s23 + $0xe90] sm:$0xff] }
 0x3cf   : > { %3736 = vmatprep.subr.mxu1 %v653_v36  ;;  %3803 = vmatprep.subr.mxu0 %v793_v39  ;;  %v933_v31 = vld [vmem:[%s5569_s23 + $0xa38] sm:$0xff]  ;;  %v932_v36 = vld [vmem:[%s5569_s23 + $0xa30] sm:$0xff] }
 0x3d0   : > { %3737 = vmatpush1.msra.mxu1 %v652_v40  ;;  %4582 = vst [vmem:[%s5579_s12 + $0xc8] sm:$0xff] %v2994_v43  ;;  %3804 = vmatpush1.msra.mxu0 %v792_v42  ;;  %v1073_v35 = vld [vmem:[%s5569_s23 + $0xe98] sm:$0xff]  ;;  %v864_v39 = vld [vmem:[%s5569_s23 + $0x810] sm:$0xff]  ;;  %v1839_v40 = vrot.slane %v6519_v12, %v6070_v37  ;;  %v863_v42 = vld [vmem:[%s5569_s23 + $0x808] sm:$0xff] }
 0x3d1   : > { %3770 = vmatprep.mubr.f32.mxu1 %v5350_v28  ;;  %3805 = vmatprep.subr.mxu0 %v724_v44  ;;  %v1004_v41 = vld [vmem:[%s5569_s23 + $0xc70] sm:$0xff]  ;;  %v1003_v44 = vld [vmem:[%s5569_s23 + $0xc68] sm:$0xff] }
 0x3d2   : > { %3848 = vmatprep.subr.mxu1 %v1692_v45  ;;  %3771 = vmatmul.mubr.f32.vlgmr.msra.gmra.mxu1 %v6307_v33  ;;  %v795_v45 = vld [vmem:[%s5569_s23 + $0x5e8] sm:$0xff] }
 0x3d3   : > { %3806 = vmatpush1.msra.mxu0 %v723_v46  ;;  %3849 = vmatpush1.msra.mxu1 %v1691_v47  ;;  %v1843_v47 = vrot.slane %v6519_v12, %v6117_v23 }
 0x3d4   : > { %3807 = vmatprep.subr.mxu0 %v655_v49  ;;  %3850 = vmatprep.subr.mxu1 %v1623_v50  ;;  %v935_v49 = vld [vmem:[%s5569_s23 + $0xa48] sm:$0xff]  ;;  %v794_v50 = vld [vmem:[%s5569_s23 + $0x5e0] sm:$0xff] }
 0x3d5   : > { %3808 = vmatpush1.msra.mxu0 %v654_v51  ;;  %3841 = vmatprep.mubr.f32.mxu0 %v5350_v28 }
 0x3d6   : > { %3851 = vmatpush1.msra.mxu1 %v1622_v52  ;;  %3842 = vmatmul.mubr.f32.vlgmr.msra.gmra.mxu0 %v6307_v33  ;;  %v1555_v33 = vld [vmem:[%s5569_s23 + $0x1da8] sm:$0xff]  ;;  %v934_v52 = vld [vmem:[%s5569_s23 + $0xa40] sm:$0xff] }
 0x3d7   : > { %3852 = vmatprep.subr.mxu1 %v1554_v53  ;;  %3919 = vmatprep.subr.mxu0 %v1694_v54  ;;  %v726_v53 = vld [vmem:[%s5569_s23 + $0x3c0] sm:$0xff] }
 0x3d8   : > { %3853 = vmatpush1.msra.mxu1 %v1553_v55  ;;  %3920 = vmatpush1.msra.mxu0 %v1693_v56  ;;  %v1847_v55 = vrot.slane %v6519_v12, %v6123_v27  ;;  %v866_v56 = vld [vmem:[%s5569_s23 + $0x820] sm:$0xff] }
 0x3d9   : > { %3854 = vmatprep.subr.mxu1 %v1485_v57  ;;  %3921 = vmatprep.subr.mxu0 %v1625_v59  ;;  %v725_v57 = vld [vmem:[%s5569_s23 + $0x3b8] sm:$0xff] }
 0x3da   : > { %3855 = vmatpush1.msra.mxu1 %v1484_v60  ;;  %3922 = vmatpush1.msra.mxu0 %v1624_v62  ;;  %v865_v60 = vld [vmem:[%s5569_s23 + $0x818] sm:$0xff] }
 0x3db   : > { %3856 = vmatprep.subr.mxu1 %v1416_v63  ;;  %3923 = vmatprep.subr.mxu0 %v1556_v0  ;;  %v657_v62 = vld [vmem:[%s5569_s23 + $0x198] sm:$0xff] }
 0x3dc   : > { %3857 = vmatpush1.msra.mxu1 %v1415_v1  ;;  %3924 = vmatpush1.msra.mxu0 %v1555_v33  ;;  %v797_v0 = vld [vmem:[%s5569_s23 + $0x5f8] sm:$0xff]  ;;  %v656_v1 = vld [vmem:[%s5569_s23 + $0x190] sm:$0xff] }
 0x3dd   : > { %3858 = vmatprep.subr.mxu1 %v1347_v5  ;;  %3925 = vmatprep.subr.mxu0 %v1487_v7  ;;  %v796_v5 = vld [vmem:[%s5569_s23 + $0x5f0] sm:$0xff] }
 0x3de   : > { %3859 = vmatpush1.msra.mxu1 %v1346_v9  ;;  %3926 = vmatpush1.msra.mxu0 %v1486_v10  ;;  %v728_v9 = vld [vmem:[%s5569_s23 + $0x3d0] sm:$0xff] }
 0x3df   : > { %3860 = vmatprep.subr.mxu1 %v1278_v11  ;;  %3927 = vmatprep.subr.mxu0 %v1418_v58  ;;  %v1696_v10 = vld [vmem:[%s5569_s23 + $0x2210] sm:$0xff]  ;;  %v727_v11 = vld [vmem:[%s5569_s23 + $0x3c8] sm:$0xff] }
 0x3e0   : > { %3861 = vmatpush1.msra.mxu1 %v1277_v13  ;;  %3928 = vmatpush1.msra.mxu0 %v1417_v14  ;;  %v1695_v58 = vld [vmem:[%s5569_s23 + $0x2208] sm:$0xff] }
 0x3e1   : > { %3862 = vmatprep.subr.mxu1 %v1209_v15  ;;  %3929 = vmatprep.subr.mxu0 %v1349_v17  ;;  %v659_v13 = vld [vmem:[%s5569_s23 + $0x1a8] sm:$0xff]  ;;  %v658_v15 = vld [vmem:[%s5569_s23 + $0x1a0] sm:$0xff] }
 0x3e2   : > { %3863 = vmatpush1.msra.mxu1 %v1208_v18  ;;  %3930 = vmatpush1.msra.mxu0 %v1348_v19  ;;  %v1627_v14 = vld [vmem:[%s5569_s23 + $0x1fe8] sm:$0xff]  ;;  %v1626_v18 = vld [vmem:[%s5569_s23 + $0x1fe0] sm:$0xff] }
 0x3e3   : > { %3864 = vmatprep.subr.mxu1 %v1140_v20  ;;  %3931 = vmatprep.subr.mxu0 %v1280_v16  ;;  %v6636_v17 = vld [vmem:[#allocation2] sm:$0xff]  ;;  %v1558_v19 = vld [vmem:[%s5569_s23 + $0x1dc0] sm:$0xff]  ;;  %v1557_v16 = vld [vmem:[%s5569_s23 + $0x1db8] sm:$0xff] }
 0x3e4   : > { %3865 = vmatpush1.msra.mxu1 %v1139_v3  ;;  %3932 = vmatpush1.msra.mxu0 %v1279_v21  ;;  %v1698_v20 = vld [vmem:[%s5569_s23 + $0x2220] sm:$0xff]  ;;  %v1697_v3 = vld [vmem:[%s5569_s23 + $0x2218] sm:$0xff] }
 0x3e5   : > { %3866 = vmatprep.subr.mxu1 %v1071_v26  ;;  %3933 = vmatprep.subr.mxu0 %v1211_v48  ;;  %v1489_v21 = vld [vmem:[%s5569_s23 + $0x1b98] sm:$0xff]  ;;  %v1488_v48 = vld [vmem:[%s5569_s23 + $0x1b90] sm:$0xff] }
 0x3e6   : > { %3867 = vmatpush1.msra.mxu1 %v1070_v22  ;;  %3934 = vmatpush1.msra.mxu0 %v1210_v6  ;;  %v1629_v26 = vld [vmem:[%s5569_s23 + $0x1ff8] sm:$0xff]  ;;  %v1628_v22 = vld [vmem:[%s5569_s23 + $0x1ff0] sm:$0xff] }
 0x3e7   : > { %3868 = vmatprep.subr.mxu1 %v1002_v24  ;;  %3935 = vmatprep.subr.mxu0 %v1142_v25  ;;  %v1420_v6 = vld [vmem:[%s5569_s23 + $0x1970] sm:$0xff]  ;;  %v1419_v25 = vld [vmem:[%s5569_s23 + $0x1968] sm:$0xff] }
 0x3e8   : > { %3869 = vmatpush1.msra.mxu1 %v1001_v29  ;;  %3936 = vmatpush1.msra.mxu0 %v1141_v30  ;;  %v3062_v43 = vpop.f32.mrf.mxu1  ;;  %v1560_v24 = vld [vmem:[%s5569_s23 + $0x1dd0] sm:$0xff]  ;;  %v1559_v29 = vld [vmem:[%s5569_s23 + $0x1dc8] sm:$0xff] }
 0x3e9   : > { %3870 = vmatprep.subr.mxu1 %v933_v31  ;;  %3937 = vmatprep.subr.mxu0 %v1073_v35  ;;  %v3063_v46 = vadd.f32 %v3062_v43, %v1835_v34  ;;  %v1351_v30 = vld [vmem:[%s5569_s23 + $0x1748] sm:$0xff]  ;;  %v1350_v34 = vld [vmem:[%s5569_s23 + $0x1740] sm:$0xff]  ;;  %v1212_v43 = vld [vmem:[%s5569_s23 + $0x12f0] sm:$0xff] }
 0x3ea   : > { %3871 = vmatpush1.msra.mxu1 %v932_v36  ;;  %3938 = vmatpush1.msra.mxu0 %v1072_v38  ;;  %v3064_v51 = vpop.f32.mrf.mxu1  ;;  %v1491_v31 = vld [vmem:[%s5569_s23 + $0x1ba8] sm:$0xff]  ;;  %v1490_v35 = vld [vmem:[%s5569_s23 + $0x1ba0] sm:$0xff] }
 0x3eb   : > { %3872 = vmatprep.subr.mxu1 %v864_v39  ;;  %3939 = vmatprep.subr.mxu0 %v1004_v41  ;;  %4583 = vst [vmem:[%s5579_s12 + $0xd0] sm:$0xff] %v3063_v46  ;;  %v3065_v54 = vadd.f32 %v3064_v51, %v1839_v40  ;;  %v1282_v36 = vld [vmem:[%s5569_s23 + $0x1520] sm:$0xff]  ;;  %v1281_v39 = vld [vmem:[%s5569_s23 + $0x1518] sm:$0xff]  ;;  %v1284_v46 = vld [vmem:[%s5569_s23 + $0x1530] sm:$0xff] }
 0x3ec   : > { %3873 = vmatpush1.msra.mxu1 %v863_v42  ;;  %3940 = vmatpush1.msra.mxu0 %v1003_v44  ;;  %v3133_v59 = vpop.f32.mrf.mxu0  ;;  %v1422_v38 = vld [vmem:[%s5569_s23 + $0x1980] sm:$0xff]  ;;  %v1421_v40 = vld [vmem:[%s5569_s23 + $0x1978] sm:$0xff]  ;;  %v1352_v44 = vld [vmem:[%s5569_s23 + $0x1750] sm:$0xff] }
 0x3ed   : > { %3874 = vmatprep.subr.mxu1 %v795_v45  ;;  %3941 = vmatprep.subr.mxu0 %v935_v49  ;;  %4584 = vst [vmem:[%s5579_s12 + $0xd8] sm:$0xff] %v3065_v54  ;;  %v3134_v63 = vadd.f32 %v3133_v59, %v1843_v47  ;;  %v1213_v41 = vld [vmem:[%s5569_s23 + $0x12f8] sm:$0xff]  ;;  %v1144_v45 = vld [vmem:[%s5569_s23 + $0x10d0] sm:$0xff]  ;;  %v1143_v47 = vld [vmem:[%s5569_s23 + $0x10c8] sm:$0xff] }
 0x3ee   : > { %3875 = vmatpush1.msra.mxu1 %v794_v50  ;;  %3942 = vmatpush1.msra.mxu0 %v934_v52  ;;  %v3135_v33 = vpop.f32.mrf.mxu0  ;;  %v1353_v42 = vld [vmem:[%s5569_s23 + $0x1758] sm:$0xff]  ;;  %v1283_v49 = vld [vmem:[%s5569_s23 + $0x1528] sm:$0xff]  ;;  %v1074_v52 = vld [vmem:[%s5569_s23 + $0xea0] sm:$0xff] }
 0x3ef   : > { %3876 = vmatprep.subr.mxu1 %v726_v53  ;;  %3943 = vmatprep.subr.mxu0 %v866_v56  ;;  %4585 = vst [vmem:[%s5579_s12 + $0xe0] sm:$0xff] %v3134_v63  ;;  %v3136_v7 = vadd.f32 %v3135_v33, %v1847_v55  ;;  %v1075_v50 = vld [vmem:[%s5569_s23 + $0xea8] sm:$0xff]  ;;  %v1214_v53 = vld [vmem:[%s5569_s23 + $0x1300] sm:$0xff]  ;;  %v1005_v56 = vld [vmem:[%s5569_s23 + $0xc78] sm:$0xff] }
 0x3f0   : > { %3877 = vmatpush1.msra.mxu1 %v725_v57  ;;  %3944 = vmatpush1.msra.mxu0 %v865_v60  ;;  %v1215_v51 = vld [vmem:[%s5569_s23 + $0x1308] sm:$0xff]  ;;  %v1006_v54 = vld [vmem:[%s5569_s23 + $0xc80] sm:$0xff]  ;;  %v1145_v57 = vld [vmem:[%s5569_s23 + $0x10d8] sm:$0xff]  ;;  %v1851_v60 = vrot.slane %v6519_v12, %v6159_v61 }
 0x3f1   : > { %3878 = vmatprep.subr.mxu1 %v657_v62  ;;  %3945 = vmatprep.subr.mxu0 %v797_v0  ;;  %4586 = vst [vmem:[%s5579_s12 + $0xe8] sm:$0xff] %v3136_v7  ;;  %v1146_v55 = vld [vmem:[%s5569_s23 + $0x10e0] sm:$0xff]  ;;  %v937_v59 = vld [vmem:[%s5569_s23 + $0xa58] sm:$0xff]  ;;  %v936_v63 = vld [vmem:[%s5569_s23 + $0xa50] sm:$0xff] }
 0x3f2   : > { %3879 = vmatpush1.msra.mxu1 %v656_v1  ;;  %3946 = vmatpush1.msra.mxu0 %v796_v5  ;;  %v1077_v62 = vld [vmem:[%s5569_s23 + $0xeb8] sm:$0xff]  ;;  %v6684_v0 = vld [vmem:[%s5577_s13 + $0x20] sm:$0xff]  ;;  %v1076_v1 = vld [vmem:[%s5569_s23 + $0xeb0] sm:$0xff]  ;;  %v1855_v5 = vrot.slane %v6519_v12, %v6166_v4 }
 0x3f3   : > { %3912 = vmatprep.mubr.f32.mxu1 %v5350_v28  ;;  %3947 = vmatprep.subr.mxu0 %v728_v9  ;;  %v868_v33 = vld [vmem:[%s5569_s23 + $0x830] sm:$0xff]  ;;  %v867_v9 = vld [vmem:[%s5569_s23 + $0x828] sm:$0xff] }
 0x3f4   : > { %3990 = vmatprep.subr.mxu1 %v1696_v10  ;;  %3913 = vmatmul.mubr.f32.vlgmr.msra.gmra.mxu1 %v6636_v17  ;;  %v1008_v7 = vld [vmem:[%s5569_s23 + $0xc90] sm:$0xff]  ;;  %v939_v12 = vld [vmem:[%s5569_s23 + $0xa68] sm:$0xff] }
 0x3f5   : > { %3948 = vmatpush1.msra.mxu0 %v727_v11  ;;  %3991 = vmatpush1.msra.mxu1 %v1695_v58  ;;  %v1007_v11 = vld [vmem:[%s5569_s23 + $0xc88] sm:$0xff] }
 0x3f6   : > { %3949 = vmatprep.subr.mxu0 %v659_v13  ;;  %3992 = vmatprep.subr.mxu1 %v1627_v14  ;;  %v799_v58 = vld [vmem:[%s5569_s23 + $0x608] sm:$0xff]  ;;  %v1859_v14 = vrot.slane %v6684_v0, %v6025_v2 }
 0x3f7   : > { %3950 = vmatpush1.msra.mxu0 %v658_v15  ;;  %3983 = vmatprep.mubr.f32.mxu0 %v5350_v28  ;;  %v798_v15 = vld [vmem:[%s5569_s23 + $0x600] sm:$0xff] }
 0x3f8   : > { %3993 = vmatpush1.msra.mxu1 %v1626_v18  ;;  %3984 = vmatmul.mubr.f32.vlgmr.msra.gmra.mxu0 %v6636_v17 }
 0x3f9   : > { %3994 = vmatprep.subr.mxu1 %v1558_v19  ;;  %4061 = vmatprep.subr.mxu0 %v1698_v20  ;;  %v938_v19 = vld [vmem:[%s5569_s23 + $0xa60] sm:$0xff] }
 0x3fa   : > { %3995 = vmatpush1.msra.mxu1 %v1557_v16  ;;  %4062 = vmatpush1.msra.mxu0 %v1697_v3  ;;  %v730_v20 = vld [vmem:[%s5569_s23 + $0x3e0] sm:$0xff]  ;;  %v1863_v3 = vrot.slane %v6684_v0, %v6034_v8 }
 0x3fb   : > { %3996 = vmatprep.subr.mxu1 %v1489_v21  ;;  %4063 = vmatprep.subr.mxu0 %v1629_v26  ;;  %v870_v21 = vld [vmem:[%s5569_s23 + $0x840] sm:$0xff]  ;;  %v729_v26 = vld [vmem:[%s5569_s23 + $0x3d8] sm:$0xff] }
 0x3fc   : > { %3997 = vmatpush1.msra.mxu1 %v1488_v48  ;;  %4064 = vmatpush1.msra.mxu0 %v1628_v22  ;;  %v869_v22 = vld [vmem:[%s5569_s23 + $0x838] sm:$0xff] }
 0x3fd   : > { %3998 = vmatprep.subr.mxu1 %v1420_v6  ;;  %4065 = vmatprep.subr.mxu0 %v1560_v24  ;;  %v661_v6 = vld [vmem:[%s5569_s23 + $0x1b8] sm:$0xff] }
 0x3fe   : > { %3999 = vmatpush1.msra.mxu1 %v1419_v25  ;;  %4066 = vmatpush1.msra.mxu0 %v1559_v29  ;;  %v801_v25 = vld [vmem:[%s5569_s23 + $0x618] sm:$0xff]  ;;  %v660_v29 = vld [vmem:[%s5569_s23 + $0x1b0] sm:$0xff] }
 0x3ff   : > { %4000 = vmatprep.subr.mxu1 %v1351_v30  ;;  %4067 = vmatprep.subr.mxu0 %v1491_v31  ;;  %v800_v31 = vld [vmem:[%s5569_s23 + $0x610] sm:$0xff] }
 0x400   : > { %4001 = vmatpush1.msra.mxu1 %v1350_v34  ;;  %4068 = vmatpush1.msra.mxu0 %v1490_v35  ;;  %v732_v35 = vld [vmem:[%s5569_s23 + $0x3f0] sm:$0xff] }
 0x401   : > { %4002 = vmatprep.subr.mxu1 %v1282_v36  ;;  %4069 = vmatprep.subr.mxu0 %v1422_v38  ;;  %v1700_v36 = vld [vmem:[%s5569_s23 + $0x2230] sm:$0xff]  ;;  %v731_v38 = vld [vmem:[%s5569_s23 + $0x3e8] sm:$0xff] }
 0x402   : > { %4003 = vmatpush1.msra.mxu1 %v1281_v39  ;;  %4070 = vmatpush1.msra.mxu0 %v1421_v40  ;;  %v1699_v39 = vld [vmem:[%s5569_s23 + $0x2228] sm:$0xff] }
 0x403   : > { %4004 = vmatprep.subr.mxu1 %v1213_v41  ;;  %4071 = vmatprep.subr.mxu0 %v1353_v42  ;;  %v663_v40 = vld [vmem:[%s5569_s23 + $0x1c8] sm:$0xff]  ;;  %v662_v42 = vld [vmem:[%s5569_s23 + $0x1c0] sm:$0xff] }
 0x404   : > { %4005 = vmatpush1.msra.mxu1 %v1212_v43  ;;  %4072 = vmatpush1.msra.mxu0 %v1352_v44  ;;  %v1631_v41 = vld [vmem:[%s5569_s23 + $0x2008] sm:$0xff]  ;;  %v1630_v43 = vld [vmem:[%s5569_s23 + $0x2000] sm:$0xff] }
 0x405   : > { %4006 = vmatprep.subr.mxu1 %v1144_v45  ;;  %4073 = vmatprep.subr.mxu0 %v1284_v46  ;;  %v1562_v44 = vld [vmem:[%s5569_s23 + $0x1de0] sm:$0xff]  ;;  %v1561_v46 = vld [vmem:[%s5569_s23 + $0x1dd8] sm:$0xff] }
 0x406   : > { %4007 = vmatpush1.msra.mxu1 %v1143_v47  ;;  %4074 = vmatpush1.msra.mxu0 %v1283_v49  ;;  %v1702_v45 = vld [vmem:[%s5569_s23 + $0x2240] sm:$0xff]  ;;  %v1701_v47 = vld [vmem:[%s5569_s23 + $0x2238] sm:$0xff] }
 0x407   : > { %4008 = vmatprep.subr.mxu1 %v1075_v50  ;;  %4075 = vmatprep.subr.mxu0 %v1215_v51  ;;  %v1493_v49 = vld [vmem:[%s5569_s23 + $0x1bb8] sm:$0xff]  ;;  %v1492_v51 = vld [vmem:[%s5569_s23 + $0x1bb0] sm:$0xff] }
 0x408   : > { %4009 = vmatpush1.msra.mxu1 %v1074_v52  ;;  %4076 = vmatpush1.msra.mxu0 %v1214_v53  ;;  %v1633_v50 = vld [vmem:[%s5569_s23 + $0x2018] sm:$0xff]  ;;  %v1632_v52 = vld [vmem:[%s5569_s23 + $0x2010] sm:$0xff] }
 0x409   : > { %4010 = vmatprep.subr.mxu1 %v1006_v54  ;;  %4077 = vmatprep.subr.mxu0 %v1146_v55  ;;  %v1424_v53 = vld [vmem:[%s5569_s23 + $0x1990] sm:$0xff]  ;;  %v1423_v55 = vld [vmem:[%s5569_s23 + $0x1988] sm:$0xff] }
 0x40a   : > { %4011 = vmatpush1.msra.mxu1 %v1005_v56  ;;  %4078 = vmatpush1.msra.mxu0 %v1145_v57  ;;  %v3204_v10 = vpop.f32.mrf.mxu1  ;;  %v1564_v54 = vld [vmem:[%s5569_s23 + $0x1df0] sm:$0xff]  ;;  %v1563_v56 = vld [vmem:[%s5569_s23 + $0x1de8] sm:$0xff] }
 0x40b   : > { %4012 = vmatprep.subr.mxu1 %v937_v59  ;;  %4079 = vmatprep.subr.mxu0 %v1077_v62  ;;  %v3205_v13 = vadd.f32 %v3204_v10, %v1851_v60  ;;  %v1355_v57 = vld [vmem:[%s5569_s23 + $0x1768] sm:$0xff]  ;;  %v1354_v60 = vld [vmem:[%s5569_s23 + $0x1760] sm:$0xff]  ;;  %v1216_v10 = vld [vmem:[%s5569_s23 + $0x1310] sm:$0xff] }
 0x40c   : > { %4013 = vmatpush1.msra.mxu1 %v936_v63  ;;  %4080 = vmatpush1.msra.mxu0 %v1076_v1  ;;  %v3206_v18 = vpop.f32.mrf.mxu1  ;;  %v1495_v59 = vld [vmem:[%s5569_s23 + $0x1bc8] sm:$0xff]  ;;  %v1494_v62 = vld [vmem:[%s5569_s23 + $0x1bc0] sm:$0xff] }
 0x40d   : > { %4014 = vmatprep.subr.mxu1 %v868_v33  ;;  %4081 = vmatprep.subr.mxu0 %v1008_v7  ;;  %4587 = vst [vmem:[%s5579_s12 + $0xf0] sm:$0xff] %v3205_v13  ;;  %v3207_v16 = vadd.f32 %v3206_v18, %v1855_v5  ;;  %v1286_v63 = vld [vmem:[%s5569_s23 + $0x1540] sm:$0xff]  ;;  %v1285_v33 = vld [vmem:[%s5569_s23 + $0x1538] sm:$0xff]  ;;  %v1288_v13 = vld [vmem:[%s5569_s23 + $0x1550] sm:$0xff] }
 0x40e   : > { %4015 = vmatpush1.msra.mxu1 %v867_v9  ;;  %4082 = vmatpush1.msra.mxu0 %v1007_v11  ;;  %v3275_v48 = vpop.f32.mrf.mxu0  ;;  %v1426_v1 = vld [vmem:[%s5569_s23 + $0x19a0] sm:$0xff]  ;;  %v1425_v5 = vld [vmem:[%s5569_s23 + $0x1998] sm:$0xff]  ;;  %v1356_v11 = vld [vmem:[%s5569_s23 + $0x1770] sm:$0xff] }
 0x40f   : > { %4016 = vmatprep.subr.mxu1 %v799_v58  ;;  %4083 = vmatprep.subr.mxu0 %v939_v12  ;;  %4588 = vst [vmem:[%s5579_s12 + $0xf8] sm:$0xff] %v3207_v16  ;;  %v3276_v24 = vadd.f32 %v3275_v48, %v1859_v14  ;;  %v1217_v7 = vld [vmem:[%s5569_s23 + $0x1318] sm:$0xff]  ;;  %v1148_v58 = vld [vmem:[%s5569_s23 + $0x10f0] sm:$0xff]  ;;  %v1147_v14 = vld [vmem:[%s5569_s23 + $0x10e8] sm:$0xff] }
 0x410   : > { %4017 = vmatpush1.msra.mxu1 %v798_v15  ;;  %4084 = vmatpush1.msra.mxu0 %v938_v19  ;;  %v3277_v30 = vpop.f32.mrf.mxu0  ;;  %v1357_v9 = vld [vmem:[%s5569_s23 + $0x1778] sm:$0xff]  ;;  %v1287_v12 = vld [vmem:[%s5569_s23 + $0x1548] sm:$0xff]  ;;  %v1078_v19 = vld [vmem:[%s5569_s23 + $0xec0] sm:$0xff] }
 0x411   : > { %4018 = vmatprep.subr.mxu1 %v730_v20  ;;  %4085 = vmatprep.subr.mxu0 %v870_v21  ;;  %4589 = vst [vmem:[%s5579_s12 + $0x100] sm:$0xff] %v3276_v24  ;;  %v3278_v34 = vadd.f32 %v3277_v30, %v1863_v3  ;;  %v1079_v15 = vld [vmem:[%s5569_s23 + $0xec8] sm:$0xff]  ;;  %v1218_v20 = vld [vmem:[%s5569_s23 + $0x1320] sm:$0xff]  ;;  %v1009_v21 = vld [vmem:[%s5569_s23 + $0xc98] sm:$0xff]  ;;  %v1871_v30 = vrot.slane %v6684_v0, %v6070_v37 }
 0x412   : > { %4019 = vmatpush1.msra.mxu1 %v729_v26  ;;  %4086 = vmatpush1.msra.mxu0 %v869_v22  ;;  %v1219_v18 = vld [vmem:[%s5569_s23 + $0x1328] sm:$0xff]  ;;  %v1010_v16 = vld [vmem:[%s5569_s23 + $0xca0] sm:$0xff]  ;;  %v1149_v26 = vld [vmem:[%s5569_s23 + $0x10f8] sm:$0xff]  ;;  %v1867_v22 = vrot.slane %v6684_v0, %v6062_v32 }
 0x413   : > { %4020 = vmatprep.subr.mxu1 %v661_v6  ;;  %4087 = vmatprep.subr.mxu0 %v801_v25  ;;  %4590 = vst [vmem:[%s5579_s12 + $0x108] sm:$0xff] %v3278_v34  ;;  %v1150_v3 = vld [vmem:[%s5569_s23 + $0x1100] sm:$0xff]  ;;  %v941_v48 = vld [vmem:[%s5569_s23 + $0xa78] sm:$0xff]  ;;  %v940_v24 = vld [vmem:[%s5569_s23 + $0xa70] sm:$0xff] }
 0x414   : > { %4021 = vmatpush1.msra.mxu1 %v660_v29  ;;  %4088 = vmatpush1.msra.mxu0 %v800_v31  ;;  %v1081_v6 = vld [vmem:[%s5569_s23 + $0xed8] sm:$0xff]  ;;  %v1080_v25 = vld [vmem:[%s5569_s23 + $0xed0] sm:$0xff]  ;;  %v871_v34 = vld [vmem:[%s5569_s23 + $0x848] sm:$0xff] }
 0x415   : > { %4054 = vmatprep.mubr.f32.mxu1 %v5350_v28  ;;  %4089 = vmatprep.subr.mxu0 %v732_v35  ;;  %v872_v29 = vld [vmem:[%s5569_s23 + $0x850] sm:$0xff] }
 0x416   : > { %4132 = vmatprep.subr.mxu1 %v1700_v36  ;;  %4055 = vmatmul.mubr.f32.vlgmr.msra.gmra.mxu1 %v6636_v17  ;;  %v1012_v31 = vld [vmem:[%s5569_s23 + $0xcb0] sm:$0xff]  ;;  %v1011_v36 = vld [vmem:[%s5569_s23 + $0xca8] sm:$0xff] }
 0x417   : > { %4090 = vmatpush1.msra.mxu0 %v731_v38  ;;  %4133 = vmatpush1.msra.mxu1 %v1699_v39  ;;  %v803_v38 = vld [vmem:[%s5569_s23 + $0x628] sm:$0xff] }
 0x418   : > { %4091 = vmatprep.subr.mxu0 %v663_v40  ;;  %4134 = vmatprep.subr.mxu1 %v1631_v41  ;;  %v1875_v40 = vrot.slane %v6684_v0, %v6117_v23  ;;  %v943_v41 = vld [vmem:[%s5569_s23 + $0xa88] sm:$0xff] }
 0x419   : > { %4092 = vmatpush1.msra.mxu0 %v662_v42  ;;  %4125 = vmatprep.mubr.f32.mxu0 %v5350_v28  ;;  %v802_v42 = vld [vmem:[%s5569_s23 + $0x620] sm:$0xff] }
 0x41a   : > { %4135 = vmatpush1.msra.mxu1 %v1630_v43  ;;  %4126 = vmatmul.mubr.f32.vlgmr.msra.gmra.mxu0 %v6636_v17 }
 0x41b   : > { %4136 = vmatprep.subr.mxu1 %v1562_v44  ;;  %4203 = vmatprep.subr.mxu0 %v1702_v45  ;;  %v942_v44 = vld [vmem:[%s5569_s23 + $0xa80] sm:$0xff] }
 0x41c   : > { %4137 = vmatpush1.msra.mxu1 %v1561_v46  ;;  %4204 = vmatpush1.msra.mxu0 %v1701_v47  ;;  %v734_v45 = vld [vmem:[%s5569_s23 + $0x400] sm:$0xff]  ;;  %v1879_v47 = vrot.slane %v6684_v0, %v6123_v27 }
 0x41d   : > { %4138 = vmatprep.subr.mxu1 %v1493_v49  ;;  %4205 = vmatprep.subr.mxu0 %v1633_v50  ;;  %v874_v49 = vld [vmem:[%s5569_s23 + $0x860] sm:$0xff]  ;;  %v733_v50 = vld [vmem:[%s5569_s23 + $0x3f8] sm:$0xff] }
 0x41e   : > { %4139 = vmatpush1.msra.mxu1 %v1492_v51  ;;  %4206 = vmatpush1.msra.mxu0 %v1632_v52  ;;  %v873_v52 = vld [vmem:[%s5569_s23 + $0x858] sm:$0xff] }
 0x41f   : > { %4140 = vmatprep.subr.mxu1 %v1424_v53  ;;  %4207 = vmatprep.subr.mxu0 %v1564_v54  ;;  %v665_v53 = vld [vmem:[%s5569_s23 + $0x1d8] sm:$0xff] }
 0x420   : > { %4141 = vmatpush1.msra.mxu1 %v1423_v55  ;;  %4208 = vmatpush1.msra.mxu0 %v1563_v56  ;;  %v805_v55 = vld [vmem:[%s5569_s23 + $0x638] sm:$0xff]  ;;  %v664_v56 = vld [vmem:[%s5569_s23 + $0x1d0] sm:$0xff] }
 0x421   : > { %4142 = vmatprep.subr.mxu1 %v1355_v57  ;;  %4209 = vmatprep.subr.mxu0 %v1495_v59  ;;  %v804_v59 = vld [vmem:[%s5569_s23 + $0x630] sm:$0xff] }
 0x422   : > { %4143 = vmatpush1.msra.mxu1 %v1354_v60  ;;  %4210 = vmatpush1.msra.mxu0 %v1494_v62  ;;  %v736_v62 = vld [vmem:[%s5569_s23 + $0x410] sm:$0xff] }
 0x423   : > { %4144 = vmatprep.subr.mxu1 %v1286_v63  ;;  %4211 = vmatprep.subr.mxu0 %v1426_v1  ;;  %v1704_v63 = vld [vmem:[%s5569_s23 + $0x2250] sm:$0xff]  ;;  %v735_v1 = vld [vmem:[%s5569_s23 + $0x408] sm:$0xff] }
 0x424   : > { %4145 = vmatpush1.msra.mxu1 %v1285_v33  ;;  %4212 = vmatpush1.msra.mxu0 %v1425_v5  ;;  %v1703_v33 = vld [vmem:[%s5569_s23 + $0x2248] sm:$0xff] }
 0x425   : > { %4146 = vmatprep.subr.mxu1 %v1217_v7  ;;  %4213 = vmatprep.subr.mxu0 %v1357_v9  ;;  %v667_v5 = vld [vmem:[%s5569_s23 + $0x1e8] sm:$0xff]  ;;  %v666_v9 = vld [vmem:[%s5569_s23 + $0x1e0] sm:$0xff] }
 0x426   : > { %4147 = vmatpush1.msra.mxu1 %v1216_v10  ;;  %4214 = vmatpush1.msra.mxu0 %v1356_v11  ;;  %v1635_v7 = vld [vmem:[%s5569_s23 + $0x2028] sm:$0xff]  ;;  %v1634_v10 = vld [vmem:[%s5569_s23 + $0x2020] sm:$0xff] }
 0x427   : > { %4148 = vmatprep.subr.mxu1 %v1148_v58  ;;  %4215 = vmatprep.subr.mxu0 %v1288_v13  ;;  %v1566_v11 = vld [vmem:[%s5569_s23 + $0x1e00] sm:$0xff]  ;;  %v1565_v13 = vld [vmem:[%s5569_s23 + $0x1df8] sm:$0xff] }
 0x428   : > { %4149 = vmatpush1.msra.mxu1 %v1147_v14  ;;  %4216 = vmatpush1.msra.mxu0 %v1287_v12  ;;  %v1706_v58 = vld [vmem:[%s5569_s23 + $0x2260] sm:$0xff]  ;;  %v1705_v14 = vld [vmem:[%s5569_s23 + $0x2258] sm:$0xff] }
 0x429   : > { %4150 = vmatprep.subr.mxu1 %v1079_v15  ;;  %4217 = vmatprep.subr.mxu0 %v1219_v18  ;;  %v1497_v12 = vld [vmem:[%s5569_s23 + $0x1bd8] sm:$0xff]  ;;  %v1496_v18 = vld [vmem:[%s5569_s23 + $0x1bd0] sm:$0xff] }
 0x42a   : > { %4151 = vmatpush1.msra.mxu1 %v1078_v19  ;;  %4218 = vmatpush1.msra.mxu0 %v1218_v20  ;;  %v1637_v15 = vld [vmem:[%s5569_s23 + $0x2038] sm:$0xff]  ;;  %v1636_v19 = vld [vmem:[%s5569_s23 + $0x2030] sm:$0xff] }
 0x42b   : > { %4152 = vmatprep.subr.mxu1 %v1010_v16  ;;  %4219 = vmatprep.subr.mxu0 %v1150_v3  ;;  %v1428_v20 = vld [vmem:[%s5569_s23 + $0x19b0] sm:$0xff]  ;;  %v1427_v3 = vld [vmem:[%s5569_s23 + $0x19a8] sm:$0xff] }
 0x42c   : > { %4153 = vmatpush1.msra.mxu1 %v1009_v21  ;;  %4220 = vmatpush1.msra.mxu0 %v1149_v26  ;;  %v3346_v35 = vpop.f32.mrf.mxu1  ;;  %v1568_v16 = vld [vmem:[%s5569_s23 + $0x1e10] sm:$0xff]  ;;  %v1567_v21 = vld [vmem:[%s5569_s23 + $0x1e08] sm:$0xff] }
 0x42d   : > { %4154 = vmatprep.subr.mxu1 %v941_v48  ;;  %4221 = vmatprep.subr.mxu0 %v1081_v6  ;;  %v3347_v39 = vadd.f32 %v3346_v35, %v1867_v22  ;;  %v1359_v26 = vld [vmem:[%s5569_s23 + $0x1788] sm:$0xff]  ;;  %v1358_v22 = vld [vmem:[%s5569_s23 + $0x1780] sm:$0xff]  ;;  %v1220_v35 = vld [vmem:[%s5569_s23 + $0x1330] sm:$0xff] }
 0x42e   : > { %4155 = vmatpush1.msra.mxu1 %v940_v24  ;;  %4222 = vmatpush1.msra.mxu0 %v1080_v25  ;;  %v3348_v43 = vpop.f32.mrf.mxu1  ;;  %v1499_v48 = vld [vmem:[%s5569_s23 + $0x1be8] sm:$0xff]  ;;  %v1498_v6 = vld [vmem:[%s5569_s23 + $0x1be0] sm:$0xff] }
 0x42f   : > { %4156 = vmatprep.subr.mxu1 %v872_v29  ;;  %4223 = vmatprep.subr.mxu0 %v1012_v31  ;;  %4591 = vst [vmem:[%s5579_s12 + $0x110] sm:$0xff] %v3347_v39  ;;  %v3349_v46 = vadd.f32 %v3348_v43, %v1871_v30  ;;  %v1290_v24 = vld [vmem:[%s5569_s23 + $0x1560] sm:$0xff]  ;;  %v1289_v29 = vld [vmem:[%s5569_s23 + $0x1558] sm:$0xff]  ;;  %v1292_v39 = vld [vmem:[%s5569_s23 + $0x1570] sm:$0xff] }
 0x430   : > { %4157 = vmatpush1.msra.mxu1 %v871_v34  ;;  %4224 = vmatpush1.msra.mxu0 %v1011_v36  ;;  %v3417_v51 = vpop.f32.mrf.mxu0  ;;  %v1430_v25 = vld [vmem:[%s5569_s23 + $0x19c0] sm:$0xff]  ;;  %v1429_v30 = vld [vmem:[%s5569_s23 + $0x19b8] sm:$0xff]  ;;  %v1360_v36 = vld [vmem:[%s5569_s23 + $0x1790] sm:$0xff] }
 0x431   : > { %4158 = vmatprep.subr.mxu1 %v803_v38  ;;  %4225 = vmatprep.subr.mxu0 %v943_v41  ;;  %4592 = vst [vmem:[%s5579_s12 + $0x118] sm:$0xff] %v3349_v46  ;;  %v3418_v54 = vadd.f32 %v3417_v51, %v1875_v40  ;;  %v1221_v31 = vld [vmem:[%s5569_s23 + $0x1338] sm:$0xff]  ;;  %v1152_v38 = vld [vmem:[%s5569_s23 + $0x1110] sm:$0xff]  ;;  %v1151_v40 = vld [vmem:[%s5569_s23 + $0x1108] sm:$0xff] }
 0x432   : > { %4159 = vmatpush1.msra.mxu1 %v802_v42  ;;  %4226 = vmatpush1.msra.mxu0 %v942_v44  ;;  %v3419_v57 = vpop.f32.mrf.mxu0  ;;  %v1361_v34 = vld [vmem:[%s5569_s23 + $0x1798] sm:$0xff]  ;;  %v1291_v41 = vld [vmem:[%s5569_s23 + $0x1568] sm:$0xff]  ;;  %v1082_v44 = vld [vmem:[%s5569_s23 + $0xee0] sm:$0xff] }
 0x433   : > { %4160 = vmatprep.subr.mxu1 %v734_v45  ;;  %4227 = vmatprep.subr.mxu0 %v874_v49  ;;  %4593 = vst [vmem:[%s5579_s12 + $0x120] sm:$0xff] %v3418_v54  ;;  %v3420_v60 = vadd.f32 %v3419_v57, %v1879_v47  ;;  %v1083_v42 = vld [vmem:[%s5569_s23 + $0xee8] sm:$0xff]  ;;  %v1222_v45 = vld [vmem:[%s5569_s23 + $0x1340] sm:$0xff]  ;;  %v1013_v49 = vld [vmem:[%s5569_s23 + $0xcb8] sm:$0xff] }
 0x434   : > { %4161 = vmatpush1.msra.mxu1 %v733_v50  ;;  %4228 = vmatpush1.msra.mxu0 %v873_v52  ;;  %v1223_v43 = vld [vmem:[%s5569_s23 + $0x1348] sm:$0xff]  ;;  %v1014_v46 = vld [vmem:[%s5569_s23 + $0xcc0] sm:$0xff]  ;;  %v1153_v50 = vld [vmem:[%s5569_s23 + $0x1118] sm:$0xff]  ;;  %v1883_v52 = vrot.slane %v6684_v0, %v6159_v61 }
 0x435   : > { %4162 = vmatprep.subr.mxu1 %v665_v53  ;;  %4229 = vmatprep.subr.mxu0 %v805_v55  ;;  %4594 = vst [vmem:[%s5579_s12 + $0x128] sm:$0xff] %v3420_v60  ;;  %v1154_v47 = vld [vmem:[%s5569_s23 + $0x1120] sm:$0xff]  ;;  %v945_v51 = vld [vmem:[%s5569_s23 + $0xa98] sm:$0xff]  ;;  %v944_v54 = vld [vmem:[%s5569_s23 + $0xa90] sm:$0xff] }
 0x436   : > { %4163 = vmatpush1.msra.mxu1 %v664_v56  ;;  %4230 = vmatpush1.msra.mxu0 %v804_v59  ;;  %v1085_v53 = vld [vmem:[%s5569_s23 + $0xef8] sm:$0xff]  ;;  %v6847_v55 = vld [vmem:[%s5577_s13 + $0x28] sm:$0xff]  ;;  %v1887_v59 = vrot.slane %v6684_v0, %v6166_v4 }
 0x437   : > { %4196 = vmatprep.mubr.f32.mxu1 %v5350_v28  ;;  %4231 = vmatprep.subr.mxu0 %v736_v62  ;;  %v1084_v56 = vld [vmem:[%s5569_s23 + $0xef0] sm:$0xff]  ;;  %v875_v62 = vld [vmem:[%s5569_s23 + $0x868] sm:$0xff] }
 0x438   : > { %4274 = vmatprep.subr.mxu1 %v1704_v63  ;;  %4197 = vmatmul.mubr.f32.vlgmr.msra.gmra.mxu1 %v6636_v17  ;;  %v876_v57 = vld [vmem:[%s5569_s23 + $0x870] sm:$0xff]  ;;  %v947_v0 = vld [vmem:[%s5569_s23 + $0xaa8] sm:$0xff] }
 0x439   : > { %4232 = vmatpush1.msra.mxu0 %v735_v1  ;;  %4275 = vmatpush1.msra.mxu1 %v1703_v33  ;;  %v1016_v60 = vld [vmem:[%s5569_s23 + $0xcd0] sm:$0xff]  ;;  %v1015_v1 = vld [vmem:[%s5569_s23 + $0xcc8] sm:$0xff] }
 0x43a   : > { %4233 = vmatprep.subr.mxu0 %v667_v5  ;;  %4276 = vmatprep.subr.mxu1 %v1635_v7  ;;  %v807_v33 = vld [vmem:[%s5569_s23 + $0x648] sm:$0xff]  ;;  %v1891_v7 = vrot.slane %v6847_v55, %v6025_v2 }
 0x43b   : > { %4234 = vmatpush1.msra.mxu0 %v666_v9  ;;  %4267 = vmatprep.mubr.f32.mxu0 %v5350_v28  ;;  %v806_v9 = vld [vmem:[%s5569_s23 + $0x640] sm:$0xff] }
 0x43c   : > { %4277 = vmatpush1.msra.mxu1 %v1634_v10  ;;  %4268 = vmatmul.mubr.f32.vlgmr.msra.gmra.mxu0 %v6636_v17 }
 0x43d   : > { %4278 = vmatprep.subr.mxu1 %v1566_v11  ;;  %4345 = vmatprep.subr.mxu0 %v1706_v58  ;;  %v946_v11 = vld [vmem:[%s5569_s23 + $0xaa0] sm:$0xff] }
 0x43e   : > { %4279 = vmatpush1.msra.mxu1 %v1565_v13  ;;  %4346 = vmatpush1.msra.mxu0 %v1705_v14  ;;  %v738_v58 = vld [vmem:[%s5569_s23 + $0x420] sm:$0xff]  ;;  %v1895_v14 = vrot.slane %v6847_v55, %v6034_v8 }
 0x43f   : > { %4280 = vmatprep.subr.mxu1 %v1497_v12  ;;  %4347 = vmatprep.subr.mxu0 %v1637_v15  ;;  %v878_v12 = vld [vmem:[%s5569_s23 + $0x880] sm:$0xff]  ;;  %v737_v15 = vld [vmem:[%s5569_s23 + $0x418] sm:$0xff] }
 0x440   : > { %4281 = vmatpush1.msra.mxu1 %v1496_v18  ;;  %4348 = vmatpush1.msra.mxu0 %v1636_v19  ;;  %v877_v19 = vld [vmem:[%s5569_s23 + $0x878] sm:$0xff] }
 0x441   : > { %4282 = vmatprep.subr.mxu1 %v1428_v20  ;;  %4349 = vmatprep.subr.mxu0 %v1568_v16  ;;  %v669_v20 = vld [vmem:[%s5569_s23 + $0x1f8] sm:$0xff] }
 0x442   : > { %4283 = vmatpush1.msra.mxu1 %v1427_v3  ;;  %4350 = vmatpush1.msra.mxu0 %v1567_v21  ;;  %v809_v3 = vld [vmem:[%s5569_s23 + $0x658] sm:$0xff]  ;;  %v668_v21 = vld [vmem:[%s5569_s23 + $0x1f0] sm:$0xff] }
 0x443   : > { %4284 = vmatprep.subr.mxu1 %v1359_v26  ;;  %4351 = vmatprep.subr.mxu0 %v1499_v48  ;;  %v808_v48 = vld [vmem:[%s5569_s23 + $0x650] sm:$0xff] }
 0x444   : > { %4285 = vmatpush1.msra.mxu1 %v1358_v22  ;;  %4352 = vmatpush1.msra.mxu0 %v1498_v6  ;;  %v740_v6 = vld [vmem:[%s5569_s23 + $0x430] sm:$0xff] }
 0x445   : > { %4286 = vmatprep.subr.mxu1 %v1290_v24  ;;  %4353 = vmatprep.subr.mxu0 %v1430_v25  ;;  %v1708_v24 = vld [vmem:[%s5569_s23 + $0x2270] sm:$0xff]  ;;  %v739_v25 = vld [vmem:[%s5569_s23 + $0x428] sm:$0xff] }
 0x446   : > { %4287 = vmatpush1.msra.mxu1 %v1289_v29  ;;  %4354 = vmatpush1.msra.mxu0 %v1429_v30  ;;  %v1707_v29 = vld [vmem:[%s5569_s23 + $0x2268] sm:$0xff] }
 0x447   : > { %4288 = vmatprep.subr.mxu1 %v1221_v31  ;;  %4355 = vmatprep.subr.mxu0 %v1361_v34  ;;  %v671_v30 = vld [vmem:[%s5569_s23 + $0x208] sm:$0xff]  ;;  %v670_v34 = vld [vmem:[%s5569_s23 + $0x200] sm:$0xff] }
 0x448   : > { %4289 = vmatpush1.msra.mxu1 %v1220_v35  ;;  %4356 = vmatpush1.msra.mxu0 %v1360_v36  ;;  %v1639_v31 = vld [vmem:[%s5569_s23 + $0x2048] sm:$0xff]  ;;  %v1638_v35 = vld [vmem:[%s5569_s23 + $0x2040] sm:$0xff] }
 0x449   : > { %4290 = vmatprep.subr.mxu1 %v1152_v38  ;;  %4357 = vmatprep.subr.mxu0 %v1292_v39  ;;  %v1570_v36 = vld [vmem:[%s5569_s23 + $0x1e20] sm:$0xff]  ;;  %v1569_v38 = vld [vmem:[%s5569_s23 + $0x1e18] sm:$0xff] }
 0x44a   : > { %4291 = vmatpush1.msra.mxu1 %v1151_v40  ;;  %4358 = vmatpush1.msra.mxu0 %v1291_v41  ;;  %v1709_v39 = vld [vmem:[%s5569_s23 + $0x2278] sm:$0xff]  ;;  %v1500_v41 = vld [vmem:[%s5569_s23 + $0x1bf0] sm:$0xff] }
 0x44b   : > { %4292 = vmatprep.subr.mxu1 %v1083_v42  ;;  %4359 = vmatprep.subr.mxu0 %v1223_v43  ;;  %v1501_v40 = vld [vmem:[%s5569_s23 + $0x1bf8] sm:$0xff]  ;;  %v1640_v42 = vld [vmem:[%s5569_s23 + $0x2050] sm:$0xff] }
 0x44c   : > { %4293 = vmatpush1.msra.mxu1 %v1082_v44  ;;  %4360 = vmatpush1.msra.mxu0 %v1222_v45  ;;  %v1432_v43 = vld [vmem:[%s5569_s23 + $0x19d0] sm:$0xff]  ;;  %v1431_v44 = vld [vmem:[%s5569_s23 + $0x19c8] sm:$0xff] }
 0x44d   : > { %4294 = vmatprep.subr.mxu1 %v1014_v46  ;;  %4361 = vmatprep.subr.mxu0 %v1154_v47  ;;  %v1363_v45 = vld [vmem:[%s5569_s23 + $0x17a8] sm:$0xff]  ;;  %v1362_v46 = vld [vmem:[%s5569_s23 + $0x17a0] sm:$0xff] }
 0x44e   : > { %4295 = vmatpush1.msra.mxu1 %v1013_v49  ;;  %4362 = vmatpush1.msra.mxu0 %v1153_v50  ;;  %v3488_v63 = vpop.f32.mrf.mxu1  ;;  %v1502_v47 = vld [vmem:[%s5569_s23 + $0x1c00] sm:$0xff]  ;;  %v1293_v50 = vld [vmem:[%s5569_s23 + $0x1578] sm:$0xff] }
 0x44f   : > { %4296 = vmatprep.subr.mxu1 %v945_v51  ;;  %4363 = vmatprep.subr.mxu0 %v1085_v53  ;;  %v3489_v5 = vadd.f32 %v3488_v63, %v1883_v52  ;;  %v1294_v49 = vld [vmem:[%s5569_s23 + $0x1580] sm:$0xff]  ;;  %v1433_v51 = vld [vmem:[%s5569_s23 + $0x19d8] sm:$0xff]  ;;  %v1224_v53 = vld [vmem:[%s5569_s23 + $0x1350] sm:$0xff] }
 0x450   : > { %4297 = vmatpush1.msra.mxu1 %v944_v54  ;;  %4364 = vmatpush1.msra.mxu0 %v1084_v56  ;;  %v3490_v10 = vpop.f32.mrf.mxu1  ;;  %v1225_v52 = vld [vmem:[%s5569_s23 + $0x1358] sm:$0xff]  ;;  %v1364_v54 = vld [vmem:[%s5569_s23 + $0x17b0] sm:$0xff]  ;;  %v1226_v63 = vld [vmem:[%s5569_s23 + $0x1360] sm:$0xff] }
 0x451   : > { %4298 = vmatprep.subr.mxu1 %v876_v57  ;;  %4365 = vmatprep.subr.mxu0 %v1016_v60  ;;  %4595 = vst [vmem:[%s5579_s12 + $0x130] sm:$0xff] %v3489_v5  ;;  %v3491_v13 = vadd.f32 %v3490_v10, %v1887_v59  ;;  %v1156_v56 = vld [vmem:[%s5569_s23 + $0x1130] sm:$0xff]  ;;  %v1155_v57 = vld [vmem:[%s5569_s23 + $0x1128] sm:$0xff]  ;;  %v1157_v5 = vld [vmem:[%s5569_s23 + $0x1138] sm:$0xff] }
 0x452   : > { %4299 = vmatpush1.msra.mxu1 %v875_v62  ;;  %4366 = vmatpush1.msra.mxu0 %v1015_v1  ;;  %v3559_v18 = vpop.f32.mrf.mxu0  ;;  %v1295_v59 = vld [vmem:[%s5569_s23 + $0x1588] sm:$0xff]  ;;  %v1086_v62 = vld [vmem:[%s5569_s23 + $0xf00] sm:$0xff]  ;;  %v1088_v10 = vld [vmem:[%s5569_s23 + $0xf10] sm:$0xff] }
 0x453   : > { %4300 = vmatprep.subr.mxu1 %v807_v33  ;;  %4367 = vmatprep.subr.mxu0 %v947_v0  ;;  %4596 = vst [vmem:[%s5579_s12 + $0x138] sm:$0xff] %v3491_v13  ;;  %v3560_v16 = vadd.f32 %v3559_v18, %v1891_v7  ;;  %v1087_v60 = vld [vmem:[%s5569_s23 + $0xf08] sm:$0xff]  ;;  %v1018_v1 = vld [vmem:[%s5569_s23 + $0xce0] sm:$0xff]  ;;  %v1017_v33 = vld [vmem:[%s5569_s23 + $0xcd8] sm:$0xff]  ;;  %v1899_v0 = vrot.slane %v6847_v55, %v6062_v32 }
 0x454   : > { %4301 = vmatpush1.msra.mxu1 %v806_v9  ;;  %4368 = vmatpush1.msra.mxu0 %v946_v11  ;;  %v3561_v26 = vpop.f32.mrf.mxu0  ;;  %v949_v7 = vld [vmem:[%s5569_s23 + $0xab8] sm:$0xff]  ;;  %v948_v9 = vld [vmem:[%s5569_s23 + $0xab0] sm:$0xff]  ;;  %v879_v13 = vld [vmem:[%s5569_s23 + $0x888] sm:$0xff] }
 0x455   : > { %4302 = vmatprep.subr.mxu1 %v738_v58  ;;  %4369 = vmatprep.subr.mxu0 %v878_v12  ;;  %4597 = vst [vmem:[%s5579_s12 + $0x140] sm:$0xff] %v3560_v16  ;;  %v3562_v22 = vadd.f32 %v3561_v26, %v1895_v14  ;;  %v880_v11 = vld [vmem:[%s5569_s23 + $0x890] sm:$0xff]  ;;  %v1903_v58 = vrot.slane %v6847_v55, %v6070_v37  ;;  %v1019_v12 = vld [vmem:[%s5569_s23 + $0xce8] sm:$0xff] }
 0x456   : > { %4303 = vmatpush1.msra.mxu1 %v737_v15  ;;  %4370 = vmatpush1.msra.mxu0 %v877_v19  ;;  %v811_v15 = vld [vmem:[%s5569_s23 + $0x668] sm:$0xff]  ;;  %v1907_v19 = vrot.slane %v6847_v55, %v6117_v23 }
 0x457   : > { %4304 = vmatprep.subr.mxu1 %v669_v20  ;;  %4371 = vmatprep.subr.mxu0 %v809_v3  ;;  %4598 = vst [vmem:[%s5579_s12 + $0x148] sm:$0xff] %v3562_v22  ;;  %v810_v20 = vld [vmem:[%s5569_s23 + $0x660] sm:$0xff]  ;;  %v741_v22 = vld [vmem:[%s5569_s23 + $0x438] sm:$0xff] }
 0x458   : > { %4305 = vmatpush1.msra.mxu1 %v668_v21  ;;  %4372 = vmatpush1.msra.mxu0 %v808_v48  ;;  %v950_v3 = vld [vmem:[%s5569_s23 + $0xac0] sm:$0xff]  ;;  %v1911_v48 = vrot.slane %v6847_v55, %v6123_v27 }
 0x459   : > { %4338 = vmatprep.mubr.f32.mxu1 %v5350_v28  ;;  %4373 = vmatprep.subr.mxu0 %v740_v6  ;;  %v742_v21 = vld [vmem:[%s5569_s23 + $0x440] sm:$0xff] }
 0x45a   : > { %4416 = vmatprep.subr.mxu1 %v1708_v24  ;;  %4339 = vmatmul.mubr.f32.vlgmr.msra.gmra.mxu1 %v6636_v17  ;;  %v881_v24 = vld [vmem:[%s5569_s23 + $0x898] sm:$0xff] }
 0x45b   : > { %4374 = vmatpush1.msra.mxu0 %v739_v25  ;;  %4417 = vmatpush1.msra.mxu1 %v1707_v29  ;;  %v673_v25 = vld [vmem:[%s5569_s23 + $0x218] sm:$0xff] }
 0x45c   : > { %4375 = vmatprep.subr.mxu0 %v671_v30  ;;  %4418 = vmatprep.subr.mxu1 %v1639_v31  ;;  %v672_v30 = vld [vmem:[%s5569_s23 + $0x210] sm:$0xff] }
 0x45d   : > { %4376 = vmatpush1.msra.mxu0 %v670_v34  ;;  %4409 = vmatprep.mubr.f32.mxu0 %v5350_v28  ;;  %v812_v34 = vld [vmem:[%s5569_s23 + $0x670] sm:$0xff] }
 0x45e   : > { %4419 = vmatpush1.msra.mxu1 %v1638_v35  ;;  %4410 = vmatmul.mubr.f32.vlgmr.msra.gmra.mxu0 %v6636_v17  ;;  %v1571_v17 = vld [vmem:[%s5569_s23 + $0x1e28] sm:$0xff] }
 0x45f   : > { %4420 = vmatprep.subr.mxu1 %v1570_v36  ;;  %4885 = vmatprep.subr.mxu0 %v5350_v28  ;;  %v743_v36 = vld [vmem:[%s5569_s23 + $0x448] sm:$0xff] }
 0x460   : > { %4421 = vmatpush1.msra.mxu1 %v1569_v38  ;;  %4886 = vmatpush3.msra.mxu0 %v1709_v39  ;;  %v5055_v38 = vld [vmem:[#allocation2] sm:$0xff]  ;;  %v674_v39 = vld [vmem:[%s5569_s23 + $0x220] sm:$0xff] }
 0x461   : > { %4422 = vmatprep.subr.mxu1 %v1501_v40  ;;  %4887 = vmatprep.subr.mxu0 %v5350_v28  ;;  %v1915_v40 = vrot.slane %v6847_v55, %v6159_v61 }
 0x462   : > { %4423 = vmatpush1.msra.mxu1 %v1500_v41  ;;  %4888 = vmatpush3.msra.mxu0 %v1640_v42  ;;  %v1716_v41 = vld [vmem:[%s5577_s13 + $0x30] sm:$0xff]  ;;  %v1919_v42 = vrot.slane %v6847_v55, %v6166_v4 }
 0x463   : > { %4424 = vmatprep.subr.mxu1 %v1432_v43  ;;  %4889 = vmatprep.subr.mxu0 %v5350_v28  ;;  %v1931_v55 = vrot.slane %v1716_v41, %v6062_v32 }
 0x464   : > { %4425 = vmatpush1.msra.mxu1 %v1431_v44  ;;  %4890 = vmatpush3.msra.mxu0 %v1571_v17  ;;  %v1923_v17 = vrot.slane %v1716_v41, %v6025_v2 }
 0x465   : > { %4426 = vmatprep.subr.mxu1 %v1363_v45  ;;  %4891 = vmatprep.subr.mxu0 %v5350_v28 }
 0x466   : > { %4427 = vmatpush1.msra.mxu1 %v1362_v46  ;;  %4892 = vmatpush3.msra.mxu0 %v1502_v47 }
 0x467   : > { %4428 = vmatprep.subr.mxu1 %v1294_v49  ;;  %4893 = vmatprep.subr.mxu0 %v5350_v28 }
 0x468   : > { %4429 = vmatpush1.msra.mxu1 %v1293_v50  ;;  %4894 = vmatpush3.msra.mxu0 %v1433_v51 }
 0x469   : > { %4430 = vmatprep.subr.mxu1 %v1225_v52  ;;  %4895 = vmatprep.subr.mxu0 %v5350_v28  ;;  %v1935_v52 = vrot.slane %v1716_v41, %v6070_v37 }
 0x46a   : > { %4431 = vmatpush1.msra.mxu1 %v1224_v53  ;;  %4896 = vmatpush3.msra.mxu0 %v1364_v54 }
 0x46b   : > { %4432 = vmatprep.subr.mxu1 %v1156_v56  ;;  %4897 = vmatprep.subr.mxu0 %v5350_v28  ;;  %v1939_v56 = vrot.slane %v1716_v41, %v6117_v23 }
 0x46c   : > { %4433 = vmatpush1.msra.mxu1 %v1155_v57  ;;  %4898 = vmatpush3.msra.mxu0 %v1295_v59 }
 0x46d   : > { %4434 = vmatprep.subr.mxu1 %v1087_v60  ;;  %4899 = vmatprep.subr.mxu0 %v5350_v28  ;;  %v1943_v60 = vrot.slane %v1716_v41, %v6123_v27 }
 0x46e   : > { %4435 = vmatpush1.msra.mxu1 %v1086_v62  ;;  %4900 = vmatpush3.msra.mxu0 %v1226_v63 }
 0x46f   : > { %4436 = vmatprep.subr.mxu1 %v1018_v1  ;;  %4901 = vmatprep.subr.mxu0 %v5350_v28 }
 0x470   : > { %4437 = vmatpush1.msra.mxu1 %v1017_v33  ;;  %4902 = vmatpush3.msra.mxu0 %v1157_v5  ;;  %v3630_v14 = vpop.f32.mrf.mxu1  ;;  %v1947_v5 = vrot.slane %v1716_v41, %v6159_v61 }
 0x471   : > { %4438 = vmatprep.subr.mxu1 %v949_v7  ;;  %4903 = vmatprep.subr.mxu0 %v5350_v28  ;;  %v3631_v18 = vadd.f32 %v3630_v14, %v1899_v0  ;;  %v1717_v7 = vld [vmem:[%s5577_s13 + $0x38] sm:$0xff]  ;;  %v1951_v0 = vrot.slane %v1716_v41, %v6166_v4 }
 0x472   : > { %4439 = vmatpush1.msra.mxu1 %v948_v9  ;;  %4904 = vmatpush3.msra.mxu0 %v1088_v10  ;;  %v3632_v16 = vpop.f32.mrf.mxu1  ;;  %v1959_v14 = vrot.slane %v1717_v7, %v6034_v8 }
 0x473   : > { %4440 = vmatprep.subr.mxu1 %v880_v11  ;;  %4905 = vmatprep.subr.mxu0 %v5350_v28  ;;  %4599 = vst [vmem:[%s5579_s12 + $0x150] sm:$0xff] %v3631_v18  ;;  %v3633_v26 = vadd.f32 %v3632_v16, %v1903_v58  ;;  %v1955_v11 = vrot.slane %v1717_v7, %v6025_v2 }
 0x474   : > { %4441 = vmatpush1.msra.mxu1 %v879_v13  ;;  %4906 = vmatpush3.msra.mxu0 %v1019_v12  ;;  %v3701_v6 = vpop.f32.mrf.mxu0  ;;  %v1967_v16 = vrot.slane %v1717_v7, %v6070_v37 }
 0x475   : > { %4442 = vmatprep.subr.mxu1 %v811_v15  ;;  %4907 = vmatprep.subr.mxu0 %v5350_v28  ;;  %4600 = vst [vmem:[%s5579_s12 + $0x158] sm:$0xff] %v3633_v26  ;;  %v3702_v29 = vadd.f32 %v3701_v6, %v1907_v19  ;;  %v1971_v26 = vrot.slane %v1717_v7, %v6117_v23 }
 0x476   : > { %4443 = vmatpush1.msra.mxu1 %v810_v20  ;;  %4908 = vmatpush3.msra.mxu0 %v950_v3  ;;  %v3703_v31 = vpop.f32.mrf.mxu0  ;;  %v1963_v20 = vrot.slane %v1717_v7, %v6062_v32  ;;  %v1975_v6 = vrot.slane %v1717_v7, %v6123_v27 }
 0x477   : > { %4444 = vmatprep.subr.mxu1 %v742_v21  ;;  %4909 = vmatprep.subr.mxu0 %v5350_v28  ;;  %4601 = vst [vmem:[%s5579_s12 + $0x160] sm:$0xff] %v3702_v29  ;;  %v3704_v35 = vadd.f32 %v3703_v31, %v1911_v48  ;;  %v1979_v31 = vrot.slane %v1717_v7, %v6159_v61 }
 0x478   : > { %4445 = vmatpush1.msra.mxu1 %v741_v22  ;;  %4910 = vmatpush3.msra.mxu0 %v881_v24 }
 0x479   : > { %4446 = vmatprep.subr.mxu1 %v673_v25  ;;  %4911 = vmatprep.subr.mxu0 %v5350_v28  ;;  %4602 = vst [vmem:[%s5579_s12 + $0x168] sm:$0xff] %v3704_v35  ;;  %v1983_v35 = vrot.slane %v1717_v7, %v6166_v4 }
 0x47a   : > { %4447 = vmatpush1.msra.mxu1 %v672_v30  ;;  %4480 = vmatprep.mubr.f32.mxu1 %v5350_v28 }
 0x47b   : > { %4912 = vmatpush3.msra.mxu0 %v812_v34  ;;  %4481 = vmatmul.mubr.f32.vlgmr.msra.gmra.mxu1 %v5055_v38  ;;  %v1718_v34 = vld [vmem:[%s5577_s13 + $0x40] sm:$0x1f] }
 0x47c   : > { %4913 = vmatprep.subr.mxu0 %v5350_v28  ;;  %4917 = vmatprep.mubr.msk.f32.mxu0 %vm5351_vm3, %v5350_v28  ;;  %v1995_v4 = vrot.slane %v1718_v34, %v6062_v32 }
 0x47d   : > { %4914 = vmatpush3.msra.mxu0 %v743_v36 }
 0x47e   : > { %4915 = vmatprep.subr.mxu0 %v5350_v28  ;;  %v1927_v28 = vrot.slane %v1716_v41, %v6034_v8  ;;  %v1991_v41 = vrot.slane %v1718_v34, %v6034_v8 }
 0x47f   : > { %4916 = vmatpush3.msra.mxu0 %v674_v39  ;;  %v1987_v39 = vrot.slane %v1718_v34, %v6025_v2  ;;  %v1999_v2 = vrot.slane %v1718_v34, %v6070_v37 }
 0x480   : > { %4918 = vmatmul.mubr.f32.vlgmr.msra.gmra.mxu0 %v5055_v38 }
 0x492   : > { %v3772_v43 = vpop.f32.mrf.mxu1 }
 0x493   : > { %v3773_v44 = vadd.f32 %v3772_v43, %v1915_v40 }
 0x494   : > { %v3774_v45 = vpop.f32.mrf.mxu1 }
 0x495   : > { %4603 = vst [vmem:[%s5579_s12 + $0x170] sm:$0xff] %v3773_v44  ;;  %v3775_v46 = vadd.f32 %v3774_v45, %v1919_v42 }
 0x496   : > { %v3843_v47 = vpop.f32.mrf.mxu0 }
 0x497   : > { %4604 = vst [vmem:[%s5579_s12 + $0x178] sm:$0xff] %v3775_v46  ;;  %v3844_v49 = vadd.f32 %v3843_v47, %v1923_v17  ;;  %v2003_v46 = vrot.slane %v1718_v34, %v6117_v23 }
 0x498   : > { %v3845_v50 = vpop.f32.mrf.mxu0 }
 0x499   : > { %4605 = vst [vmem:[%s5579_s12 + $0x180] sm:$0xff] %v3844_v49  ;;  %v3846_v51 = vadd.f32 %v3845_v50, %v1927_v28 }
 0x49b   : > { %4606 = vst [vmem:[%s5579_s12 + $0x188] sm:$0xff] %v3846_v51 }
 0x4b4   : > { %v3914_v53 = vpop.f32.mrf.mxu1 }
 0x4b5   : > { %v3915_v54 = vadd.f32 %v3914_v53, %v1931_v55 }
 0x4b6   : > { %v3916_v57 = vpop.f32.mrf.mxu1 }
 0x4b7   : > { %4607 = vst [vmem:[%s5579_s12 + $0x190] sm:$0xff] %v3915_v54  ;;  %v3917_v59 = vadd.f32 %v3916_v57, %v1935_v52 }
 0x4b8   : > { %v3985_v62 = vpop.f32.mrf.mxu0 }
 0x4b9   : > { %4608 = vst [vmem:[%s5579_s12 + $0x198] sm:$0xff] %v3917_v59  ;;  %v3986_v63 = vadd.f32 %v3985_v62, %v1939_v56 }
 0x4ba   : > { %v3987_v1 = vpop.f32.mrf.mxu0 }
 0x4bb   : > { %4609 = vst [vmem:[%s5579_s12 + $0x1a0] sm:$0xff] %v3986_v63  ;;  %v3988_v33 = vadd.f32 %v3987_v1, %v1943_v60 }
 0x4bd   : > { %4610 = vst [vmem:[%s5579_s12 + $0x1a8] sm:$0xff] %v3988_v33 }
 0x4d6   : > { %v4056_v9 = vpop.f32.mrf.mxu1 }
 0x4d7   : > { %v4057_v10 = vadd.f32 %v4056_v9, %v1947_v5 }
 0x4d8   : > { %v4058_v58 = vpop.f32.mrf.mxu1 }
 0x4d9   : > { %4611 = vst [vmem:[%s5579_s12 + $0x1b0] sm:$0xff] %v4057_v10  ;;  %v4059_v13 = vadd.f32 %v4058_v58, %v1951_v0 }
 0x4da   : > { %v4127_v12 = vpop.f32.mrf.mxu0 }
 0x4db   : > { %4612 = vst [vmem:[%s5579_s12 + $0x1b8] sm:$0xff] %v4059_v13  ;;  %v4128_v15 = vadd.f32 %v4127_v12, %v1955_v11 }
 0x4dc   : > { %v4129_v18 = vpop.f32.mrf.mxu0 }
 0x4dd   : > { %4613 = vst [vmem:[%s5579_s12 + $0x1c0] sm:$0xff] %v4128_v15  ;;  %v4130_v19 = vadd.f32 %v4129_v18, %v1959_v14 }
 0x4df   : > { %4614 = vst [vmem:[%s5579_s12 + $0x1c8] sm:$0xff] %v4130_v19 }
 0x4f8   : > { %v4198_v3 = vpop.f32.mrf.mxu1 }
 0x4f9   : > { %v4199_v21 = vadd.f32 %v4198_v3, %v1963_v20 }
 0x4fa   : > { %v4200_v48 = vpop.f32.mrf.mxu1 }
 0x4fb   : > { %4615 = vst [vmem:[%s5579_s12 + $0x1d0] sm:$0xff] %v4199_v21  ;;  %v4201_v22 = vadd.f32 %v4200_v48, %v1967_v16 }
 0x4fc   : > { %v4269_v24 = vpop.f32.mrf.mxu0 }
 0x4fd   : > { %4616 = vst [vmem:[%s5579_s12 + $0x1d8] sm:$0xff] %v4201_v22  ;;  %v4270_v25 = vadd.f32 %v4269_v24, %v1971_v26 }
 0x4fe   : > { %v4271_v29 = vpop.f32.mrf.mxu0 }
 0x4ff   : > { %4617 = vst [vmem:[%s5579_s12 + $0x1e0] sm:$0xff] %v4270_v25  ;;  %v4272_v30 = vadd.f32 %v4271_v29, %v1975_v6 }
 0x501   : > { %4618 = vst [vmem:[%s5579_s12 + $0x1e8] sm:$0xff] %v4272_v30 }
 0x51a   : > { %v4340_v36 = vpop.f32.mrf.mxu1 }
 0x51b   : > { %v4341_v38 = vadd.f32 %v4340_v36, %v1979_v31 }
 0x51c   : > { %v4342_v27 = vpop.f32.mrf.mxu1 }
 0x51d   : > { %4619 = vst [vmem:[%s5579_s12 + $0x1f0] sm:$0xff] %v4341_v38  ;;  %v4343_v40 = vadd.f32 %v4342_v27, %v1983_v35 }
 0x51e   : > { %v4411_v42 = vpop.f32.mrf.mxu0 }
 0x51f   : > { %4620 = vst [vmem:[%s5579_s12 + $0x1f8] sm:$0xff] %v4343_v40  ;;  %v4412_v43 = vadd.f32 %v4411_v42, %v1987_v39 }
 0x520   : > { %v4413_v61 = vpop.f32.mrf.mxu0 }
 0x521   : > { %4621 = vst [vmem:[%s5579_s12 + $0x200] sm:$0xff] %v4412_v43  ;;  %v4414_v44 = vadd.f32 %v4413_v61, %v1991_v41 }
 0x523   : > { %4622 = vst [vmem:[%s5579_s12 + $0x208] sm:$0xff] %v4414_v44 }
 0x53b   : > { %v4482_v17 = vpop.f32.mrf.mxu1 }
 0x53c   : > { %v4483_v45 = vadd.f32 %v4482_v17, %v1995_v4 }
 0x53d   : > { %v4484_v8 = vpop.f32.mrf.mxu1 }
 0x53e   : > { %4623 = vst [vmem:[%s5579_s12 + $0x210] sm:$0xff] %v4483_v45  ;;  %v4485_v28 = vadd.f32 %v4484_v8, %v1999_v2 }
 0x540   : > { %v4553_v47 = vpop.f32.mrf.mxu0  ;;  %4624 = vst [vmem:[%s5579_s12 + $0x218] sm:$0xff] %v4485_v28 }
 0x541   : > { %v4554_v49 = vadd.f32 %v4553_v47, %v2003_v46 }
 0x542   : > { %v4919_v32 = vpop.f32.mrf.mxu0 }
 0x543   : > { %4625 = vst [vmem:[%s5579_s12 + $0x220] sm:$0xff] %v4554_v49 }
 0x544   : > { %5255 = shalt.err (!%p5252_p0)
}
 0x545   : > { %s5256_s19 = scalar_lea.hbm %s7017_s10, 8832  ;;  %s5260_s21 = scalar_lea.hbm %s7067_s7, 17664 }
 0x546   : > { %p5257_p5 = scmp.ne.s32.totalorder %s7017_s10, %s5256_s19  ;;  %p5261_p13 = scmp.lt.s32.totalorder %s7017_s10, %s7067_s7 }
 0x547   : > { %p5262_p8 = scmp.lt.s32.totalorder %s5260_s21, %s5256_s19 }
 0x548   : > { %p5258_p12 = pnand %p5257_p5, %p5486_p7 }
 0x549   : > { %p5263_p4 = por %p5262_p8, %p5261_p13 }
 0x54a   : > { %p5259_p1 = pneg %p5258_p12 }
 0x54c   : > { %p5264_p2 = pnand %p5263_p4, %p5259_p1 }
 0x54e   : > { %5267 = shalt.err (!%p5264_p2)
}
 0x54f   : > { %4949 = dma.vmem_to_hbm [thread:$0]  (%p5486_p7), %s4644_s9, 8832, %s7017_s10, %s4627_s5  }
 0x550 PF: > { %s7100_s1 = sld [smem:[#allocation21_spill]]  ;;  %s4655_s16 = sand.u32 1, %s5314_s24  }
 0x551   : > { %p7102_p11 = scmp.ge.s32.totalorder %s5334_s29, 2  ;;  %s4656_s13 = scalar_lea.sflag [#allocation5], %s4655_s16 }
 0x556   : > { %p7101_p6 = scmp.ne.s32.totalorder %s7100_s1, 0 }
 0x558   : > { %p4975_p10 = pnand %p7102_p11, %p7101_p6 }
 0x55a   : > { %p4976_p3 = pneg %p4975_p10 }
 0x55c   : > { %5309 = dma.done.wait (%p4976_p3), %s4656_s13, 8832  }
 0x55d   : > { %5311 = vsyncadd (%p4976_p3), %s4656_s13, 4294958464  ;;  %s26_s29 = sadd.s32 1, %s5334_s29   ;;  %s7103_s18 = sld [smem:[#allocation23_spill]] }
 0x55e   : > { %p23_p9 = scmp.ge.s32.totalorder %s26_s29, 4   ;;  %s7104_s12 = sld [smem:[#allocation22_spill]] }
 0x55f   : > { %s7105_s24 = smov %s5318_s25  ;;  %s7106_s25 = smov %s5322_s26 }
 0x560   : > { %s7108_s27 = smov %s5330_s28  ;;  %25 = sbr.rel (!%p23_p9) target bundleno = 13 (0xd), region = 130 }
 0x563   : > { %s7107_s26 = smov %s7103_s18 }
 0x564   : > { %s7109_s28 = smov %s7104_s12 }
 0x565   :  { %4661 = vsyncpa [#allocation4], 1 }
 0x566   :  { %4663 = vsyncpa [#allocation4 + $0x1], 1 }
 0x567   :  { %4664 = vsyncpa [#allocation7], 1 }
 0x568   :  { %4665 = vsyncpa [#allocation10], 1 }
 0x569   :  { %4666 = vsyncpa [#allocation13], 1 }
 0x56a   :  { %4668 = vsyncpa [#allocation13 + $0x1], 1 }
 0x56b   :  { %4669 = vsyncpa [#allocation5], 1 }
 0x56c   :  { %4671 = vsyncpa [#allocation5 + $0x1], 1 }

</bundles_post_ra>
